<compile_context>
chip_gen: v7x
topology: tpu7x:2x2x1
jax: 0.10.0
libtpu: 0.0.40
codegen_flags: <defaults>
</compile_context>

<pallas_src>
import jax
import jax.numpy as jnp
from jax import lax
from jax.experimental import pallas as pl
from jax.experimental.pallas import tpu as pltpu


def _round_up(x, m):
    return ((x + m - 1) // m) * m


def _pad_gate_cols(w, H, Hp):
    """(..., 3H) -> (..., 3Hp): zero-pad each of the 3 gate blocks (r,z,n) to Hp lanes."""
    if Hp == H:
        return w
    pad = [(0, 0)] * (w.ndim - 1) + [(0, Hp - H)]
    return jnp.concatenate(
        [jnp.pad(w[..., g * H:(g + 1) * H], pad) for g in range(3)], axis=-1)


def make_gru_kernel(num_layers, T, Bp, Hp, unroll):
    """Pallas kernel body.  All refs live in VMEM; single grid point."""

    def kernel(*refs):
        # ---- unpack refs -------------------------------------------------
        x_ref = refs[0]                                        # (T*Bp, D)
        layer_refs = refs[1:1 + 4 * num_layers]                # (Wih, Whh, b_ih, b_hh)
        w1_ref, b1_ref, w2_ref, b2_ref = refs[1 + 4 * num_layers:
                                              1 + 4 * num_layers + 4]
        out_ref = refs[1 + 4 * num_layers + 4]                 # (Bp, Op)
        seq_ref, xg_ref, h_ref = refs[1 + 4 * num_layers + 5:]  # scratch

        # ---- stacked GRU recurrence (PyTorch semantics) -------------------
        for layer in range(num_layers):
            wih = layer_refs[4 * layer][...]                   # (D_in, 3Hp)
            whh = layer_refs[4 * layer + 1][...]               # (Hp,  3Hp)
            b_ih = layer_refs[4 * layer + 2][...]              # (1,   3Hp)
            b_hh = layer_refs[4 * layer + 3][...]              # (1,   3Hp)

            in_ref = x_ref if layer == 0 else seq_ref          # static per layer

            # Hoisted input projection: one big MXU matmul for the whole sequence,
            # bias folded in (cuDNN-style).
            xg_ref[...] = (jnp.dot(in_ref[...], wih,
                                   preferred_element_type=jnp.float32) + b_ih)

            h_ref[...] = jnp.zeros_like(h_ref)                 # h0 = 0
            b_hh_b = jnp.broadcast_to(b_hh, (Bp, 3 * Hp))      # hoisted broadcast

            write_seq = layer < num_layers - 1                 # skip dead last-layer store

            def step(t, carry, whh=whh, b_hh_b=b_hh_b, write_seq=write_seq):
                row = pl.multiple_of(t * Bp, Bp)
                xg = xg_ref[pl.ds(row, Bp), :]                 # (Bp, 3Hp) precomputed
                h = h_ref[...]
                hg = jnp.dot(h, whh,
                             preferred_element_type=jnp.float32) + b_hh_b
                # lane-aligned gate slices (each gate block is Hp=128-lane padded)
                r = jax.nn.sigmoid(xg[:, 0:Hp] + hg[:, 0:Hp])
                z = jax.nn.sigmoid(xg[:, Hp:2 * Hp] + hg[:, Hp:2 * Hp])
                n = jnp.tanh(xg[:, 2 * Hp:3 * Hp] + r * hg[:, 2 * Hp:3 * Hp])
                h_new = (1.0 - z) * n + z * h
                h_ref[...] = h_new
                if write_seq:
                    seq_ref[pl.ds(row, Bp), :] = h_new
                return 0

            lax.fori_loop(0, T, step, 0, unroll=unroll)

        # ---- head: out = fc2(relu(fc1(h_T))) -----------------------------
        h_last = h_ref[...]                                    # (Bp, Hp)
        y = jnp.dot(h_last, w1_ref[...],
                    preferred_element_type=jnp.float32) + b1_ref[...]
        y = jnp.maximum(y, 0.0)
        out_ref[...] = (jnp.dot(y, w2_ref[...],
                                preferred_element_type=jnp.float32) + b2_ref[...])

    return kernel


def gru_forward(x, params, *, num_layers, hidden_size, output_size, fc_size):
    """x: [B, T, D] (batch_first, like PyTorch).  Returns [B, output_size]."""
    B, T, D = x.shape
    H = hidden_size
    SUB, LANE = 8, 128                       # f32 sublane / lane sizes
    Bp = _round_up(B, SUB)
    Hp = _round_up(H, LANE)
    Fp = _round_up(fc_size, LANE)
    Op = _round_up(output_size, LANE)

    # time-major, batch padded to sublane multiple, flattened to (T*Bp, D)
    x_tm = jnp.transpose(x, (1, 0, 2))                          # [T, B, D]
    x_tm = jnp.pad(x_tm, ((0, 0), (0, Bp - B), (0, 0)))
    x_flat = x_tm.reshape(T * Bp, D)

    flat_inputs = [x_flat]
    for layer in range(num_layers):
        wih_t, whh_t, b_ih, b_hh = params["gru"][layer]          # (D_in,3H),(H,3H),(1,3H)x2
        d_in = wih_t.shape[0]
        d_in_p = d_in if layer == 0 else Hp
        wih_p = _pad_gate_cols(jnp.pad(wih_t, ((0, d_in_p - d_in), (0, 0))), H, Hp)
        whh_p = _pad_gate_cols(jnp.pad(whh_t, ((0, Hp - H), (0, 0))), H, Hp)
        flat_inputs += [wih_p, whh_p,
                        _pad_gate_cols(b_ih, H, Hp),
                        _pad_gate_cols(b_hh, H, Hp)]
    w1 = jnp.pad(params["w1"], ((0, Hp - H), (0, Fp - fc_size)))
    b1 = jnp.pad(params["b1"], ((0, 0), (0, Fp - fc_size)))
    w2 = jnp.pad(params["w2"], ((0, Fp - fc_size), (0, Op - output_size)))
    b2 = jnp.pad(params["b2"], ((0, 0), (0, Op - output_size)))
    flat_inputs += [w1, b1, w2, b2]

    unroll = T if T <= 8 else 8              # cap unroll for long sequences

    # ---- VMEM budget + cost estimate ------------------------------------
    scratch_bytes = 4 * (T * Bp * Hp + T * Bp * 3 * Hp + Bp * Hp)
    in_bytes = sum(int(a.size) * a.dtype.itemsize for a in flat_inputs)
    out_bytes = 4 * Bp * Op
    needed = in_bytes + out_bytes + scratch_bytes
    vmem_limit = int(min(max(2 * needed + (4 << 20), 16 << 20), 100 << 20))

    flops = 0
    d_in = D
    for _ in range(num_layers):
        flops += 2 * T * Bp * d_in * 3 * Hp      # hoisted input projection
        flops += 2 * T * Bp * Hp * 3 * Hp        # recurrent matmuls
        d_in = Hp
    flops += 2 * Bp * Hp * Fp + 2 * Bp * Fp * Op
    transcendentals = num_layers * T * Bp * 3 * Hp

    kernel = make_gru_kernel(num_layers, T, Bp, Hp, unroll)
    vmem = pl.BlockSpec(memory_space=pltpu.MemorySpace.VMEM)

    out = pl.pallas_call(
        kernel,
        out_shape=jax.ShapeDtypeStruct((Bp, Op), jnp.float32),
        in_specs=[vmem] * len(flat_inputs),
        out_specs=vmem,
        scratch_shapes=[
            pltpu.VMEM((T * Bp, Hp), jnp.float32),       # per-layer output sequence
            pltpu.VMEM((T * Bp, 3 * Hp), jnp.float32),   # precomputed input gates
            pltpu.VMEM((Bp, Hp), jnp.float32),           # h state
        ],
        compiler_params=pltpu.CompilerParams(vmem_limit_bytes=vmem_limit),
        cost_estimate=pl.CostEstimate(flops=int(flops),
                                      transcendentals=int(transcendentals),
                                      bytes_accessed=int(in_bytes + out_bytes)),
    )(*flat_inputs)

    return out[:B, :output_size]


def reference_forward(x, params, *, num_layers, hidden_size):
    """Pure-JAX reference with PyTorch GRU semantics (gate order r, z, n)."""
    B, T, D = x.shape
    H = hidden_size
    seq = x
    for layer in range(num_layers):
        wih_t, whh_t, b_ih, b_hh = params["gru"][layer]
        h = jnp.zeros((B, H), jnp.float32)
        outs = []
        for t in range(T):
            xg = seq[:, t, :] @ wih_t + b_ih
            hg = h @ whh_t + b_hh
            r = jax.nn.sigmoid(xg[:, 0:H] + hg[:, 0:H])
            z = jax.nn.sigmoid(xg[:, H:2 * H] + hg[:, H:2 * H])
            n = jnp.tanh(xg[:, 2 * H:3 * H] + r * hg[:, 2 * H:3 * H])
            h = (1.0 - z) * n + z * h
            outs.append(h)
        seq = jnp.stack(outs, axis=1)
    h_last = seq[:, -1, :]
    y = jnp.maximum(h_last @ params["w1"] + params["b1"], 0.0)
    return y @ params["w2"] + params["b2"]


def init_params(key, input_size, hidden_size, num_layers, output_size, fc_size):
    """Deterministic init mimicking PyTorch's U(-1/sqrt(H), 1/sqrt(H)).  Gate order r,z,n."""
    H = hidden_size
    k = 1.0 / jnp.sqrt(jnp.float32(H))
    params = {"gru": []}
    for layer in range(num_layers):
        d_in = input_size if layer == 0 else H
        key, k1, k2, k3, k4 = jax.random.split(key, 5)
        # stored already transposed: [D_in, 3H], [H, 3H]; biases kept separate
        # (b_hh must stay separate: r multiplies the hh "n" term *including* b_hn).
        wih_t = jax.random.uniform(k1, (d_in, 3 * H), jnp.float32, -k, k)
        whh_t = jax.random.uniform(k2, (H, 3 * H), jnp.float32, -k, k)
        b_ih = jax.random.uniform(k3, (1, 3 * H), jnp.float32, -k, k)
        b_hh = jax.random.uniform(k4, (1, 3 * H), jnp.float32, -k, k)
        params["gru"].append((wih_t, whh_t, b_ih, b_hh))
    kf1 = 1.0 / jnp.sqrt(jnp.float32(H))
    kf2 = 1.0 / jnp.sqrt(jnp.float32(fc_size))
    key, k1, k2, k3, k4 = jax.random.split(key, 5)
    params["w1"] = jax.random.uniform(k1, (H, fc_size), jnp.float32, -kf1, kf1)
    params["b1"] = jax.random.uniform(k2, (1, fc_size), jnp.float32, -kf1, kf1)
    params["w2"] = jax.random.uniform(k3, (fc_size, output_size), jnp.float32, -kf2, kf2)
    params["b2"] = jax.random.uniform(k4, (1, output_size), jnp.float32, -kf2, kf2)
    return params


if __name__ == "__main__":
    # Small shapes consistent with the GRU module.
    B, T = 2, 8
    input_size, hidden_size, num_layers = 16, 32, 2
    fc_size, output_size = 32, 8

    key = jax.random.PRNGKey(0)
    key, xk = jax.random.split(key)
    x = jax.random.normal(xk, (B, T, input_size), jnp.float32)   # [B, T, D] batch_first

    params = init_params(key, input_size, hidden_size, num_layers,
                         output_size, fc_size)

    out = gru_forward(x, params, num_layers=num_layers, hidden_size=hidden_size,
                      output_size=output_size, fc_size=fc_size)
    out = jax.block_until_ready(out)

    ref = reference_forward(x, params, num_layers=num_layers,
                            hidden_size=hidden_size)
    assert out.shape == (B, output_size)
    assert jnp.allclose(out, ref, atol=2e-4, rtol=2e-4), "kernel mismatch vs reference"

    # TODO(synk): bn1 (BatchNorm1d) exists in the PyTorch module but is unused in
    # forward(), so it is intentionally not implemented.
    print("KERNEL_OK")
</pallas_src>

<mosaic_0001>
module attributes {stable_mosaic.version = 11 : i64} {
  func.func @kernel(%arg0: memref<64x16xf32, #tpu.memory_space<vmem>>, %arg1: memref<16x384xf32, #tpu.memory_space<vmem>>, %arg2: memref<128x384xf32, #tpu.memory_space<vmem>>, %arg3: memref<1x384xf32, #tpu.memory_space<vmem>>, %arg4: memref<1x384xf32, #tpu.memory_space<vmem>>, %arg5: memref<128x384xf32, #tpu.memory_space<vmem>>, %arg6: memref<128x384xf32, #tpu.memory_space<vmem>>, %arg7: memref<1x384xf32, #tpu.memory_space<vmem>>, %arg8: memref<1x384xf32, #tpu.memory_space<vmem>>, %arg9: memref<128x128xf32, #tpu.memory_space<vmem>>, %arg10: memref<1x128xf32, #tpu.memory_space<vmem>>, %arg11: memref<128x128xf32, #tpu.memory_space<vmem>>, %arg12: memref<1x128xf32, #tpu.memory_space<vmem>>, %arg13: memref<8x128xf32, #tpu.memory_space<vmem>>, %arg14: memref<64x128xf32, #tpu.memory_space<vmem>>, %arg15: memref<64x384xf32, #tpu.memory_space<vmem>>, %arg16: memref<8x128xf32, #tpu.memory_space<vmem>>) attributes {dimension_semantics = [], scalar_prefetch = 0 : i64, scratch_operands = 3 : i64, tpu.core_type = #tpu.core_type<tc>} {
    %c0 = arith.constant 0 : index
    %c0_0 = arith.constant 0 : index
    %0 = vector.load %arg1[%c0, %c0_0] : memref<16x384xf32, #tpu.memory_space<vmem>>, vector<16x384xf32>
    %c0_1 = arith.constant 0 : index
    %c0_2 = arith.constant 0 : index
    %1 = vector.load %arg2[%c0_1, %c0_2] : memref<128x384xf32, #tpu.memory_space<vmem>>, vector<128x384xf32>
    %c0_3 = arith.constant 0 : index
    %c0_4 = arith.constant 0 : index
    %2 = vector.load %arg3[%c0_3, %c0_4] : memref<1x384xf32, #tpu.memory_space<vmem>>, vector<1x384xf32>
    %c0_5 = arith.constant 0 : index
    %c0_6 = arith.constant 0 : index
    %3 = vector.load %arg4[%c0_5, %c0_6] : memref<1x384xf32, #tpu.memory_space<vmem>>, vector<1x384xf32>
    %c0_7 = arith.constant 0 : index
    %c0_8 = arith.constant 0 : index
    %4 = vector.load %arg0[%c0_7, %c0_8] : memref<64x16xf32, #tpu.memory_space<vmem>>, vector<64x16xf32>
    %cst = arith.constant dense<0.000000e+00> : vector<64x384xf32>
    %5 = tpu.matmul %4, %0, %cst {dimension_numbers = #tpu.dot_dimension_numbers<[1], [0], [0], [1], [0, 0, 1, 1], [], []>} : vector<64x16xf32>, vector<16x384xf32>, vector<64x384xf32> -> vector<64x384xf32>
    %6 = vector.broadcast %2 : vector<1x384xf32> to vector<64x384xf32>
    %7 = arith.addf %5, %6 : vector<64x384xf32>
    %c0_9 = arith.constant 0 : index
    %c0_10 = arith.constant 0 : index
    %8 = vector.load %arg15[%c0_9, %c0_10] : memref<64x384xf32, #tpu.memory_space<vmem>>, vector<64x384xf32>
    tpu.vector_store %arg15[%c0_9, %c0_10], %7 {strides = array<i32>} : memref<64x384xf32, #tpu.memory_space<vmem>>, vector<64x384xf32>,
    %cst_11 = arith.constant 0.000000e+00 : f32
    %9 = vector.broadcast %cst_11 : f32 to vector<8x128xf32>
    %c0_12 = arith.constant 0 : index
    %c0_13 = arith.constant 0 : index
    %10 = vector.load %arg16[%c0_12, %c0_13] : memref<8x128xf32, #tpu.memory_space<vmem>>, vector<8x128xf32>
    tpu.vector_store %arg16[%c0_12, %c0_13], %9 {strides = array<i32>} : memref<8x128xf32, #tpu.memory_space<vmem>>, vector<8x128xf32>,
    %11 = vector.shape_cast %3 : vector<1x384xf32> to vector<1x384xf32>
    %12 = vector.broadcast %11 : vector<1x384xf32> to vector<8x384xf32>
    %c0_i32 = arith.constant 0 : i32
    %c8_i32 = arith.constant 8 : i32
    %13 = arith.muli %c0_i32, %c8_i32 : i32
    %14 = tpu.assume_multiple %13, 8 : i32
    %15 = arith.index_cast %14 : i32 to index
    %c0_14 = arith.constant 0 : index
    %16 = vector.load %arg15[%15, %c0_14] : memref<64x384xf32, #tpu.memory_space<vmem>>, vector<8x384xf32>
    %c0_15 = arith.constant 0 : index
    %c0_16 = arith.constant 0 : index
    %17 = vector.load %arg16[%c0_15, %c0_16] : memref<8x128xf32, #tpu.memory_space<vmem>>, vector<8x128xf32>
    %cst_17 = arith.constant dense<0.000000e+00> : vector<8x384xf32>
    %18 = tpu.matmul %17, %1, %cst_17 {dimension_numbers = #tpu.dot_dimension_numbers<[1], [0], [0], [1], [0, 0, 1, 1], [], []>} : vector<8x128xf32>, vector<128x384xf32>, vector<8x384xf32> -> vector<8x384xf32>
    %19 = arith.addf %18, %12 : vector<8x384xf32>
    %20 = vector.extract_strided_slice %16 {offsets = [0, 0], sizes = [8, 128], strides = [1, 1]} : vector<8x384xf32> to vector<8x128xf32>
    %21 = vector.extract_strided_slice %19 {offsets = [0, 0], sizes = [8, 128], strides = [1, 1]} : vector<8x384xf32> to vector<8x128xf32>
    %22 = arith.addf %20, %21 : vector<8x128xf32>
    %23 = arith.negf %22 : vector<8x128xf32>
    %24 = math.exp %23 : vector<8x128xf32>
    %cst_18 = arith.constant 1.000000e+00 : f32
    %25 = vector.broadcast %cst_18 : f32 to vector<8x128xf32>
    %26 = arith.addf %25, %24 : vector<8x128xf32>
    %27 = arith.divf %25, %26 : vector<8x128xf32>
    %28 = vector.extract_strided_slice %16 {offsets = [0, 128], sizes = [8, 128], strides = [1, 1]} : vector<8x384xf32> to vector<8x128xf32>
    %29 = vector.extract_strided_slice %19 {offsets = [0, 128], sizes = [8, 128], strides = [1, 1]} : vector<8x384xf32> to vector<8x128xf32>
    %30 = arith.addf %28, %29 : vector<8x128xf32>
    %31 = arith.negf %30 : vector<8x128xf32>
    %32 = math.exp %31 : vector<8x128xf32>
    %cst_19 = arith.constant 1.000000e+00 : f32
    %33 = vector.broadcast %cst_19 : f32 to vector<8x128xf32>
    %34 = arith.addf %33, %32 : vector<8x128xf32>
    %35 = arith.divf %33, %34 : vector<8x128xf32>
    %36 = vector.extract_strided_slice %16 {offsets = [0, 256], sizes = [8, 128], strides = [1, 1]} : vector<8x384xf32> to vector<8x128xf32>
    %37 = vector.extract_strided_slice %19 {offsets = [0, 256], sizes = [8, 128], strides = [1, 1]} : vector<8x384xf32> to vector<8x128xf32>
    %38 = arith.mulf %27, %37 : vector<8x128xf32>
    %39 = arith.addf %36, %38 : vector<8x128xf32>
    %40 = math.tanh %39 : vector<8x128xf32>
    %cst_20 = arith.constant 1.000000e+00 : f32
    %41 = vector.broadcast %cst_20 : f32 to vector<8x128xf32>
    %42 = arith.subf %41, %35 : vector<8x128xf32>
    %43 = arith.mulf %42, %40 : vector<8x128xf32>
    %44 = arith.mulf %35, %17 : vector<8x128xf32>
    %45 = arith.addf %43, %44 : vector<8x128xf32>
    %c0_21 = arith.constant 0 : index
    %c0_22 = arith.constant 0 : index
    %46 = vector.load %arg16[%c0_21, %c0_22] : memref<8x128xf32, #tpu.memory_space<vmem>>, vector<8x128xf32>
    tpu.vector_store %arg16[%c0_21, %c0_22], %45 {strides = array<i32>} : memref<8x128xf32, #tpu.memory_space<vmem>>, vector<8x128xf32>,
    %47 = arith.index_cast %14 : i32 to index
    %c0_23 = arith.constant 0 : index
    %48 = vector.load %arg14[%47, %c0_23] : memref<64x128xf32, #tpu.memory_space<vmem>>, vector<8x128xf32>
    tpu.vector_store %arg14[%47, %c0_23], %45 {strides = array<i32>} : memref<64x128xf32, #tpu.memory_space<vmem>>, vector<8x128xf32>,
    %c1_i32 = arith.constant 1 : i32
    %c8_i32_24 = arith.constant 8 : i32
    %49 = arith.muli %c1_i32, %c8_i32_24 : i32
    %50 = tpu.assume_multiple %49, 8 : i32
    %51 = arith.index_cast %50 : i32 to index
    %c0_25 = arith.constant 0 : index
    %52 = vector.load %arg15[%51, %c0_25] : memref<64x384xf32, #tpu.memory_space<vmem>>, vector<8x384xf32>
    %c0_26 = arith.constant 0 : index
    %c0_27 = arith.constant 0 : index
    %53 = vector.load %arg16[%c0_26, %c0_27] : memref<8x128xf32, #tpu.memory_space<vmem>>, vector<8x128xf32>
    %cst_28 = arith.constant dense<0.000000e+00> : vector<8x384xf32>
    %54 = tpu.matmul %53, %1, %cst_28 {dimension_numbers = #tpu.dot_dimension_numbers<[1], [0], [0], [1], [0, 0, 1, 1], [], []>} : vector<8x128xf32>, vector<128x384xf32>, vector<8x384xf32> -> vector<8x384xf32>
    %55 = arith.addf %54, %12 : vector<8x384xf32>
    %56 = vector.extract_strided_slice %52 {offsets = [0, 0], sizes = [8, 128], strides = [1, 1]} : vector<8x384xf32> to vector<8x128xf32>
    %57 = vector.extract_strided_slice %55 {offsets = [0, 0], sizes = [8, 128], strides = [1, 1]} : vector<8x384xf32> to vector<8x128xf32>
    %58 = arith.addf %56, %57 : vector<8x128xf32>
    %59 = arith.negf %58 : vector<8x128xf32>
    %60 = math.exp %59 : vector<8x128xf32>
    %cst_29 = arith.constant 1.000000e+00 : f32
    %61 = vector.broadcast %cst_29 : f32 to vector<8x128xf32>
    %62 = arith.addf %61, %60 : vector<8x128xf32>
    %63 = arith.divf %61, %62 : vector<8x128xf32>
    %64 = vector.extract_strided_slice %52 {offsets = [0, 128], sizes = [8, 128], strides = [1, 1]} : vector<8x384xf32> to vector<8x128xf32>
    %65 = vector.extract_strided_slice %55 {offsets = [0, 128], sizes = [8, 128], strides = [1, 1]} : vector<8x384xf32> to vector<8x128xf32>
    %66 = arith.addf %64, %65 : vector<8x128xf32>
    %67 = arith.negf %66 : vector<8x128xf32>
    %68 = math.exp %67 : vector<8x128xf32>
    %cst_30 = arith.constant 1.000000e+00 : f32
    %69 = vector.broadcast %cst_30 : f32 to vector<8x128xf32>
    %70 = arith.addf %69, %68 : vector<8x128xf32>
    %71 = arith.divf %69, %70 : vector<8x128xf32>
    %72 = vector.extract_strided_slice %52 {offsets = [0, 256], sizes = [8, 128], strides = [1, 1]} : vector<8x384xf32> to vector<8x128xf32>
    %73 = vector.extract_strided_slice %55 {offsets = [0, 256], sizes = [8, 128], strides = [1, 1]} : vector<8x384xf32> to vector<8x128xf32>
    %74 = arith.mulf %63, %73 : vector<8x128xf32>
    %75 = arith.addf %72, %74 : vector<8x128xf32>
    %76 = math.tanh %75 : vector<8x128xf32>
    %cst_31 = arith.constant 1.000000e+00 : f32
    %77 = vector.broadcast %cst_31 : f32 to vector<8x128xf32>
    %78 = arith.subf %77, %71 : vector<8x128xf32>
    %79 = arith.mulf %78, %76 : vector<8x128xf32>
    %80 = arith.mulf %71, %53 : vector<8x128xf32>
    %81 = arith.addf %79, %80 : vector<8x128xf32>
    %c0_32 = arith.constant 0 : index
    %c0_33 = arith.constant 0 : index
    %82 = vector.load %arg16[%c0_32, %c0_33] : memref<8x128xf32, #tpu.memory_space<vmem>>, vector<8x128xf32>
    tpu.vector_store %arg16[%c0_32, %c0_33], %81 {strides = array<i32>} : memref<8x128xf32, #tpu.memory_space<vmem>>, vector<8x128xf32>,
    %83 = arith.index_cast %50 : i32 to index
    %c0_34 = arith.constant 0 : index
    %84 = vector.load %arg14[%83, %c0_34] : memref<64x128xf32, #tpu.memory_space<vmem>>, vector<8x128xf32>
    tpu.vector_store %arg14[%83, %c0_34], %81 {strides = array<i32>} : memref<64x128xf32, #tpu.memory_space<vmem>>, vector<8x128xf32>,
    %c2_i32 = arith.constant 2 : i32
    %c8_i32_35 = arith.constant 8 : i32
    %85 = arith.muli %c2_i32, %c8_i32_35 : i32
    %86 = tpu.assume_multiple %85, 8 : i32
    %87 = arith.index_cast %86 : i32 to index
    %c0_36 = arith.constant 0 : index
    %88 = vector.load %arg15[%87, %c0_36] : memref<64x384xf32, #tpu.memory_space<vmem>>, vector<8x384xf32>
    %c0_37 = arith.constant 0 : index
    %c0_38 = arith.constant 0 : index
    %89 = vector.load %arg16[%c0_37, %c0_38] : memref<8x128xf32, #tpu.memory_space<vmem>>, vector<8x128xf32>
    %cst_39 = arith.constant dense<0.000000e+00> : vector<8x384xf32>
    %90 = tpu.matmul %89, %1, %cst_39 {dimension_numbers = #tpu.dot_dimension_numbers<[1], [0], [0], [1], [0, 0, 1, 1], [], []>} : vector<8x128xf32>, vector<128x384xf32>, vector<8x384xf32> -> vector<8x384xf32>
    %91 = arith.addf %90, %12 : vector<8x384xf32>
    %92 = vector.extract_strided_slice %88 {offsets = [0, 0], sizes = [8, 128], strides = [1, 1]} : vector<8x384xf32> to vector<8x128xf32>
    %93 = vector.extract_strided_slice %91 {offsets = [0, 0], sizes = [8, 128], strides = [1, 1]} : vector<8x384xf32> to vector<8x128xf32>
    %94 = arith.addf %92, %93 : vector<8x128xf32>
    %95 = arith.negf %94 : vector<8x128xf32>
    %96 = math.exp %95 : vector<8x128xf32>
    %cst_40 = arith.constant 1.000000e+00 : f32
    %97 = vector.broadcast %cst_40 : f32 to vector<8x128xf32>
    %98 = arith.addf %97, %96 : vector<8x128xf32>
    %99 = arith.divf %97, %98 : vector<8x128xf32>
    %100 = vector.extract_strided_slice %88 {offsets = [0, 128], sizes = [8, 128], strides = [1, 1]} : vector<8x384xf32> to vector<8x128xf32>
    %101 = vector.extract_strided_slice %91 {offsets = [0, 128], sizes = [8, 128], strides = [1, 1]} : vector<8x384xf32> to vector<8x128xf32>
    %102 = arith.addf %100, %101 : vector<8x128xf32>
    %103 = arith.negf %102 : vector<8x128xf32>
    %104 = math.exp %103 : vector<8x128xf32>
    %cst_41 = arith.constant 1.000000e+00 : f32
    %105 = vector.broadcast %cst_41 : f32 to vector<8x128xf32>
    %106 = arith.addf %105, %104 : vector<8x128xf32>
    %107 = arith.divf %105, %106 : vector<8x128xf32>
    %108 = vector.extract_strided_slice %88 {offsets = [0, 256], sizes = [8, 128], strides = [1, 1]} : vector<8x384xf32> to vector<8x128xf32>
    %109 = vector.extract_strided_slice %91 {offsets = [0, 256], sizes = [8, 128], strides = [1, 1]} : vector<8x384xf32> to vector<8x128xf32>
    %110 = arith.mulf %99, %109 : vector<8x128xf32>
    %111 = arith.addf %108, %110 : vector<8x128xf32>
    %112 = math.tanh %111 : vector<8x128xf32>
    %cst_42 = arith.constant 1.000000e+00 : f32
    %113 = vector.broadcast %cst_42 : f32 to vector<8x128xf32>
    %114 = arith.subf %113, %107 : vector<8x128xf32>
    %115 = arith.mulf %114, %112 : vector<8x128xf32>
    %116 = arith.mulf %107, %89 : vector<8x128xf32>
    %117 = arith.addf %115, %116 : vector<8x128xf32>
    %c0_43 = arith.constant 0 : index
    %c0_44 = arith.constant 0 : index
    %118 = vector.load %arg16[%c0_43, %c0_44] : memref<8x128xf32, #tpu.memory_space<vmem>>, vector<8x128xf32>
    tpu.vector_store %arg16[%c0_43, %c0_44], %117 {strides = array<i32>} : memref<8x128xf32, #tpu.memory_space<vmem>>, vector<8x128xf32>,
    %119 = arith.index_cast %86 : i32 to index
    %c0_45 = arith.constant 0 : index
    %120 = vector.load %arg14[%119, %c0_45] : memref<64x128xf32, #tpu.memory_space<vmem>>, vector<8x128xf32>
    tpu.vector_store %arg14[%119, %c0_45], %117 {strides = array<i32>} : memref<64x128xf32, #tpu.memory_space<vmem>>, vector<8x128xf32>,
    %c3_i32 = arith.constant 3 : i32
    %c8_i32_46 = arith.constant 8 : i32
    %121 = arith.muli %c3_i32, %c8_i32_46 : i32
    %122 = tpu.assume_multiple %121, 8 : i32
    %123 = arith.index_cast %122 : i32 to index
    %c0_47 = arith.constant 0 : index
    %124 = vector.load %arg15[%123, %c0_47] : memref<64x384xf32, #tpu.memory_space<vmem>>, vector<8x384xf32>
    %c0_48 = arith.constant 0 : index
    %c0_49 = arith.constant 0 : index
    %125 = vector.load %arg16[%c0_48, %c0_49] : memref<8x128xf32, #tpu.memory_space<vmem>>, vector<8x128xf32>
    %cst_50 = arith.constant dense<0.000000e+00> : vector<8x384xf32>
    %126 = tpu.matmul %125, %1, %cst_50 {dimension_numbers = #tpu.dot_dimension_numbers<[1], [0], [0], [1], [0, 0, 1, 1], [], []>} : vector<8x128xf32>, vector<128x384xf32>, vector<8x384xf32> -> vector<8x384xf32>
    %127 = arith.addf %126, %12 : vector<8x384xf32>
    %128 = vector.extract_strided_slice %124 {offsets = [0, 0], sizes = [8, 128], strides = [1, 1]} : vector<8x384xf32> to vector<8x128xf32>
    %129 = vector.extract_strided_slice %127 {offsets = [0, 0], sizes = [8, 128], strides = [1, 1]} : vector<8x384xf32> to vector<8x128xf32>
    %130 = arith.addf %128, %129 : vector<8x128xf32>
    %131 = arith.negf %130 : vector<8x128xf32>
    %132 = math.exp %131 : vector<8x128xf32>
    %cst_51 = arith.constant 1.000000e+00 : f32
    %133 = vector.broadcast %cst_51 : f32 to vector<8x128xf32>
    %134 = arith.addf %133, %132 : vector<8x128xf32>
    %135 = arith.divf %133, %134 : vector<8x128xf32>
    %136 = vector.extract_strided_slice %124 {offsets = [0, 128], sizes = [8, 128], strides = [1, 1]} : vector<8x384xf32> to vector<8x128xf32>
    %137 = vector.extract_strided_slice %127 {offsets = [0, 128], sizes = [8, 128], strides = [1, 1]} : vector<8x384xf32> to vector<8x128xf32>
    %138 = arith.addf %136, %137 : vector<8x128xf32>
    %139 = arith.negf %138 : vector<8x128xf32>
    %140 = math.exp %139 : vector<8x128xf32>
    %cst_52 = arith.constant 1.000000e+00 : f32
    %141 = vector.broadcast %cst_52 : f32 to vector<8x128xf32>
    %142 = arith.addf %141, %140 : vector<8x128xf32>
    %143 = arith.divf %141, %142 : vector<8x128xf32>
    %144 = vector.extract_strided_slice %124 {offsets = [0, 256], sizes = [8, 128], strides = [1, 1]} : vector<8x384xf32> to vector<8x128xf32>
    %145 = vector.extract_strided_slice %127 {offsets = [0, 256], sizes = [8, 128], strides = [1, 1]} : vector<8x384xf32> to vector<8x128xf32>
    %146 = arith.mulf %135, %145 : vector<8x128xf32>
    %147 = arith.addf %144, %146 : vector<8x128xf32>
    %148 = math.tanh %147 : vector<8x128xf32>
    %cst_53 = arith.constant 1.000000e+00 : f32
    %149 = vector.broadcast %cst_53 : f32 to vector<8x128xf32>
    %150 = arith.subf %149, %143 : vector<8x128xf32>
    %151 = arith.mulf %150, %148 : vector<8x128xf32>
    %152 = arith.mulf %143, %125 : vector<8x128xf32>
    %153 = arith.addf %151, %152 : vector<8x128xf32>
    %c0_54 = arith.constant 0 : index
    %c0_55 = arith.constant 0 : index
    %154 = vector.load %arg16[%c0_54, %c0_55] : memref<8x128xf32, #tpu.memory_space<vmem>>, vector<8x128xf32>
    tpu.vector_store %arg16[%c0_54, %c0_55], %153 {strides = array<i32>} : memref<8x128xf32, #tpu.memory_space<vmem>>, vector<8x128xf32>,
    %155 = arith.index_cast %122 : i32 to index
    %c0_56 = arith.constant 0 : index
    %156 = vector.load %arg14[%155, %c0_56] : memref<64x128xf32, #tpu.memory_space<vmem>>, vector<8x128xf32>
    tpu.vector_store %arg14[%155, %c0_56], %153 {strides = array<i32>} : memref<64x128xf32, #tpu.memory_space<vmem>>, vector<8x128xf32>,
    %c4_i32 = arith.constant 4 : i32
    %c8_i32_57 = arith.constant 8 : i32
    %157 = arith.muli %c4_i32, %c8_i32_57 : i32
    %158 = tpu.assume_multiple %157, 8 : i32
    %159 = arith.index_cast %158 : i32 to index
    %c0_58 = arith.constant 0 : index
    %160 = vector.load %arg15[%159, %c0_58] : memref<64x384xf32, #tpu.memory_space<vmem>>, vector<8x384xf32>
    %c0_59 = arith.constant 0 : index
    %c0_60 = arith.constant 0 : index
    %161 = vector.load %arg16[%c0_59, %c0_60] : memref<8x128xf32, #tpu.memory_space<vmem>>, vector<8x128xf32>
    %cst_61 = arith.constant dense<0.000000e+00> : vector<8x384xf32>
    %162 = tpu.matmul %161, %1, %cst_61 {dimension_numbers = #tpu.dot_dimension_numbers<[1], [0], [0], [1], [0, 0, 1, 1], [], []>} : vector<8x128xf32>, vector<128x384xf32>, vector<8x384xf32> -> vector<8x384xf32>
    %163 = arith.addf %162, %12 : vector<8x384xf32>
    %164 = vector.extract_strided_slice %160 {offsets = [0, 0], sizes = [8, 128], strides = [1, 1]} : vector<8x384xf32> to vector<8x128xf32>
    %165 = vector.extract_strided_slice %163 {offsets = [0, 0], sizes = [8, 128], strides = [1, 1]} : vector<8x384xf32> to vector<8x128xf32>
    %166 = arith.addf %164, %165 : vector<8x128xf32>
    %167 = arith.negf %166 : vector<8x128xf32>
    %168 = math.exp %167 : vector<8x128xf32>
    %cst_62 = arith.constant 1.000000e+00 : f32
    %169 = vector.broadcast %cst_62 : f32 to vector<8x128xf32>
    %170 = arith.addf %169, %168 : vector<8x128xf32>
    %171 = arith.divf %169, %170 : vector<8x128xf32>
    %172 = vector.extract_strided_slice %160 {offsets = [0, 128], sizes = [8, 128], strides = [1, 1]} : vector<8x384xf32> to vector<8x128xf32>
    %173 = vector.extract_strided_slice %163 {offsets = [0, 128], sizes = [8, 128], strides = [1, 1]} : vector<8x384xf32> to vector<8x128xf32>
    %174 = arith.addf %172, %173 : vector<8x128xf32>
    %175 = arith.negf %174 : vector<8x128xf32>
    %176 = math.exp %175 : vector<8x128xf32>
    %cst_63 = arith.constant 1.000000e+00 : f32
    %177 = vector.broadcast %cst_63 : f32 to vector<8x128xf32>
    %178 = arith.addf %177, %176 : vector<8x128xf32>
    %179 = arith.divf %177, %178 : vector<8x128xf32>
    %180 = vector.extract_strided_slice %160 {offsets = [0, 256], sizes = [8, 128], strides = [1, 1]} : vector<8x384xf32> to vector<8x128xf32>
    %181 = vector.extract_strided_slice %163 {offsets = [0, 256], sizes = [8, 128], strides = [1, 1]} : vector<8x384xf32> to vector<8x128xf32>
    %182 = arith.mulf %171, %181 : vector<8x128xf32>
    %183 = arith.addf %180, %182 : vector<8x128xf32>
    %184 = math.tanh %183 : vector<8x128xf32>
    %cst_64 = arith.constant 1.000000e+00 : f32
    %185 = vector.broadcast %cst_64 : f32 to vector<8x128xf32>
    %186 = arith.subf %185, %179 : vector<8x128xf32>
    %187 = arith.mulf %186, %184 : vector<8x128xf32>
    %188 = arith.mulf %179, %161 : vector<8x128xf32>
    %189 = arith.addf %187, %188 : vector<8x128xf32>
    %c0_65 = arith.constant 0 : index
    %c0_66 = arith.constant 0 : index
    %190 = vector.load %arg16[%c0_65, %c0_66] : memref<8x128xf32, #tpu.memory_space<vmem>>, vector<8x128xf32>
    tpu.vector_store %arg16[%c0_65, %c0_66], %189 {strides = array<i32>} : memref<8x128xf32, #tpu.memory_space<vmem>>, vector<8x128xf32>,
    %191 = arith.index_cast %158 : i32 to index
    %c0_67 = arith.constant 0 : index
    %192 = vector.load %arg14[%191, %c0_67] : memref<64x128xf32, #tpu.memory_space<vmem>>, vector<8x128xf32>
    tpu.vector_store %arg14[%191, %c0_67], %189 {strides = array<i32>} : memref<64x128xf32, #tpu.memory_space<vmem>>, vector<8x128xf32>,
    %c5_i32 = arith.constant 5 : i32
    %c8_i32_68 = arith.constant 8 : i32
    %193 = arith.muli %c5_i32, %c8_i32_68 : i32
    %194 = tpu.assume_multiple %193, 8 : i32
    %195 = arith.index_cast %194 : i32 to index
    %c0_69 = arith.constant 0 : index
    %196 = vector.load %arg15[%195, %c0_69] : memref<64x384xf32, #tpu.memory_space<vmem>>, vector<8x384xf32>
    %c0_70 = arith.constant 0 : index
    %c0_71 = arith.constant 0 : index
    %197 = vector.load %arg16[%c0_70, %c0_71] : memref<8x128xf32, #tpu.memory_space<vmem>>, vector<8x128xf32>
    %cst_72 = arith.constant dense<0.000000e+00> : vector<8x384xf32>
    %198 = tpu.matmul %197, %1, %cst_72 {dimension_numbers = #tpu.dot_dimension_numbers<[1], [0], [0], [1], [0, 0, 1, 1], [], []>} : vector<8x128xf32>, vector<128x384xf32>, vector<8x384xf32> -> vector<8x384xf32>
    %199 = arith.addf %198, %12 : vector<8x384xf32>
    %200 = vector.extract_strided_slice %196 {offsets = [0, 0], sizes = [8, 128], strides = [1, 1]} : vector<8x384xf32> to vector<8x128xf32>
    %201 = vector.extract_strided_slice %199 {offsets = [0, 0], sizes = [8, 128], strides = [1, 1]} : vector<8x384xf32> to vector<8x128xf32>
    %202 = arith.addf %200, %201 : vector<8x128xf32>
    %203 = arith.negf %202 : vector<8x128xf32>
    %204 = math.exp %203 : vector<8x128xf32>
    %cst_73 = arith.constant 1.000000e+00 : f32
    %205 = vector.broadcast %cst_73 : f32 to vector<8x128xf32>
    %206 = arith.addf %205, %204 : vector<8x128xf32>
    %207 = arith.divf %205, %206 : vector<8x128xf32>
    %208 = vector.extract_strided_slice %196 {offsets = [0, 128], sizes = [8, 128], strides = [1, 1]} : vector<8x384xf32> to vector<8x128xf32>
    %209 = vector.extract_strided_slice %199 {offsets = [0, 128], sizes = [8, 128], strides = [1, 1]} : vector<8x384xf32> to vector<8x128xf32>
    %210 = arith.addf %208, %209 : vector<8x128xf32>
    %211 = arith.negf %210 : vector<8x128xf32>
    %212 = math.exp %211 : vector<8x128xf32>
    %cst_74 = arith.constant 1.000000e+00 : f32
    %213 = vector.broadcast %cst_74 : f32 to vector<8x128xf32>
    %214 = arith.addf %213, %212 : vector<8x128xf32>
    %215 = arith.divf %213, %214 : vector<8x128xf32>
    %216 = vector.extract_strided_slice %196 {offsets = [0, 256], sizes = [8, 128], strides = [1, 1]} : vector<8x384xf32> to vector<8x128xf32>
    %217 = vector.extract_strided_slice %199 {offsets = [0, 256], sizes = [8, 128], strides = [1, 1]} : vector<8x384xf32> to vector<8x128xf32>
    %218 = arith.mulf %207, %217 : vector<8x128xf32>
    %219 = arith.addf %216, %218 : vector<8x128xf32>
    %220 = math.tanh %219 : vector<8x128xf32>
    %cst_75 = arith.constant 1.000000e+00 : f32
    %221 = vector.broadcast %cst_75 : f32 to vector<8x128xf32>
    %222 = arith.subf %221, %215 : vector<8x128xf32>
    %223 = arith.mulf %222, %220 : vector<8x128xf32>
    %224 = arith.mulf %215, %197 : vector<8x128xf32>
    %225 = arith.addf %223, %224 : vector<8x128xf32>
    %c0_76 = arith.constant 0 : index
    %c0_77 = arith.constant 0 : index
    %226 = vector.load %arg16[%c0_76, %c0_77] : memref<8x128xf32, #tpu.memory_space<vmem>>, vector<8x128xf32>
    tpu.vector_store %arg16[%c0_76, %c0_77], %225 {strides = array<i32>} : memref<8x128xf32, #tpu.memory_space<vmem>>, vector<8x128xf32>,
    %227 = arith.index_cast %194 : i32 to index
    %c0_78 = arith.constant 0 : index
    %228 = vector.load %arg14[%227, %c0_78] : memref<64x128xf32, #tpu.memory_space<vmem>>, vector<8x128xf32>
    tpu.vector_store %arg14[%227, %c0_78], %225 {strides = array<i32>} : memref<64x128xf32, #tpu.memory_space<vmem>>, vector<8x128xf32>,
    %c6_i32 = arith.constant 6 : i32
    %c8_i32_79 = arith.constant 8 : i32
    %229 = arith.muli %c6_i32, %c8_i32_79 : i32
    %230 = tpu.assume_multiple %229, 8 : i32
    %231 = arith.index_cast %230 : i32 to index
    %c0_80 = arith.constant 0 : index
    %232 = vector.load %arg15[%231, %c0_80] : memref<64x384xf32, #tpu.memory_space<vmem>>, vector<8x384xf32>
    %c0_81 = arith.constant 0 : index
    %c0_82 = arith.constant 0 : index
    %233 = vector.load %arg16[%c0_81, %c0_82] : memref<8x128xf32, #tpu.memory_space<vmem>>, vector<8x128xf32>
    %cst_83 = arith.constant dense<0.000000e+00> : vector<8x384xf32>
    %234 = tpu.matmul %233, %1, %cst_83 {dimension_numbers = #tpu.dot_dimension_numbers<[1], [0], [0], [1], [0, 0, 1, 1], [], []>} : vector<8x128xf32>, vector<128x384xf32>, vector<8x384xf32> -> vector<8x384xf32>
    %235 = arith.addf %234, %12 : vector<8x384xf32>
    %236 = vector.extract_strided_slice %232 {offsets = [0, 0], sizes = [8, 128], strides = [1, 1]} : vector<8x384xf32> to vector<8x128xf32>
    %237 = vector.extract_strided_slice %235 {offsets = [0, 0], sizes = [8, 128], strides = [1, 1]} : vector<8x384xf32> to vector<8x128xf32>
    %238 = arith.addf %236, %237 : vector<8x128xf32>
    %239 = arith.negf %238 : vector<8x128xf32>
    %240 = math.exp %239 : vector<8x128xf32>
    %cst_84 = arith.constant 1.000000e+00 : f32
    %241 = vector.broadcast %cst_84 : f32 to vector<8x128xf32>
    %242 = arith.addf %241, %240 : vector<8x128xf32>
    %243 = arith.divf %241, %242 : vector<8x128xf32>
    %244 = vector.extract_strided_slice %232 {offsets = [0, 128], sizes = [8, 128], strides = [1, 1]} : vector<8x384xf32> to vector<8x128xf32>
    %245 = vector.extract_strided_slice %235 {offsets = [0, 128], sizes = [8, 128], strides = [1, 1]} : vector<8x384xf32> to vector<8x128xf32>
    %246 = arith.addf %244, %245 : vector<8x128xf32>
    %247 = arith.negf %246 : vector<8x128xf32>
    %248 = math.exp %247 : vector<8x128xf32>
    %cst_85 = arith.constant 1.000000e+00 : f32
    %249 = vector.broadcast %cst_85 : f32 to vector<8x128xf32>
    %250 = arith.addf %249, %248 : vector<8x128xf32>
    %251 = arith.divf %249, %250 : vector<8x128xf32>
    %252 = vector.extract_strided_slice %232 {offsets = [0, 256], sizes = [8, 128], strides = [1, 1]} : vector<8x384xf32> to vector<8x128xf32>
    %253 = vector.extract_strided_slice %235 {offsets = [0, 256], sizes = [8, 128], strides = [1, 1]} : vector<8x384xf32> to vector<8x128xf32>
    %254 = arith.mulf %243, %253 : vector<8x128xf32>
    %255 = arith.addf %252, %254 : vector<8x128xf32>
    %256 = math.tanh %255 : vector<8x128xf32>
    %cst_86 = arith.constant 1.000000e+00 : f32
    %257 = vector.broadcast %cst_86 : f32 to vector<8x128xf32>
    %258 = arith.subf %257, %251 : vector<8x128xf32>
    %259 = arith.mulf %258, %256 : vector<8x128xf32>
    %260 = arith.mulf %251, %233 : vector<8x128xf32>
    %261 = arith.addf %259, %260 : vector<8x128xf32>
    %c0_87 = arith.constant 0 : index
    %c0_88 = arith.constant 0 : index
    %262 = vector.load %arg16[%c0_87, %c0_88] : memref<8x128xf32, #tpu.memory_space<vmem>>, vector<8x128xf32>
    tpu.vector_store %arg16[%c0_87, %c0_88], %261 {strides = array<i32>} : memref<8x128xf32, #tpu.memory_space<vmem>>, vector<8x128xf32>,
    %263 = arith.index_cast %230 : i32 to index
    %c0_89 = arith.constant 0 : index
    %264 = vector.load %arg14[%263, %c0_89] : memref<64x128xf32, #tpu.memory_space<vmem>>, vector<8x128xf32>
    tpu.vector_store %arg14[%263, %c0_89], %261 {strides = array<i32>} : memref<64x128xf32, #tpu.memory_space<vmem>>, vector<8x128xf32>,
    %c7_i32 = arith.constant 7 : i32
    %c8_i32_90 = arith.constant 8 : i32
    %265 = arith.muli %c7_i32, %c8_i32_90 : i32
    %266 = tpu.assume_multiple %265, 8 : i32
    %267 = arith.index_cast %266 : i32 to index
    %c0_91 = arith.constant 0 : index
    %268 = vector.load %arg15[%267, %c0_91] : memref<64x384xf32, #tpu.memory_space<vmem>>, vector<8x384xf32>
    %c0_92 = arith.constant 0 : index
    %c0_93 = arith.constant 0 : index
    %269 = vector.load %arg16[%c0_92, %c0_93] : memref<8x128xf32, #tpu.memory_space<vmem>>, vector<8x128xf32>
    %cst_94 = arith.constant dense<0.000000e+00> : vector<8x384xf32>
    %270 = tpu.matmul %269, %1, %cst_94 {dimension_numbers = #tpu.dot_dimension_numbers<[1], [0], [0], [1], [0, 0, 1, 1], [], []>} : vector<8x128xf32>, vector<128x384xf32>, vector<8x384xf32> -> vector<8x384xf32>
    %271 = arith.addf %270, %12 : vector<8x384xf32>
    %272 = vector.extract_strided_slice %268 {offsets = [0, 0], sizes = [8, 128], strides = [1, 1]} : vector<8x384xf32> to vector<8x128xf32>
    %273 = vector.extract_strided_slice %271 {offsets = [0, 0], sizes = [8, 128], strides = [1, 1]} : vector<8x384xf32> to vector<8x128xf32>
    %274 = arith.addf %272, %273 : vector<8x128xf32>
    %275 = arith.negf %274 : vector<8x128xf32>
    %276 = math.exp %275 : vector<8x128xf32>
    %cst_95 = arith.constant 1.000000e+00 : f32
    %277 = vector.broadcast %cst_95 : f32 to vector<8x128xf32>
    %278 = arith.addf %277, %276 : vector<8x128xf32>
    %279 = arith.divf %277, %278 : vector<8x128xf32>
    %280 = vector.extract_strided_slice %268 {offsets = [0, 128], sizes = [8, 128], strides = [1, 1]} : vector<8x384xf32> to vector<8x128xf32>
    %281 = vector.extract_strided_slice %271 {offsets = [0, 128], sizes = [8, 128], strides = [1, 1]} : vector<8x384xf32> to vector<8x128xf32>
    %282 = arith.addf %280, %281 : vector<8x128xf32>
    %283 = arith.negf %282 : vector<8x128xf32>
    %284 = math.exp %283 : vector<8x128xf32>
    %cst_96 = arith.constant 1.000000e+00 : f32
    %285 = vector.broadcast %cst_96 : f32 to vector<8x128xf32>
    %286 = arith.addf %285, %284 : vector<8x128xf32>
    %287 = arith.divf %285, %286 : vector<8x128xf32>
    %288 = vector.extract_strided_slice %268 {offsets = [0, 256], sizes = [8, 128], strides = [1, 1]} : vector<8x384xf32> to vector<8x128xf32>
    %289 = vector.extract_strided_slice %271 {offsets = [0, 256], sizes = [8, 128], strides = [1, 1]} : vector<8x384xf32> to vector<8x128xf32>
    %290 = arith.mulf %279, %289 : vector<8x128xf32>
    %291 = arith.addf %288, %290 : vector<8x128xf32>
    %292 = math.tanh %291 : vector<8x128xf32>
    %cst_97 = arith.constant 1.000000e+00 : f32
    %293 = vector.broadcast %cst_97 : f32 to vector<8x128xf32>
    %294 = arith.subf %293, %287 : vector<8x128xf32>
    %295 = arith.mulf %294, %292 : vector<8x128xf32>
    %296 = arith.mulf %287, %269 : vector<8x128xf32>
    %297 = arith.addf %295, %296 : vector<8x128xf32>
    %c0_98 = arith.constant 0 : index
    %c0_99 = arith.constant 0 : index
    %298 = vector.load %arg16[%c0_98, %c0_99] : memref<8x128xf32, #tpu.memory_space<vmem>>, vector<8x128xf32>
    tpu.vector_store %arg16[%c0_98, %c0_99], %297 {strides = array<i32>} : memref<8x128xf32, #tpu.memory_space<vmem>>, vector<8x128xf32>,
    %299 = arith.index_cast %266 : i32 to index
    %c0_100 = arith.constant 0 : index
    %300 = vector.load %arg14[%299, %c0_100] : memref<64x128xf32, #tpu.memory_space<vmem>>, vector<8x128xf32>
    tpu.vector_store %arg14[%299, %c0_100], %297 {strides = array<i32>} : memref<64x128xf32, #tpu.memory_space<vmem>>, vector<8x128xf32>,
    %c8_i32_101 = arith.constant 8 : i32
    %c0_102 = arith.constant 0 : index
    %c0_103 = arith.constant 0 : index
    %301 = vector.load %arg5[%c0_102, %c0_103] : memref<128x384xf32, #tpu.memory_space<vmem>>, vector<128x384xf32>
    %c0_104 = arith.constant 0 : index
    %c0_105 = arith.constant 0 : index
    %302 = vector.load %arg6[%c0_104, %c0_105] : memref<128x384xf32, #tpu.memory_space<vmem>>, vector<128x384xf32>
    %c0_106 = arith.constant 0 : index
    %c0_107 = arith.constant 0 : index
    %303 = vector.load %arg7[%c0_106, %c0_107] : memref<1x384xf32, #tpu.memory_space<vmem>>, vector<1x384xf32>
    %c0_108 = arith.constant 0 : index
    %c0_109 = arith.constant 0 : index
    %304 = vector.load %arg8[%c0_108, %c0_109] : memref<1x384xf32, #tpu.memory_space<vmem>>, vector<1x384xf32>
    %c0_110 = arith.constant 0 : index
    %c0_111 = arith.constant 0 : index
    %305 = vector.load %arg14[%c0_110, %c0_111] : memref<64x128xf32, #tpu.memory_space<vmem>>, vector<64x128xf32>
    %cst_112 = arith.constant dense<0.000000e+00> : vector<64x384xf32>
    %306 = tpu.matmul %305, %301, %cst_112 {dimension_numbers = #tpu.dot_dimension_numbers<[1], [0], [0], [1], [0, 0, 1, 1], [], []>} : vector<64x128xf32>, vector<128x384xf32>, vector<64x384xf32> -> vector<64x384xf32>
    %307 = vector.broadcast %303 : vector<1x384xf32> to vector<64x384xf32>
    %308 = arith.addf %306, %307 : vector<64x384xf32>
    %c0_113 = arith.constant 0 : index
    %c0_114 = arith.constant 0 : index
    %309 = vector.load %arg15[%c0_113, %c0_114] : memref<64x384xf32, #tpu.memory_space<vmem>>, vector<64x384xf32>
    tpu.vector_store %arg15[%c0_113, %c0_114], %308 {strides = array<i32>} : memref<64x384xf32, #tpu.memory_space<vmem>>, vector<64x384xf32>,
    %cst_115 = arith.constant 0.000000e+00 : f32
    %310 = vector.broadcast %cst_115 : f32 to vector<8x128xf32>
    %c0_116 = arith.constant 0 : index
    %c0_117 = arith.constant 0 : index
    %311 = vector.load %arg16[%c0_116, %c0_117] : memref<8x128xf32, #tpu.memory_space<vmem>>, vector<8x128xf32>
    tpu.vector_store %arg16[%c0_116, %c0_117], %310 {strides = array<i32>} : memref<8x128xf32, #tpu.memory_space<vmem>>, vector<8x128xf32>,
    %312 = vector.shape_cast %304 : vector<1x384xf32> to vector<1x384xf32>
    %313 = vector.broadcast %312 : vector<1x384xf32> to vector<8x384xf32>
    %c0_i32_118 = arith.constant 0 : i32
    %c8_i32_119 = arith.constant 8 : i32
    %314 = arith.muli %c0_i32_118, %c8_i32_119 : i32
    %315 = tpu.assume_multiple %314, 8 : i32
    %316 = arith.index_cast %315 : i32 to index
    %c0_120 = arith.constant 0 : index
    %317 = vector.load %arg15[%316, %c0_120] : memref<64x384xf32, #tpu.memory_space<vmem>>, vector<8x384xf32>
    %c0_121 = arith.constant 0 : index
    %c0_122 = arith.constant 0 : index
    %318 = vector.load %arg16[%c0_121, %c0_122] : memref<8x128xf32, #tpu.memory_space<vmem>>, vector<8x128xf32>
    %cst_123 = arith.constant dense<0.000000e+00> : vector<8x384xf32>
    %319 = tpu.matmul %318, %302, %cst_123 {dimension_numbers = #tpu.dot_dimension_numbers<[1], [0], [0], [1], [0, 0, 1, 1], [], []>} : vector<8x128xf32>, vector<128x384xf32>, vector<8x384xf32> -> vector<8x384xf32>
    %320 = arith.addf %319, %313 : vector<8x384xf32>
    %321 = vector.extract_strided_slice %317 {offsets = [0, 0], sizes = [8, 128], strides = [1, 1]} : vector<8x384xf32> to vector<8x128xf32>
    %322 = vector.extract_strided_slice %320 {offsets = [0, 0], sizes = [8, 128], strides = [1, 1]} : vector<8x384xf32> to vector<8x128xf32>
    %323 = arith.addf %321, %322 : vector<8x128xf32>
    %324 = arith.negf %323 : vector<8x128xf32>
    %325 = math.exp %324 : vector<8x128xf32>
    %cst_124 = arith.constant 1.000000e+00 : f32
    %326 = vector.broadcast %cst_124 : f32 to vector<8x128xf32>
    %327 = arith.addf %326, %325 : vector<8x128xf32>
    %328 = arith.divf %326, %327 : vector<8x128xf32>
    %329 = vector.extract_strided_slice %317 {offsets = [0, 128], sizes = [8, 128], strides = [1, 1]} : vector<8x384xf32> to vector<8x128xf32>
    %330 = vector.extract_strided_slice %320 {offsets = [0, 128], sizes = [8, 128], strides = [1, 1]} : vector<8x384xf32> to vector<8x128xf32>
    %331 = arith.addf %329, %330 : vector<8x128xf32>
    %332 = arith.negf %331 : vector<8x128xf32>
    %333 = math.exp %332 : vector<8x128xf32>
    %cst_125 = arith.constant 1.000000e+00 : f32
    %334 = vector.broadcast %cst_125 : f32 to vector<8x128xf32>
    %335 = arith.addf %334, %333 : vector<8x128xf32>
    %336 = arith.divf %334, %335 : vector<8x128xf32>
    %337 = vector.extract_strided_slice %317 {offsets = [0, 256], sizes = [8, 128], strides = [1, 1]} : vector<8x384xf32> to vector<8x128xf32>
    %338 = vector.extract_strided_slice %320 {offsets = [0, 256], sizes = [8, 128], strides = [1, 1]} : vector<8x384xf32> to vector<8x128xf32>
    %339 = arith.mulf %328, %338 : vector<8x128xf32>
    %340 = arith.addf %337, %339 : vector<8x128xf32>
    %341 = math.tanh %340 : vector<8x128xf32>
    %cst_126 = arith.constant 1.000000e+00 : f32
    %342 = vector.broadcast %cst_126 : f32 to vector<8x128xf32>
    %343 = arith.subf %342, %336 : vector<8x128xf32>
    %344 = arith.mulf %343, %341 : vector<8x128xf32>
    %345 = arith.mulf %336, %318 : vector<8x128xf32>
    %346 = arith.addf %344, %345 : vector<8x128xf32>
    %c0_127 = arith.constant 0 : index
    %c0_128 = arith.constant 0 : index
    %347 = vector.load %arg16[%c0_127, %c0_128] : memref<8x128xf32, #tpu.memory_space<vmem>>, vector<8x128xf32>
    tpu.vector_store %arg16[%c0_127, %c0_128], %346 {strides = array<i32>} : memref<8x128xf32, #tpu.memory_space<vmem>>, vector<8x128xf32>,
    %c1_i32_129 = arith.constant 1 : i32
    %c8_i32_130 = arith.constant 8 : i32
    %348 = arith.muli %c1_i32_129, %c8_i32_130 : i32
    %349 = tpu.assume_multiple %348, 8 : i32
    %350 = arith.index_cast %349 : i32 to index
    %c0_131 = arith.constant 0 : index
    %351 = vector.load %arg15[%350, %c0_131] : memref<64x384xf32, #tpu.memory_space<vmem>>, vector<8x384xf32>
    %c0_132 = arith.constant 0 : index
    %c0_133 = arith.constant 0 : index
    %352 = vector.load %arg16[%c0_132, %c0_133] : memref<8x128xf32, #tpu.memory_space<vmem>>, vector<8x128xf32>
    %cst_134 = arith.constant dense<0.000000e+00> : vector<8x384xf32>
    %353 = tpu.matmul %352, %302, %cst_134 {dimension_numbers = #tpu.dot_dimension_numbers<[1], [0], [0], [1], [0, 0, 1, 1], [], []>} : vector<8x128xf32>, vector<128x384xf32>, vector<8x384xf32> -> vector<8x384xf32>
    %354 = arith.addf %353, %313 : vector<8x384xf32>
    %355 = vector.extract_strided_slice %351 {offsets = [0, 0], sizes = [8, 128], strides = [1, 1]} : vector<8x384xf32> to vector<8x128xf32>
    %356 = vector.extract_strided_slice %354 {offsets = [0, 0], sizes = [8, 128], strides = [1, 1]} : vector<8x384xf32> to vector<8x128xf32>
    %357 = arith.addf %355, %356 : vector<8x128xf32>
    %358 = arith.negf %357 : vector<8x128xf32>
    %359 = math.exp %358 : vector<8x128xf32>
    %cst_135 = arith.constant 1.000000e+00 : f32
    %360 = vector.broadcast %cst_135 : f32 to vector<8x128xf32>
    %361 = arith.addf %360, %359 : vector<8x128xf32>
    %362 = arith.divf %360, %361 : vector<8x128xf32>
    %363 = vector.extract_strided_slice %351 {offsets = [0, 128], sizes = [8, 128], strides = [1, 1]} : vector<8x384xf32> to vector<8x128xf32>
    %364 = vector.extract_strided_slice %354 {offsets = [0, 128], sizes = [8, 128], strides = [1, 1]} : vector<8x384xf32> to vector<8x128xf32>
    %365 = arith.addf %363, %364 : vector<8x128xf32>
    %366 = arith.negf %365 : vector<8x128xf32>
    %367 = math.exp %366 : vector<8x128xf32>
    %cst_136 = arith.constant 1.000000e+00 : f32
    %368 = vector.broadcast %cst_136 : f32 to vector<8x128xf32>
    %369 = arith.addf %368, %367 : vector<8x128xf32>
    %370 = arith.divf %368, %369 : vector<8x128xf32>
    %371 = vector.extract_strided_slice %351 {offsets = [0, 256], sizes = [8, 128], strides = [1, 1]} : vector<8x384xf32> to vector<8x128xf32>
    %372 = vector.extract_strided_slice %354 {offsets = [0, 256], sizes = [8, 128], strides = [1, 1]} : vector<8x384xf32> to vector<8x128xf32>
    %373 = arith.mulf %362, %372 : vector<8x128xf32>
    %374 = arith.addf %371, %373 : vector<8x128xf32>
    %375 = math.tanh %374 : vector<8x128xf32>
    %cst_137 = arith.constant 1.000000e+00 : f32
    %376 = vector.broadcast %cst_137 : f32 to vector<8x128xf32>
    %377 = arith.subf %376, %370 : vector<8x128xf32>
    %378 = arith.mulf %377, %375 : vector<8x128xf32>
    %379 = arith.mulf %370, %352 : vector<8x128xf32>
    %380 = arith.addf %378, %379 : vector<8x128xf32>
    %c0_138 = arith.constant 0 : index
    %c0_139 = arith.constant 0 : index
    %381 = vector.load %arg16[%c0_138, %c0_139] : memref<8x128xf32, #tpu.memory_space<vmem>>, vector<8x128xf32>
    tpu.vector_store %arg16[%c0_138, %c0_139], %380 {strides = array<i32>} : memref<8x128xf32, #tpu.memory_space<vmem>>, vector<8x128xf32>,
    %c2_i32_140 = arith.constant 2 : i32
    %c8_i32_141 = arith.constant 8 : i32
    %382 = arith.muli %c2_i32_140, %c8_i32_141 : i32
    %383 = tpu.assume_multiple %382, 8 : i32
    %384 = arith.index_cast %383 : i32 to index
    %c0_142 = arith.constant 0 : index
    %385 = vector.load %arg15[%384, %c0_142] : memref<64x384xf32, #tpu.memory_space<vmem>>, vector<8x384xf32>
    %c0_143 = arith.constant 0 : index
    %c0_144 = arith.constant 0 : index
    %386 = vector.load %arg16[%c0_143, %c0_144] : memref<8x128xf32, #tpu.memory_space<vmem>>, vector<8x128xf32>
    %cst_145 = arith.constant dense<0.000000e+00> : vector<8x384xf32>
    %387 = tpu.matmul %386, %302, %cst_145 {dimension_numbers = #tpu.dot_dimension_numbers<[1], [0], [0], [1], [0, 0, 1, 1], [], []>} : vector<8x128xf32>, vector<128x384xf32>, vector<8x384xf32> -> vector<8x384xf32>
    %388 = arith.addf %387, %313 : vector<8x384xf32>
    %389 = vector.extract_strided_slice %385 {offsets = [0, 0], sizes = [8, 128], strides = [1, 1]} : vector<8x384xf32> to vector<8x128xf32>
    %390 = vector.extract_strided_slice %388 {offsets = [0, 0], sizes = [8, 128], strides = [1, 1]} : vector<8x384xf32> to vector<8x128xf32>
    %391 = arith.addf %389, %390 : vector<8x128xf32>
    %392 = arith.negf %391 : vector<8x128xf32>
    %393 = math.exp %392 : vector<8x128xf32>
    %cst_146 = arith.constant 1.000000e+00 : f32
    %394 = vector.broadcast %cst_146 : f32 to vector<8x128xf32>
    %395 = arith.addf %394, %393 : vector<8x128xf32>
    %396 = arith.divf %394, %395 : vector<8x128xf32>
    %397 = vector.extract_strided_slice %385 {offsets = [0, 128], sizes = [8, 128], strides = [1, 1]} : vector<8x384xf32> to vector<8x128xf32>
    %398 = vector.extract_strided_slice %388 {offsets = [0, 128], sizes = [8, 128], strides = [1, 1]} : vector<8x384xf32> to vector<8x128xf32>
    %399 = arith.addf %397, %398 : vector<8x128xf32>
    %400 = arith.negf %399 : vector<8x128xf32>
    %401 = math.exp %400 : vector<8x128xf32>
    %cst_147 = arith.constant 1.000000e+00 : f32
    %402 = vector.broadcast %cst_147 : f32 to vector<8x128xf32>
    %403 = arith.addf %402, %401 : vector<8x128xf32>
    %404 = arith.divf %402, %403 : vector<8x128xf32>
    %405 = vector.extract_strided_slice %385 {offsets = [0, 256], sizes = [8, 128], strides = [1, 1]} : vector<8x384xf32> to vector<8x128xf32>
    %406 = vector.extract_strided_slice %388 {offsets = [0, 256], sizes = [8, 128], strides = [1, 1]} : vector<8x384xf32> to vector<8x128xf32>
    %407 = arith.mulf %396, %406 : vector<8x128xf32>
    %408 = arith.addf %405, %407 : vector<8x128xf32>
    %409 = math.tanh %408 : vector<8x128xf32>
    %cst_148 = arith.constant 1.000000e+00 : f32
    %410 = vector.broadcast %cst_148 : f32 to vector<8x128xf32>
    %411 = arith.subf %410, %404 : vector<8x128xf32>
    %412 = arith.mulf %411, %409 : vector<8x128xf32>
    %413 = arith.mulf %404, %386 : vector<8x128xf32>
    %414 = arith.addf %412, %413 : vector<8x128xf32>
    %c0_149 = arith.constant 0 : index
    %c0_150 = arith.constant 0 : index
    %415 = vector.load %arg16[%c0_149, %c0_150] : memref<8x128xf32, #tpu.memory_space<vmem>>, vector<8x128xf32>
    tpu.vector_store %arg16[%c0_149, %c0_150], %414 {strides = array<i32>} : memref<8x128xf32, #tpu.memory_space<vmem>>, vector<8x128xf32>,
    %c3_i32_151 = arith.constant 3 : i32
    %c8_i32_152 = arith.constant 8 : i32
    %416 = arith.muli %c3_i32_151, %c8_i32_152 : i32
    %417 = tpu.assume_multiple %416, 8 : i32
    %418 = arith.index_cast %417 : i32 to index
    %c0_153 = arith.constant 0 : index
    %419 = vector.load %arg15[%418, %c0_153] : memref<64x384xf32, #tpu.memory_space<vmem>>, vector<8x384xf32>
    %c0_154 = arith.constant 0 : index
    %c0_155 = arith.constant 0 : index
    %420 = vector.load %arg16[%c0_154, %c0_155] : memref<8x128xf32, #tpu.memory_space<vmem>>, vector<8x128xf32>
    %cst_156 = arith.constant dense<0.000000e+00> : vector<8x384xf32>
    %421 = tpu.matmul %420, %302, %cst_156 {dimension_numbers = #tpu.dot_dimension_numbers<[1], [0], [0], [1], [0, 0, 1, 1], [], []>} : vector<8x128xf32>, vector<128x384xf32>, vector<8x384xf32> -> vector<8x384xf32>
    %422 = arith.addf %421, %313 : vector<8x384xf32>
    %423 = vector.extract_strided_slice %419 {offsets = [0, 0], sizes = [8, 128], strides = [1, 1]} : vector<8x384xf32> to vector<8x128xf32>
    %424 = vector.extract_strided_slice %422 {offsets = [0, 0], sizes = [8, 128], strides = [1, 1]} : vector<8x384xf32> to vector<8x128xf32>
    %425 = arith.addf %423, %424 : vector<8x128xf32>
    %426 = arith.negf %425 : vector<8x128xf32>
    %427 = math.exp %426 : vector<8x128xf32>
    %cst_157 = arith.constant 1.000000e+00 : f32
    %428 = vector.broadcast %cst_157 : f32 to vector<8x128xf32>
    %429 = arith.addf %428, %427 : vector<8x128xf32>
    %430 = arith.divf %428, %429 : vector<8x128xf32>
    %431 = vector.extract_strided_slice %419 {offsets = [0, 128], sizes = [8, 128], strides = [1, 1]} : vector<8x384xf32> to vector<8x128xf32>
    %432 = vector.extract_strided_slice %422 {offsets = [0, 128], sizes = [8, 128], strides = [1, 1]} : vector<8x384xf32> to vector<8x128xf32>
    %433 = arith.addf %431, %432 : vector<8x128xf32>
    %434 = arith.negf %433 : vector<8x128xf32>
    %435 = math.exp %434 : vector<8x128xf32>
    %cst_158 = arith.constant 1.000000e+00 : f32
    %436 = vector.broadcast %cst_158 : f32 to vector<8x128xf32>
    %437 = arith.addf %436, %435 : vector<8x128xf32>
    %438 = arith.divf %436, %437 : vector<8x128xf32>
    %439 = vector.extract_strided_slice %419 {offsets = [0, 256], sizes = [8, 128], strides = [1, 1]} : vector<8x384xf32> to vector<8x128xf32>
    %440 = vector.extract_strided_slice %422 {offsets = [0, 256], sizes = [8, 128], strides = [1, 1]} : vector<8x384xf32> to vector<8x128xf32>
    %441 = arith.mulf %430, %440 : vector<8x128xf32>
    %442 = arith.addf %439, %441 : vector<8x128xf32>
    %443 = math.tanh %442 : vector<8x128xf32>
    %cst_159 = arith.constant 1.000000e+00 : f32
    %444 = vector.broadcast %cst_159 : f32 to vector<8x128xf32>
    %445 = arith.subf %444, %438 : vector<8x128xf32>
    %446 = arith.mulf %445, %443 : vector<8x128xf32>
    %447 = arith.mulf %438, %420 : vector<8x128xf32>
    %448 = arith.addf %446, %447 : vector<8x128xf32>
    %c0_160 = arith.constant 0 : index
    %c0_161 = arith.constant 0 : index
    %449 = vector.load %arg16[%c0_160, %c0_161] : memref<8x128xf32, #tpu.memory_space<vmem>>, vector<8x128xf32>
    tpu.vector_store %arg16[%c0_160, %c0_161], %448 {strides = array<i32>} : memref<8x128xf32, #tpu.memory_space<vmem>>, vector<8x128xf32>,
    %c4_i32_162 = arith.constant 4 : i32
    %c8_i32_163 = arith.constant 8 : i32
    %450 = arith.muli %c4_i32_162, %c8_i32_163 : i32
    %451 = tpu.assume_multiple %450, 8 : i32
    %452 = arith.index_cast %451 : i32 to index
    %c0_164 = arith.constant 0 : index
    %453 = vector.load %arg15[%452, %c0_164] : memref<64x384xf32, #tpu.memory_space<vmem>>, vector<8x384xf32>
    %c0_165 = arith.constant 0 : index
    %c0_166 = arith.constant 0 : index
    %454 = vector.load %arg16[%c0_165, %c0_166] : memref<8x128xf32, #tpu.memory_space<vmem>>, vector<8x128xf32>
    %cst_167 = arith.constant dense<0.000000e+00> : vector<8x384xf32>
    %455 = tpu.matmul %454, %302, %cst_167 {dimension_numbers = #tpu.dot_dimension_numbers<[1], [0], [0], [1], [0, 0, 1, 1], [], []>} : vector<8x128xf32>, vector<128x384xf32>, vector<8x384xf32> -> vector<8x384xf32>
    %456 = arith.addf %455, %313 : vector<8x384xf32>
    %457 = vector.extract_strided_slice %453 {offsets = [0, 0], sizes = [8, 128], strides = [1, 1]} : vector<8x384xf32> to vector<8x128xf32>
    %458 = vector.extract_strided_slice %456 {offsets = [0, 0], sizes = [8, 128], strides = [1, 1]} : vector<8x384xf32> to vector<8x128xf32>
    %459 = arith.addf %457, %458 : vector<8x128xf32>
    %460 = arith.negf %459 : vector<8x128xf32>
    %461 = math.exp %460 : vector<8x128xf32>
    %cst_168 = arith.constant 1.000000e+00 : f32
    %462 = vector.broadcast %cst_168 : f32 to vector<8x128xf32>
    %463 = arith.addf %462, %461 : vector<8x128xf32>
    %464 = arith.divf %462, %463 : vector<8x128xf32>
    %465 = vector.extract_strided_slice %453 {offsets = [0, 128], sizes = [8, 128], strides = [1, 1]} : vector<8x384xf32> to vector<8x128xf32>
    %466 = vector.extract_strided_slice %456 {offsets = [0, 128], sizes = [8, 128], strides = [1, 1]} : vector<8x384xf32> to vector<8x128xf32>
    %467 = arith.addf %465, %466 : vector<8x128xf32>
    %468 = arith.negf %467 : vector<8x128xf32>
    %469 = math.exp %468 : vector<8x128xf32>
    %cst_169 = arith.constant 1.000000e+00 : f32
    %470 = vector.broadcast %cst_169 : f32 to vector<8x128xf32>
    %471 = arith.addf %470, %469 : vector<8x128xf32>
    %472 = arith.divf %470, %471 : vector<8x128xf32>
    %473 = vector.extract_strided_slice %453 {offsets = [0, 256], sizes = [8, 128], strides = [1, 1]} : vector<8x384xf32> to vector<8x128xf32>
    %474 = vector.extract_strided_slice %456 {offsets = [0, 256], sizes = [8, 128], strides = [1, 1]} : vector<8x384xf32> to vector<8x128xf32>
    %475 = arith.mulf %464, %474 : vector<8x128xf32>
    %476 = arith.addf %473, %475 : vector<8x128xf32>
    %477 = math.tanh %476 : vector<8x128xf32>
    %cst_170 = arith.constant 1.000000e+00 : f32
    %478 = vector.broadcast %cst_170 : f32 to vector<8x128xf32>
    %479 = arith.subf %478, %472 : vector<8x128xf32>
    %480 = arith.mulf %479, %477 : vector<8x128xf32>
    %481 = arith.mulf %472, %454 : vector<8x128xf32>
    %482 = arith.addf %480, %481 : vector<8x128xf32>
    %c0_171 = arith.constant 0 : index
    %c0_172 = arith.constant 0 : index
    %483 = vector.load %arg16[%c0_171, %c0_172] : memref<8x128xf32, #tpu.memory_space<vmem>>, vector<8x128xf32>
    tpu.vector_store %arg16[%c0_171, %c0_172], %482 {strides = array<i32>} : memref<8x128xf32, #tpu.memory_space<vmem>>, vector<8x128xf32>,
    %c5_i32_173 = arith.constant 5 : i32
    %c8_i32_174 = arith.constant 8 : i32
    %484 = arith.muli %c5_i32_173, %c8_i32_174 : i32
    %485 = tpu.assume_multiple %484, 8 : i32
    %486 = arith.index_cast %485 : i32 to index
    %c0_175 = arith.constant 0 : index
    %487 = vector.load %arg15[%486, %c0_175] : memref<64x384xf32, #tpu.memory_space<vmem>>, vector<8x384xf32>
    %c0_176 = arith.constant 0 : index
    %c0_177 = arith.constant 0 : index
    %488 = vector.load %arg16[%c0_176, %c0_177] : memref<8x128xf32, #tpu.memory_space<vmem>>, vector<8x128xf32>
    %cst_178 = arith.constant dense<0.000000e+00> : vector<8x384xf32>
    %489 = tpu.matmul %488, %302, %cst_178 {dimension_numbers = #tpu.dot_dimension_numbers<[1], [0], [0], [1], [0, 0, 1, 1], [], []>} : vector<8x128xf32>, vector<128x384xf32>, vector<8x384xf32> -> vector<8x384xf32>
    %490 = arith.addf %489, %313 : vector<8x384xf32>
    %491 = vector.extract_strided_slice %487 {offsets = [0, 0], sizes = [8, 128], strides = [1, 1]} : vector<8x384xf32> to vector<8x128xf32>
    %492 = vector.extract_strided_slice %490 {offsets = [0, 0], sizes = [8, 128], strides = [1, 1]} : vector<8x384xf32> to vector<8x128xf32>
    %493 = arith.addf %491, %492 : vector<8x128xf32>
    %494 = arith.negf %493 : vector<8x128xf32>
    %495 = math.exp %494 : vector<8x128xf32>
    %cst_179 = arith.constant 1.000000e+00 : f32
    %496 = vector.broadcast %cst_179 : f32 to vector<8x128xf32>
    %497 = arith.addf %496, %495 : vector<8x128xf32>
    %498 = arith.divf %496, %497 : vector<8x128xf32>
    %499 = vector.extract_strided_slice %487 {offsets = [0, 128], sizes = [8, 128], strides = [1, 1]} : vector<8x384xf32> to vector<8x128xf32>
    %500 = vector.extract_strided_slice %490 {offsets = [0, 128], sizes = [8, 128], strides = [1, 1]} : vector<8x384xf32> to vector<8x128xf32>
    %501 = arith.addf %499, %500 : vector<8x128xf32>
    %502 = arith.negf %501 : vector<8x128xf32>
    %503 = math.exp %502 : vector<8x128xf32>
    %cst_180 = arith.constant 1.000000e+00 : f32
    %504 = vector.broadcast %cst_180 : f32 to vector<8x128xf32>
    %505 = arith.addf %504, %503 : vector<8x128xf32>
    %506 = arith.divf %504, %505 : vector<8x128xf32>
    %507 = vector.extract_strided_slice %487 {offsets = [0, 256], sizes = [8, 128], strides = [1, 1]} : vector<8x384xf32> to vector<8x128xf32>
    %508 = vector.extract_strided_slice %490 {offsets = [0, 256], sizes = [8, 128], strides = [1, 1]} : vector<8x384xf32> to vector<8x128xf32>
    %509 = arith.mulf %498, %508 : vector<8x128xf32>
    %510 = arith.addf %507, %509 : vector<8x128xf32>
    %511 = math.tanh %510 : vector<8x128xf32>
    %cst_181 = arith.constant 1.000000e+00 : f32
    %512 = vector.broadcast %cst_181 : f32 to vector<8x128xf32>
    %513 = arith.subf %512, %506 : vector<8x128xf32>
    %514 = arith.mulf %513, %511 : vector<8x128xf32>
    %515 = arith.mulf %506, %488 : vector<8x128xf32>
    %516 = arith.addf %514, %515 : vector<8x128xf32>
    %c0_182 = arith.constant 0 : index
    %c0_183 = arith.constant 0 : index
    %517 = vector.load %arg16[%c0_182, %c0_183] : memref<8x128xf32, #tpu.memory_space<vmem>>, vector<8x128xf32>
    tpu.vector_store %arg16[%c0_182, %c0_183], %516 {strides = array<i32>} : memref<8x128xf32, #tpu.memory_space<vmem>>, vector<8x128xf32>,
    %c6_i32_184 = arith.constant 6 : i32
    %c8_i32_185 = arith.constant 8 : i32
    %518 = arith.muli %c6_i32_184, %c8_i32_185 : i32
    %519 = tpu.assume_multiple %518, 8 : i32
    %520 = arith.index_cast %519 : i32 to index
    %c0_186 = arith.constant 0 : index
    %521 = vector.load %arg15[%520, %c0_186] : memref<64x384xf32, #tpu.memory_space<vmem>>, vector<8x384xf32>
    %c0_187 = arith.constant 0 : index
    %c0_188 = arith.constant 0 : index
    %522 = vector.load %arg16[%c0_187, %c0_188] : memref<8x128xf32, #tpu.memory_space<vmem>>, vector<8x128xf32>
    %cst_189 = arith.constant dense<0.000000e+00> : vector<8x384xf32>
    %523 = tpu.matmul %522, %302, %cst_189 {dimension_numbers = #tpu.dot_dimension_numbers<[1], [0], [0], [1], [0, 0, 1, 1], [], []>} : vector<8x128xf32>, vector<128x384xf32>, vector<8x384xf32> -> vector<8x384xf32>
    %524 = arith.addf %523, %313 : vector<8x384xf32>
    %525 = vector.extract_strided_slice %521 {offsets = [0, 0], sizes = [8, 128], strides = [1, 1]} : vector<8x384xf32> to vector<8x128xf32>
    %526 = vector.extract_strided_slice %524 {offsets = [0, 0], sizes = [8, 128], strides = [1, 1]} : vector<8x384xf32> to vector<8x128xf32>
    %527 = arith.addf %525, %526 : vector<8x128xf32>
    %528 = arith.negf %527 : vector<8x128xf32>
    %529 = math.exp %528 : vector<8x128xf32>
    %cst_190 = arith.constant 1.000000e+00 : f32
    %530 = vector.broadcast %cst_190 : f32 to vector<8x128xf32>
    %531 = arith.addf %530, %529 : vector<8x128xf32>
    %532 = arith.divf %530, %531 : vector<8x128xf32>
    %533 = vector.extract_strided_slice %521 {offsets = [0, 128], sizes = [8, 128], strides = [1, 1]} : vector<8x384xf32> to vector<8x128xf32>
    %534 = vector.extract_strided_slice %524 {offsets = [0, 128], sizes = [8, 128], strides = [1, 1]} : vector<8x384xf32> to vector<8x128xf32>
    %535 = arith.addf %533, %534 : vector<8x128xf32>
    %536 = arith.negf %535 : vector<8x128xf32>
    %537 = math.exp %536 : vector<8x128xf32>
    %cst_191 = arith.constant 1.000000e+00 : f32
    %538 = vector.broadcast %cst_191 : f32 to vector<8x128xf32>
    %539 = arith.addf %538, %537 : vector<8x128xf32>
    %540 = arith.divf %538, %539 : vector<8x128xf32>
    %541 = vector.extract_strided_slice %521 {offsets = [0, 256], sizes = [8, 128], strides = [1, 1]} : vector<8x384xf32> to vector<8x128xf32>
    %542 = vector.extract_strided_slice %524 {offsets = [0, 256], sizes = [8, 128], strides = [1, 1]} : vector<8x384xf32> to vector<8x128xf32>
    %543 = arith.mulf %532, %542 : vector<8x128xf32>
    %544 = arith.addf %541, %543 : vector<8x128xf32>
    %545 = math.tanh %544 : vector<8x128xf32>
    %cst_192 = arith.constant 1.000000e+00 : f32
    %546 = vector.broadcast %cst_192 : f32 to vector<8x128xf32>
    %547 = arith.subf %546, %540 : vector<8x128xf32>
    %548 = arith.mulf %547, %545 : vector<8x128xf32>
    %549 = arith.mulf %540, %522 : vector<8x128xf32>
    %550 = arith.addf %548, %549 : vector<8x128xf32>
    %c0_193 = arith.constant 0 : index
    %c0_194 = arith.constant 0 : index
    %551 = vector.load %arg16[%c0_193, %c0_194] : memref<8x128xf32, #tpu.memory_space<vmem>>, vector<8x128xf32>
    tpu.vector_store %arg16[%c0_193, %c0_194], %550 {strides = array<i32>} : memref<8x128xf32, #tpu.memory_space<vmem>>, vector<8x128xf32>,
    %c7_i32_195 = arith.constant 7 : i32
    %c8_i32_196 = arith.constant 8 : i32
    %552 = arith.muli %c7_i32_195, %c8_i32_196 : i32
    %553 = tpu.assume_multiple %552, 8 : i32
    %554 = arith.index_cast %553 : i32 to index
    %c0_197 = arith.constant 0 : index
    %555 = vector.load %arg15[%554, %c0_197] : memref<64x384xf32, #tpu.memory_space<vmem>>, vector<8x384xf32>
    %c0_198 = arith.constant 0 : index
    %c0_199 = arith.constant 0 : index
    %556 = vector.load %arg16[%c0_198, %c0_199] : memref<8x128xf32, #tpu.memory_space<vmem>>, vector<8x128xf32>
    %cst_200 = arith.constant dense<0.000000e+00> : vector<8x384xf32>
    %557 = tpu.matmul %556, %302, %cst_200 {dimension_numbers = #tpu.dot_dimension_numbers<[1], [0], [0], [1], [0, 0, 1, 1], [], []>} : vector<8x128xf32>, vector<128x384xf32>, vector<8x384xf32> -> vector<8x384xf32>
    %558 = arith.addf %557, %313 : vector<8x384xf32>
    %559 = vector.extract_strided_slice %555 {offsets = [0, 0], sizes = [8, 128], strides = [1, 1]} : vector<8x384xf32> to vector<8x128xf32>
    %560 = vector.extract_strided_slice %558 {offsets = [0, 0], sizes = [8, 128], strides = [1, 1]} : vector<8x384xf32> to vector<8x128xf32>
    %561 = arith.addf %559, %560 : vector<8x128xf32>
    %562 = arith.negf %561 : vector<8x128xf32>
    %563 = math.exp %562 : vector<8x128xf32>
    %cst_201 = arith.constant 1.000000e+00 : f32
    %564 = vector.broadcast %cst_201 : f32 to vector<8x128xf32>
    %565 = arith.addf %564, %563 : vector<8x128xf32>
    %566 = arith.divf %564, %565 : vector<8x128xf32>
    %567 = vector.extract_strided_slice %555 {offsets = [0, 128], sizes = [8, 128], strides = [1, 1]} : vector<8x384xf32> to vector<8x128xf32>
    %568 = vector.extract_strided_slice %558 {offsets = [0, 128], sizes = [8, 128], strides = [1, 1]} : vector<8x384xf32> to vector<8x128xf32>
    %569 = arith.addf %567, %568 : vector<8x128xf32>
    %570 = arith.negf %569 : vector<8x128xf32>
    %571 = math.exp %570 : vector<8x128xf32>
    %cst_202 = arith.constant 1.000000e+00 : f32
    %572 = vector.broadcast %cst_202 : f32 to vector<8x128xf32>
    %573 = arith.addf %572, %571 : vector<8x128xf32>
    %574 = arith.divf %572, %573 : vector<8x128xf32>
    %575 = vector.extract_strided_slice %555 {offsets = [0, 256], sizes = [8, 128], strides = [1, 1]} : vector<8x384xf32> to vector<8x128xf32>
    %576 = vector.extract_strided_slice %558 {offsets = [0, 256], sizes = [8, 128], strides = [1, 1]} : vector<8x384xf32> to vector<8x128xf32>
    %577 = arith.mulf %566, %576 : vector<8x128xf32>
    %578 = arith.addf %575, %577 : vector<8x128xf32>
    %579 = math.tanh %578 : vector<8x128xf32>
    %cst_203 = arith.constant 1.000000e+00 : f32
    %580 = vector.broadcast %cst_203 : f32 to vector<8x128xf32>
    %581 = arith.subf %580, %574 : vector<8x128xf32>
    %582 = arith.mulf %581, %579 : vector<8x128xf32>
    %583 = arith.mulf %574, %556 : vector<8x128xf32>
    %584 = arith.addf %582, %583 : vector<8x128xf32>
    %c0_204 = arith.constant 0 : index
    %c0_205 = arith.constant 0 : index
    %585 = vector.load %arg16[%c0_204, %c0_205] : memref<8x128xf32, #tpu.memory_space<vmem>>, vector<8x128xf32>
    tpu.vector_store %arg16[%c0_204, %c0_205], %584 {strides = array<i32>} : memref<8x128xf32, #tpu.memory_space<vmem>>, vector<8x128xf32>,
    %c8_i32_206 = arith.constant 8 : i32
    %c0_207 = arith.constant 0 : index
    %c0_208 = arith.constant 0 : index
    %586 = vector.load %arg16[%c0_207, %c0_208] : memref<8x128xf32, #tpu.memory_space<vmem>>, vector<8x128xf32>
    %c0_209 = arith.constant 0 : index
    %c0_210 = arith.constant 0 : index
    %587 = vector.load %arg9[%c0_209, %c0_210] : memref<128x128xf32, #tpu.memory_space<vmem>>, vector<128x128xf32>
    %cst_211 = arith.constant dense<0.000000e+00> : vector<8x128xf32>
    %588 = tpu.matmul %586, %587, %cst_211 {dimension_numbers = #tpu.dot_dimension_numbers<[1], [0], [0], [1], [0, 0, 1, 1], [], []>} : vector<8x128xf32>, vector<128x128xf32>, vector<8x128xf32> -> vector<8x128xf32>
    %c0_212 = arith.constant 0 : index
    %c0_213 = arith.constant 0 : index
    %589 = vector.load %arg10[%c0_212, %c0_213] : memref<1x128xf32, #tpu.memory_space<vmem>>, vector<1x128xf32>
    %590 = vector.broadcast %589 : vector<1x128xf32> to vector<8x128xf32>
    %591 = arith.addf %588, %590 : vector<8x128xf32>
    %cst_214 = arith.constant 0.000000e+00 : f32
    %592 = vector.broadcast %cst_214 : f32 to vector<8x128xf32>
    %593 = arith.maximumf %591, %592 : vector<8x128xf32>
    %c0_215 = arith.constant 0 : index
    %c0_216 = arith.constant 0 : index
    %594 = vector.load %arg11[%c0_215, %c0_216] : memref<128x128xf32, #tpu.memory_space<vmem>>, vector<128x128xf32>
    %cst_217 = arith.constant dense<0.000000e+00> : vector<8x128xf32>
    %595 = tpu.matmul %593, %594, %cst_217 {dimension_numbers = #tpu.dot_dimension_numbers<[1], [0], [0], [1], [0, 0, 1, 1], [], []>} : vector<8x128xf32>, vector<128x128xf32>, vector<8x128xf32> -> vector<8x128xf32>
    %c0_218 = arith.constant 0 : index
    %c0_219 = arith.constant 0 : index
    %596 = vector.load %arg12[%c0_218, %c0_219] : memref<1x128xf32, #tpu.memory_space<vmem>>, vector<1x128xf32>
    %597 = vector.broadcast %596 : vector<1x128xf32> to vector<8x128xf32>
    %598 = arith.addf %595, %597 : vector<8x128xf32>
    %c0_220 = arith.constant 0 : index
    %c0_221 = arith.constant 0 : index
    %599 = vector.load %arg13[%c0_220, %c0_221] : memref<8x128xf32, #tpu.memory_space<vmem>>, vector<8x128xf32>
    tpu.vector_store %arg13[%c0_220, %c0_221], %598 {strides = array<i32>} : memref<8x128xf32, #tpu.memory_space<vmem>>, vector<8x128xf32>,
    return
  }
}

</mosaic_0001>

<bundles_post_ra>
// kernel: tpu_custom_call.1
= control target key start
LH: loop header
LB: loop body
LE: loop exit
PB: predicated region body
PF: predicated region fallthrough
CT: control target
= control target key end

     0   :  { %18 = vsyncpa [#allocation6], 0  ;;  %s7460_s0 = inlined_call_operand.vmem [shape: f32[64,16], index: 0, kind: input, shape index: {}]   ;;  %s7461_s1 = inlined_call_operand.vmem [shape: f32[16,384], index: 1, kind: input, shape index: {}]   ;;  %s7462_s2 = inlined_call_operand.hbm [shape: f32[128,384], index: 2, kind: input, shape index: {}]   ;;  %s7463_s3 = inlined_call_operand.vmem [shape: f32[1,384], index: 3, kind: input, shape index: {}]   ;;  %s7464_s4 = inlined_call_operand.vmem [shape: f32[1,384], index: 4, kind: input, shape index: {}]   ;;  %s7465_s5 = inlined_call_operand.hbm [shape: f32[128,384], index: 5, kind: input, shape index: {}]   ;;  %s7466_s6 = inlined_call_operand.hbm [shape: f32[128,384], index: 6, kind: input, shape index: {}]   ;;  %s7467_s7 = inlined_call_operand.vmem [shape: f32[1,384], index: 7, kind: input, shape index: {}]   ;;  %s7468_s8 = inlined_call_operand.vmem [shape: f32[1,384], index: 8, kind: input, shape index: {}]   ;;  %s7469_s9 = inlined_call_operand.hbm [shape: f32[128,128], index: 9, kind: input, shape index: {}]   ;;  %s7470_s10 = inlined_call_operand.vmem [shape: f32[1,128], index: 10, kind: input, shape index: {}]   ;;  %s7471_s11 = inlined_call_operand.hbm [shape: f32[128,128], index: 11, kind: input, shape index: {}]   ;;  %s7472_s12 = inlined_call_operand.vmem [shape: f32[1,128], index: 12, kind: input, shape index: {}]   ;;  %s7473_s13 = inlined_call_operand.hbm [shape: f32[8,128], index: 13, kind: output, shape index: {}]  }
   0x1   :  { %19 = vsyncpa [#allocation9], 0 }
   0x2   :  { %20 = vsyncpa [#allocation12], 0 }
   0x3   :  { %21 = vsyncpa [#allocation7], 0  ;;  %s6287_s25 = smov [#allocation8]   ;;  %s6288_s27 = smov [#allocation11]  }
   0x4   :  { %s47_s26 = sshll.u32 %s6287_s25, 4  ;;  %s75_s28 = sshll.u32 %s6288_s27, 4  ;;  %s48_s26 = int_to_ptr.vmem [resolvable:$true] %s47_s26  ;;  %s6370_s28 = int_to_ptr.vmem [resolvable:$true] %s75_s28 }
   0x5   :  { %s6147_s14 = scalar_lea.hbm %s7465_s5, 6144 }
   0x6   :  { %p6148_p0 = scmp.ne.s32.totalorder %s7465_s5, %s6147_s14  ;;  %p6151_p1 = scmp.lt.u32.totalorder %s6147_s14, %s7465_s5 }
   0x8   :  { %p6153_p2 = pnand %p6151_p1, %p6148_p0 }
   0xa   :  { %6156 = shalt.err (!%p6153_p2)
}
   0xb   :  { %s6157_s19 = scalar_lea.vmem %s48_s26, 6144  ;;  %p6162_p4 = scmp.lt.s32.totalorder %s48_s26, %s48_s26 }
   0xc   :  { %p6158_p3 = scmp.ne.s32.totalorder %s48_s26, %s6157_s19  ;;  %p6163_p5 = scmp.lt.s32.totalorder %s6157_s19, %s6157_s19 }
   0xe   :  { %p6164_p6 = por %p6163_p5, %p6162_p4 }
  0x10   :  { %p6165_p7 = pnand %p6164_p6, %p6158_p3 }
  0x12   :  { %6168 = shalt.err (!%p6165_p7)
}
  0x13   :  { %s6289_s20 = smov 384   ;;  %s6290_s21 = smov 24  }
  0x14   :  { %53 = dma.hbm_to_vmem [thread:$0]  %s7465_s5, 6144, %s48_s26, [#allocation9], %s6289_s20, %s6289_s20, %s6290_s21  }
  0x15   :  { %s6169_s27 = scalar_lea.hbm %s7469_s9, 2048 }
  0x16   :  { %p6170_p8 = scmp.ne.s32.totalorder %s7469_s9, %s6169_s27  ;;  %p6173_p9 = scmp.lt.u32.totalorder %s6169_s27, %s7469_s9 }
  0x18   :  { %p6175_p10 = pnand %p6173_p9, %p6170_p8 }
  0x1a   :  { %6178 = shalt.err (!%p6175_p10)
}
  0x1b   :  { %s6179_s16 = scalar_lea.vmem %s6370_s28, 2048  ;;  %p6184_p12 = scmp.lt.s32.totalorder %s6370_s28, %s6370_s28 }
  0x1c   :  { %p6180_p11 = scmp.ne.s32.totalorder %s6370_s28, %s6179_s16  ;;  %p6185_p13 = scmp.lt.s32.totalorder %s6179_s16, %s6179_s16 }
  0x1e   :  { %p6186_p0 = por %p6185_p13, %p6184_p12 }
  0x20   :  { %p6187_p1 = pnand %p6186_p0, %p6180_p11 }
  0x22   :  { %6190 = shalt.err (!%p6187_p1)
}
  0x23   :  { %s6291_s5 = smov 128   ;;  %s6292_s26 = smov 8  }
  0x24   :  { %81 = dma.hbm_to_vmem [thread:$0]  %s7469_s9, 2048, %s6370_s28, [#allocation12], %s6291_s5, %s6291_s5, %s6292_s26  }
  0x25   :  { %s6293_s19 = smov [#allocation5]   ;;  %s6294_s23 = smov [#allocation10]  }
  0x26   :  { %s31_s22 = sshll.u32 %s6293_s19, 4  ;;  %s59_s24 = sshll.u32 %s6294_s23, 4  ;;  %s32_s22 = int_to_ptr.vmem [resolvable:$true] %s31_s22  ;;  %s6407_s24 = int_to_ptr.vmem [resolvable:$true] %s59_s24 }
  0x27   :  { %s6191_s29 = scalar_lea.hbm %s7462_s2, 6144 }
  0x28   :  { %p6192_p2 = scmp.ne.s32.totalorder %s7462_s2, %s6191_s29  ;;  %p6195_p3 = scmp.lt.u32.totalorder %s6191_s29, %s7462_s2 }
  0x2a   :  { %p6197_p4 = pnand %p6195_p3, %p6192_p2 }
  0x2c   :  { %6200 = shalt.err (!%p6197_p4)
}
  0x2d   :  { %s6201_s9 = scalar_lea.vmem %s32_s22, 6144  ;;  %p6206_p6 = scmp.lt.s32.totalorder %s32_s22, %s32_s22 }
  0x2e   :  { %p6202_p5 = scmp.ne.s32.totalorder %s32_s22, %s6201_s9  ;;  %p6207_p7 = scmp.lt.s32.totalorder %s6201_s9, %s6201_s9 }
  0x30   :  { %p6208_p8 = por %p6207_p7, %p6206_p6 }
  0x32   :  { %p6209_p9 = pnand %p6208_p8, %p6202_p5 }
  0x34   :  { %6212 = shalt.err (!%p6209_p9)
}
  0x35   :  { %37 = dma.hbm_to_vmem [thread:$0]  %s7462_s2, 6144, %s32_s22, [#allocation6], %s6289_s20, %s6289_s20, %s6290_s21  }
  0x36   :  { %s6213_s23 = scalar_lea.hbm %s7466_s6, 6144 }
  0x37   :  { %p6214_p10 = scmp.ne.s32.totalorder %s7466_s6, %s6213_s23  ;;  %p6217_p11 = scmp.lt.u32.totalorder %s6213_s23, %s7466_s6 }
  0x39   :  { %p6219_p12 = pnand %p6217_p11, %p6214_p10 }
  0x3b   :  { %6222 = shalt.err (!%p6219_p12)
}
  0x3c   :  { %s6223_s14 = scalar_lea.vmem %s6407_s24, 6144  ;;  %p6228_p0 = scmp.lt.s32.totalorder %s6407_s24, %s6407_s24 }
  0x3d   :  { %p6224_p13 = scmp.ne.s32.totalorder %s6407_s24, %s6223_s14  ;;  %p6229_p1 = scmp.lt.s32.totalorder %s6223_s14, %s6223_s14 }
  0x3f   :  { %p6230_p2 = por %p6229_p1, %p6228_p0 }
  0x41   :  { %p6231_p3 = pnand %p6230_p2, %p6224_p13 }
  0x43   :  { %6234 = shalt.err (!%p6231_p3)
}
  0x44   :  { %65 = dma.hbm_to_vmem [thread:$0]  %s7466_s6, 6144, %s6407_s24, [#allocation9], %s6289_s20, %s6289_s20, %s6290_s21  }
  0x45   :  { %s6295_s15 = smov [#allocation13]   ;;  %s6235_s17 = scalar_lea.hbm %s7471_s11, 2048 }
  0x46   :  { %s89_s16 = sshll.u32 %s6295_s15, 4  ;;  %p6236_p4 = scmp.ne.s32.totalorder %s7471_s11, %s6235_s17  ;;  %s90_s16 = int_to_ptr.vmem [resolvable:$true] %s89_s16 }
  0x47   :  { %p6239_p5 = scmp.lt.u32.totalorder %s6235_s17, %s7471_s11 }
  0x49   :  { %p6241_p6 = pnand %p6239_p5, %p6236_p4 }
  0x4b   :  { %6244 = shalt.err (!%p6241_p6)
}
  0x4c   :  { %s6245_s27 = scalar_lea.vmem %s90_s16, 2048  ;;  %p6250_p8 = scmp.lt.s32.totalorder %s90_s16, %s90_s16 }
  0x4d   :  { %p6246_p7 = scmp.ne.s32.totalorder %s90_s16, %s6245_s27  ;;  %p6251_p9 = scmp.lt.s32.totalorder %s6245_s27, %s6245_s27 }
  0x4f   :  { %p6252_p10 = por %p6251_p9, %p6250_p8 }
  0x51   :  { %p6253_p11 = pnand %p6252_p10, %p6246_p7 }
  0x53   :  { %6256 = shalt.err (!%p6253_p11)
}
  0x54   :  { %95 = dma.hbm_to_vmem [thread:$0]  %s7471_s11, 2048, %s90_s16, [#allocation12], %s6291_s5, %s6291_s5, %s6292_s26  }
  0x55   :  { %6279 = dma.done.wait [#allocation6], 6144  }
  0x56   :  { %6280 = vsyncadd [#allocation6], 4294961152 }
  0x57   :  { %6281 = dma.done.wait [#allocation9], 12288  }
  0x58   :  { %6282 = vsyncadd [#allocation9], 4294955008 }
  0x59   :  { %6283 = dma.done.wait [#allocation12], 4096  }
  0x5a   :  { %6284 = vsyncadd [#allocation12], 4294963200  ;;  %v6296_v0 = vmov 0.0   ;;  %v114_v1 = vld [vmem:[%s7461_s1 + $0x8] sm:$0xff]  ;;  %v117_v2 = vld [vmem:[%s7461_s1 + $0x20] sm:$0xff]  ;;  %vm193_vm0 = vcmask 130048  }
  0x5b   :  { %282 = vmatprep.mubr.f32.mxu0 %v6296_v0  ;;  %v113_v3 = vld [vmem:[%s7461_s1] sm:$0xff]  ;;  %v4862_v4 = vpack.c.bf16 %v117_v2, %v114_v1  ;;  %v116_v5 = vld [vmem:[%s7461_s1 + $0x18] sm:$0xff]  ;;  %v123_v9 = vld [vmem:[#allocation5 + $0x20] sm:$0xff]  ;;  %v6297_v48 = vmov 0.0|0.0   ;;  %vm6298_vm1 = vmmov 0   ;;  %s6299_s9 = smov [#allocation14]  }
  0x5c   :  { %v169_v6 = vld [vmem:[%s7460_s0] sm:$0xff]  ;;  %v120_v7 = vld [vmem:[#allocation5 + $0x8] sm:$0xff]  ;;  %v4864_v8 = vpack.c.bf16 %v116_v5, %v113_v3  ;;  %v119_v10 = vld [vmem:[#allocation5] sm:$0xff]  ;;  %s3764_s28 = sshll.u32 %s6299_s9, 4  ;;  %s3765_s28 = int_to_ptr.vmem [resolvable:$true] %s3764_s28 }
  0x5d   :  { %v122_v11 = vld [vmem:[#allocation5 + $0x18] sm:$0xff]  ;;  %4176 = vmatprep.mubr.msk.f32.mxu1 %vm193_vm0, %v169_v6  ;;  %4863 = vmatprep.subr.bf16.mxu0 %v4862_v4  ;;  %v6476_v12 = vpack.c.bf16 %v123_v9, %v120_v7  ;;  %v129_v14 = vld [vmem:[#allocation5 + $0x50] sm:$0xff]  ;;  %v128_v18 = vld [vmem:[#allocation5 + $0x48] sm:$0xff]  ;;  %s6257_s17 = scalar_lea.vmem %s3765_s28, 128  ;;  %p6262_p13 = scmp.lt.s32.totalorder %s3765_s28, %s3765_s28 }
  0x5e   :  { %v126_v13 = vld [vmem:[#allocation5 + $0x38] sm:$0xff]  ;;  %4865 = vmatpush1.bf16.msra.mxu0 %v4864_v8  ;;  %v6478_v15 = vpack.c.bf16 %v122_v11, %v119_v10  ;;  %v125_v17 = vld [vmem:[#allocation5 + $0x30] sm:$0xff]  ;;  %v132_v19 = vld [vmem:[#allocation5 + $0x68] sm:$0xff]  ;;  %p6258_p12 = scmp.ne.s32.totalorder %s3765_s28, %s6257_s17  ;;  %p6263_p0 = scmp.lt.s32.totalorder %s6257_s17, %s6257_s17 }
  0x5f   :  { %4871 = vmatprep.subr.bf16.mxu0 %v6476_v12  ;;  %v6481_v16 = vpack.c.bf16 %v129_v14, %v126_v13  ;;  %v135_v20 = vld [vmem:[#allocation5 + $0x80] sm:$0xff]  ;;  %v170_v21 = vld [vmem:[%s7460_s0 + $0x8] sm:$0xff]  ;;  %v6489_v22 = vpack.c.bf16 %v128_v18, %v125_v17  ;;  %v141_v27 = vld [vmem:[#allocation5 + $0xb0] sm:$0xff] }
  0x60   :  { %v6492_v23 = vpack.c.bf16 %v135_v20, %v132_v19  ;;  %v131_v24 = vld [vmem:[#allocation5 + $0x60] sm:$0xff]  ;;  %v134_v25 = vld [vmem:[#allocation5 + $0x78] sm:$0xff]  ;;  %v137_v34 = vld [vmem:[#allocation5 + $0x90] sm:$0xff]  ;;  %p6264_p1 = por %p6263_p0, %p6262_p13 }
  0x61   :  { %3782 = vmatmul.mubr.msk.f32.vlgmr.msra.gmra.mrb[0].mxu0 %vm193_vm0, %v169_v6  ;;  %v138_v26 = vld [vmem:[#allocation5 + $0x98] sm:$0xff]  ;;  %v115_v28 = vld [vmem:[%s7461_s1 + $0x10] sm:$0xff]  ;;  %v6506_v31 = vpack.c.bf16 %v134_v25, %v131_v24  ;;  %v140_v35 = vld [vmem:[#allocation5 + $0xa8] sm:$0xff] }
  0x62   :  { %4873 = vmatpush1.bf16.msra.mxu0 %v6478_v15  ;;  %288 = vmatprep.mubr.f32.mxu0 %v6296_v0  ;;  %v118_v29 = vld [vmem:[%s7461_s1 + $0x28] sm:$0xff]  ;;  %v171_v30 = vld [vmem:[%s7460_s0 + $0x10] sm:$0xff]  ;;  %v6509_v33 = vpack.c.bf16 %v141_v27, %v138_v26  ;;  %v121_v36 = vld [vmem:[#allocation5 + $0x10] sm:$0xff]  ;;  %v6519_v42 = vpack.c.bf16 %v140_v35, %v137_v34  ;;  %v178_v35 = vlaneseq  ;;  %p6265_p2 = pnand %p6264_p1, %p6258_p12 }
  0x63   :  { %4875 = vmatprep.subr.bf16.mxu0 %v6481_v16  ;;  %v4866_v32 = vpack.c.bf16 %v118_v29, %v115_v28  ;;  %v144_v37 = vld [vmem:[#allocation5 + $0xc8] sm:$0xff]  ;;  %v147_v38 = vld [vmem:[#allocation5 + $0xe0] sm:$0xff]  ;;  %v130_v44 = vld [vmem:[#allocation5 + $0x58] sm:$0xff] }
  0x64   :  { %v124_v39 = vld [vmem:[#allocation5 + $0x28] sm:$0xff]  ;;  %v127_v43 = vld [vmem:[#allocation5 + $0x40] sm:$0xff]  ;;  %v6522_v45 = vpack.c.bf16 %v147_v38, %v144_v37  ;;  %v146_v47 = vld [vmem:[#allocation5 + $0xd8] sm:$0xff] }
  0x65   :  { %3783 = vmatmul.mubr.msk.f32.gmra.mrb[2].mxu0 %vm193_vm0, %v170_v21  ;;  %4867 = vmatprep.subr.bf16.mxu1 %v4866_v32  ;;  %v6512_v40 = vpack.c.bf16 %v124_v39, %v121_v36  ;;  %v172_v41 = vld [vmem:[%s7460_s0 + $0x18] sm:$0xff]  ;;  %v143_v46 = vld [vmem:[#allocation5 + $0xc0] sm:$0xff]  ;;  %v150_v49 = vld [vmem:[#allocation5 + $0xf8] sm:$0xff]  ;;  %v6528_v51 = vpack.c.bf16 %v130_v44, %v127_v43  ;;  %v179_v36 = vshrl.u32 %v178_v35, 7 }
  0x66   :  { %4877 = vmatpush1.bf16.msra.mxu0 %v6489_v22  ;;  %294 = vmatprep.mubr.f32.mxu0 %v6296_v0  ;;  %v153_v50 = vld [vmem:[#allocation5 + $0x110] sm:$0xff]  ;;  %v6535_v53 = vpack.c.bf16 %v146_v47, %v143_v46  ;;  %v136_v55 = vld [vmem:[#allocation5 + $0x88] sm:$0xff]  ;;  %v159_v60 = vld [vmem:[#allocation5 + $0x140] sm:$0xff] }
  0x67   :  { %4879 = vmatprep.subr.bf16.mxu0 %v6492_v23  ;;  %4869 = vmatpush3.bf16.msra.mxu1 %v4866_v32  ;;  %v173_v52 = vld [vmem:[%s7460_s0 + $0x20] sm:$0xff]  ;;  %v6538_v56 = vpack.c.bf16 %v153_v50, %v150_v49  ;;  %v152_v58 = vld [vmem:[#allocation5 + $0x108] sm:$0xff]  ;;  %v174_v62 = vld [vmem:[%s7460_s0 + $0x28] sm:$0xff]  ;;  %v6647_v37 = vsub.s32 2, %v179_v36  ;;  %v6657_v50 = vsub.s32 0, %v179_v36 }
  0x68   :  { %4902 = vmatprep.subr.bf16.mxu1 %v6297_v48  ;;  %v133_v54 = vld [vmem:[#allocation5 + $0x70] sm:$0xff]  ;;  %v156_v59 = vld [vmem:[#allocation5 + $0x128] sm:$0xff]  ;;  %v139_v1 = vld [vmem:[#allocation5 + $0xa0] sm:$0xff] }
  0x69   :  { %3784 = vmatmul.mubr.msk.f32.gmra.mrb[4].mxu0 %vm193_vm0, %v171_v30  ;;  %v149_v57 = vld [vmem:[#allocation5 + $0xf0] sm:$0xff]  ;;  %v6544_v61 = vpack.c.bf16 %v136_v55, %v133_v54  ;;  %v142_v2 = vld [vmem:[#allocation5 + $0xb8] sm:$0xff]  ;;  %v6554_v3 = vpack.c.bf16 %v159_v60, %v156_v59  ;;  %v155_v4 = vld [vmem:[#allocation5 + $0x120] sm:$0xff]  ;;  %v6664_v55 = vsub.s32 1, %v179_v36 }
  0x6a   :  { %4881 = vmatpush1.bf16.msra.mxu0 %v6506_v31  ;;  %300 = vmatprep.mubr.f32.mxu0 %v6296_v0  ;;  %v6551_v63 = vpack.c.bf16 %v152_v58, %v149_v57  ;;  %v158_v5 = vld [vmem:[#allocation5 + $0x138] sm:$0xff]  ;;  %v165_v7 = vld [vmem:[#allocation5 + $0x170] sm:$0xff]  ;;  %v6560_v8 = vpack.c.bf16 %v142_v2, %v139_v1  ;;  %v175_v9 = vld [vmem:[%s7460_s0 + $0x30] sm:$0xff] }
  0x6b   :  { %4883 = vmatprep.subr.bf16.mxu0 %v6509_v33  ;;  %4177 = vmatmul.mubr.msk.f32.vlgmr.msra.gmra.mrb[0].mxu1 %vm193_vm0, %v170_v21  ;;  %v162_v6 = vld [vmem:[#allocation5 + $0x158] sm:$0xff]  ;;  %v6567_v10 = vpack.c.bf16 %v158_v5, %v155_v4  ;;  %v145_v11 = vld [vmem:[#allocation5 + $0xd0] sm:$0xff]  ;;  %v148_v13 = vld [vmem:[#allocation5 + $0xe8] sm:$0xff] }
  0x6c   :  { %4904 = vmatpush3.bf16.msra.mxu1 %v6512_v40  ;;  %4179 = vmatprep.mubr.msk.f32.mxu1 %vm193_vm0, %v171_v30  ;;  %v6570_v14 = vpack.c.bf16 %v165_v7, %v162_v6  ;;  %v161_v17 = vld [vmem:[#allocation5 + $0x150] sm:$0xff]  ;;  %v164_v18 = vld [vmem:[#allocation5 + $0x168] sm:$0xff]  ;;  %v6576_v19 = vpack.c.bf16 %v148_v13, %v145_v11  ;;  %v151_v24 = vld [vmem:[#allocation5 + $0x100] sm:$0xff] }
  0x6d   :  { %3785 = vmatmul.mubr.msk.f32.gmra.mrb[6].mxu0 %vm193_vm0, %v172_v41  ;;  %4905 = vmatprep.subr.bf16.mxu1 %v6297_v48  ;;  %v176_v20 = vld [vmem:[%s7460_s0 + $0x38] sm:$0xff]  ;;  %v6583_v21 = vpack.c.bf16 %v164_v18, %v161_v17  ;;  %v154_v25 = vld [vmem:[#allocation5 + $0x118] sm:$0xff]  ;;  %v157_v27 = vld [vmem:[#allocation5 + $0x130] sm:$0xff] }
  0x6e   :  { %4885 = vmatpush1.bf16.msra.mxu0 %v6519_v42  ;;  %306 = vmatprep.mubr.f32.mxu0 %v6296_v0  ;;  %v6590_v26 = vpack.c.bf16 %v154_v25, %v151_v24  ;;  %v160_v28 = vld [vmem:[#allocation5 + $0x148] sm:$0xff]  ;;  %v163_v30 = vld [vmem:[#allocation5 + $0x160] sm:$0xff]  ;;  %v166_v32 = vld [vmem:[#allocation5 + $0x178] sm:$0xff] }
  0x6f   :  { %4887 = vmatprep.subr.bf16.mxu0 %v6522_v45  ;;  %4180 = vmatmul.mubr.msk.f32.gmra.mrb[2].mxu1 %vm193_vm0, %v172_v41  ;;  %v6600_v29 = vpack.c.bf16 %v160_v28, %v157_v27  ;;  %v6609_v34 = vpack.c.bf16 %v166_v32, %v163_v30  ;;  %v167_v38 = vld [vmem:[%s7463_s3] sm:$0x7] }
  0x70   :  { %4907 = vmatpush3.bf16.msra.mxu1 %v6528_v51  ;;  %4182 = vmatprep.mubr.msk.f32.mxu1 %vm193_vm0, %v173_v52  ;;  %v189_v39 = vrot.slane %v167_v38, %v6647_v37  ;;  %v168_v54 = vld [vmem:[%s7464_s4] sm:$0x7]  ;;  %v181_v57 = vrot.slane %v167_v38, %v6657_v50  ;;  %v185_v60 = vrot.slane %v167_v38, %v6664_v55 }
  0x71   :  { %3786 = vmatmul.mubr.msk.f32.gmra.mrb[8].mxu0 %vm193_vm0, %v173_v52  ;;  %4908 = vmatprep.subr.bf16.mxu1 %v6297_v48  ;;  %v465_v58 = vrot.slane %v168_v54, %v6657_v50  ;;  %v6685_v36 = vrot.slane %v168_v54, %v6647_v37 }
  0x72   :  { %4889 = vmatpush1.bf16.msra.mxu0 %v6535_v53  ;;  %312 = vmatprep.mubr.f32.mxu0 %v6296_v0 }
  0x73   :  { %4891 = vmatprep.subr.bf16.mxu0 %v6538_v56  ;;  %4183 = vmatmul.mubr.msk.f32.gmra.mrb[4].mxu1 %vm193_vm0, %v174_v62  ;;  %v6672_v4 = vadd.f32 %v465_v58, %v181_v57 }
  0x74   :  { %4910 = vmatpush3.bf16.msra.mxu1 %v6544_v61  ;;  %4185 = vmatprep.mubr.msk.f32.mxu1 %vm193_vm0, %v175_v9 }
  0x75   :  { %3787 = vmatmul.mubr.msk.f32.gmra.mrb[10].mxu0 %vm193_vm0, %v174_v62  ;;  %4911 = vmatprep.subr.bf16.mxu1 %v6297_v48  ;;  %v469_v62 = vrot.slane %v168_v54, %v6664_v55 }
  0x76   :  { %4893 = vmatpush1.bf16.msra.mxu0 %v6551_v63  ;;  %318 = vmatprep.mubr.f32.mxu0 %v6296_v0 }
  0x77   :  { %4895 = vmatprep.subr.bf16.mxu0 %v6554_v3  ;;  %4186 = vmatmul.mubr.msk.f32.gmra.mrb[6].mxu1 %vm193_vm0, %v176_v20 }
  0x78   :  { %4913 = vmatpush3.bf16.msra.mxu1 %v6560_v8  ;;  %4220 = vmatprep.mubr.msk.f32.mxu1 %vm6298_vm1, %v6296_v0 }
  0x79   :  { %3788 = vmatmul.mubr.msk.f32.gmra.mrb[12].mxu0 %vm193_vm0, %v175_v9  ;;  %4914 = vmatprep.subr.bf16.mxu1 %v6297_v48  ;;  %v6676_v9 = vadd.f32 %v469_v62, %v185_v60 }
  0x7a   :  { %4897 = vmatpush1.bf16.msra.mxu0 %v6567_v10  ;;  %324 = vmatprep.mubr.f32.mxu0 %v6296_v0 }
  0x7b   :  { %4899 = vmatprep.subr.bf16.mxu0 %v6570_v14 }
  0x7c   :  { %4916 = vmatpush3.bf16.msra.mxu1 %v6576_v19 }
  0x7d   :  { %3789 = vmatmul.mubr.msk.f32.gmra.mrb[14].mxu0 %vm193_vm0, %v176_v20  ;;  %4917 = vmatprep.subr.bf16.mxu1 %v6297_v48 }
  0x7e   :  { %4901 = vmatpush1.bf16.msra.mxu0 %v6583_v21  ;;  %548 = vmatprep.mubr.f32.mxu0 %v6296_v0 }
  0x7f   :  { %4927 = vmatprep.subr.bf16.mxu0 %v6476_v12 }
  0x80   :  { %4919 = vmatpush3.bf16.msra.mxu1 %v6590_v26 }
  0x81   :  { %549 = vmatmul.mubr.f32.vlgmr.msra.gmra.mrb[0].mxu0 %v6296_v0  ;;  %4920 = vmatprep.subr.bf16.mxu1 %v6297_v48 }
  0x82   :  { %4929 = vmatpush1.bf16.msra.mxu0 %v6478_v15  ;;  %719 = vmatprep.mubr.f32.mxu0 %v6296_v0 }
  0x83   :  { %4931 = vmatprep.subr.bf16.mxu0 %v6481_v16 }
  0x84   :  { %4922 = vmatpush3.bf16.msra.mxu1 %v6600_v29 }
  0x85   :  { %4923 = vmatprep.subr.bf16.mxu1 %v6297_v48 }
  0x86   :  { %4933 = vmatpush1.bf16.msra.mxu0 %v6489_v22 }
  0x87   :  { %4935 = vmatprep.subr.bf16.mxu0 %v6492_v23 }
  0x88   :  { %4925 = vmatpush3.bf16.msra.mxu1 %v6609_v34 }
  0x89   :  { %4958 = vmatprep.subr.bf16.mxu1 %v6297_v48 }
  0x8a   :  { %4937 = vmatpush1.bf16.msra.mxu0 %v6506_v31 }
  0x8b   :  { %4221 = vmatmul.mubr.f32.vlgmr.msra.gmra.mrb[8].mxu1 %v6296_v0  ;;  %4939 = vmatprep.subr.bf16.mxu0 %v6509_v33 }
  0x8c   :  { %4960 = vmatpush3.bf16.msra.mxu1 %v6512_v40  ;;  %4255 = vmatprep.mubr.msk.f32.mxu1 %vm6298_vm1, %v6296_v0 }
  0x8d   :  { %4961 = vmatprep.subr.bf16.mxu1 %v6297_v48 }
  0x8e   :  { %4941 = vmatpush1.bf16.msra.mxu0 %v6519_v42 }
  0x8f   :  { %4943 = vmatprep.subr.bf16.mxu0 %v6522_v45 }
  0x90   :  { %4963 = vmatpush3.bf16.msra.mxu1 %v6528_v51 }
  0x91   :  { %4964 = vmatprep.subr.bf16.mxu1 %v6297_v48 }
  0x92   :  { %4945 = vmatpush1.bf16.msra.mxu0 %v6535_v53 }
  0x93   :  { %4947 = vmatprep.subr.bf16.mxu0 %v6538_v56 }
  0x94   :  { %4966 = vmatpush3.bf16.msra.mxu1 %v6544_v61 }
  0x95   :  { %4967 = vmatprep.subr.bf16.mxu1 %v6297_v48 }
  0x96   :  { %4949 = vmatpush1.bf16.msra.mxu0 %v6551_v63 }
  0x97   :  { %4951 = vmatprep.subr.bf16.mxu0 %v6554_v3 }
  0x98   :  { %4969 = vmatpush3.bf16.msra.mxu1 %v6560_v8 }
  0x99   :  { %4970 = vmatprep.subr.bf16.mxu1 %v6297_v48 }
  0x9a   :  { %4953 = vmatpush1.bf16.msra.mxu0 %v6567_v10 }
  0x9b   :  { %4955 = vmatprep.subr.bf16.mxu0 %v6570_v14 }
  0x9c   :  { %4972 = vmatpush3.bf16.msra.mxu1 %v6576_v19 }
  0x9d   :  { %4973 = vmatprep.subr.bf16.mxu1 %v6297_v48 }
  0x9e   :  { %4957 = vmatpush1.bf16.msra.mxu0 %v6583_v21 }
  0x9f   :  { %4983 = vmatprep.subr.bf16.mxu0 %v6476_v12 }
  0xa0   :  { %4975 = vmatpush3.bf16.msra.mxu1 %v6590_v26 }
  0xa1   :  { %4976 = vmatprep.subr.bf16.mxu1 %v6297_v48 }
  0xa4   :  { %4978 = vmatpush3.bf16.msra.mxu1 %v6600_v29 }
  0xa5   :  { %4979 = vmatprep.subr.bf16.mxu1 %v6297_v48 }
  0xa8   :  { %4981 = vmatpush3.bf16.msra.mxu1 %v6609_v34 }
  0xa9   :  { %5014 = vmatprep.subr.bf16.mxu1 %v6297_v48 }
 0x13e   :  { %v4178_v41 = vpop.f32.mrb[0].mxu1 }
 0x13f   :  { %v6653_v43 = vadd.f32 %v4178_v41, %v189_v39  ;;  %v397_v44 = vpop.f32.mrb[1].mxu1 }
 0x140   :  { %v398_v57 = vadd.f32 %v397_v44, %v189_v39 }
 0x142   :  { %v4181_v46 = vpop.f32.mrb[2].mxu1 }
 0x143   :  { %v6655_v47 = vadd.f32 %v4181_v46, %v189_v39  ;;  %v407_v49 = vpop.f32.mrb[3].mxu1 }
 0x144   :  { %v6659_v52 = vadd.f32 %v407_v49, %v189_v39 }
 0x146   :  { %v4184_v59 = vpop.f32.mrb[4].mxu1 }
 0x147   :  { %v6670_v1 = vadd.f32 %v4184_v59, %v189_v39  ;;  %v417_v2 = vpop.f32.mrb[5].mxu1 }
 0x148   :  { %v6674_v5 = vadd.f32 %v417_v2, %v189_v39 }
 0x14a   :  { %v4187_v6 = vpop.f32.mrb[6].mxu1 }
 0x14b   :  { %v6678_v11 = vadd.f32 %v4187_v6, %v189_v39  ;;  %v427_v13 = vpop.f32.mrb[7].mxu1 }
 0x14c   :  { %v6681_v20 = vadd.f32 %v427_v13, %v189_v39 }
 0x154   :  { %v550_v7 = vpop.f32.mrb[0].mxu0 }
 0x155   :  { %v5879_v17 = vadd.f32 %v6672_v4, %v550_v7  ;;  %v552_v18 = vpop.f32.mrb[1].mxu0 }
 0x156   :  { %v5881_v25 = vadd.f32 %v6676_v9, %v552_v18 }
 0x157   :  { %v3798_v24 = vmul.f32 -1.442695, %v5879_v17 }
 0x158   :  { %v3799_v27 = vmul.f32 -1.442695, %v5881_v25 }
 0x159   :  { %5987 = vpow2.f32 %v3798_v24 }
 0x15a   :  { %5989 = vpow2.f32 %v3799_v27 }
 0x15e   :  { %v621_v28 = vpop.f32.mrb[8].mxu1 }
 0x15f   :  { %v4222_v30 = vpop.f32.mrb[9].mxu1  ;;  %v622_v46 = vadd.f32 %v621_v28, %v6685_v36 }
 0x163   :  { %v5988_v32 = vpop.eup %5987 }
 0x164   :  { %v629_v35 = vadd.f32 1.0, %v5988_v32  ;;  %v5990_v38 = vpop.eup %5989 }
 0x165   :  { %v636_v41 = vadd.f32 1.0, %v5990_v38 }
 0x166   :  { %5991 = vrcp.f32 %v629_v35 }
 0x167   :  { %5993 = vrcp.f32 %v636_v41 }
 0x170   :  { %v5992_v49 = vpop.eup %5991 }
 0x171   :  { %v639_v58 = vmul.f32 %v5992_v49, %v622_v46  ;;  %v5994_v60 = vpop.eup %5993 }
 0x172   :  { %v642_v62 = vsub.f32 1.0, %v5994_v60  ;;  %v644_v7 = vmul.f32 0.0, %v5994_v60 }
 0x173   :  { %v640_v59 = vadd.f32 %v639_v58, %v398_v57 }
 0x175   :  { %5995 = vtanh.f32 %v640_v59 }
 0x17f   :  { %v5996_v2 = vpop.eup %5995 }
 0x180   :  { %v643_v6 = vmul.f32 %v5996_v2, %v642_v62 }
 0x182   :  { %v6688_v13 = vadd.f32 %v644_v7, %v643_v6 }
 0x184   :  { %720 = vmatmul.mubr.f32.vlgmr.msra.gmra.mrb[2].mxu0 %v6688_v13  ;;  %4256 = vmatmul.mubr.f32.vlgmr.msra.gmra.mrb[10].mxu1 %v6688_v13 }
 0x185   :  { %4985 = vmatpush1.bf16.msra.mxu0 %v6478_v15  ;;  %5016 = vmatpush3.bf16.msra.mxu1 %v6512_v40 }
 0x186   :  { %4987 = vmatprep.subr.bf16.mxu0 %v6481_v16  ;;  %5017 = vmatprep.subr.bf16.mxu1 %v6297_v48 }
 0x187   :  { %891 = vmatprep.mubr.f32.mxu0 %v6296_v0  ;;  %4290 = vmatprep.mubr.msk.f32.mxu1 %vm6298_vm1, %v6296_v0 }
 0x189   :  { %4989 = vmatpush1.bf16.msra.mxu0 %v6489_v22  ;;  %5019 = vmatpush3.bf16.msra.mxu1 %v6528_v51 }
 0x18a   :  { %4991 = vmatprep.subr.bf16.mxu0 %v6492_v23  ;;  %5020 = vmatprep.subr.bf16.mxu1 %v6297_v48 }
 0x18d   :  { %4993 = vmatpush1.bf16.msra.mxu0 %v6506_v31  ;;  %5022 = vmatpush3.bf16.msra.mxu1 %v6544_v61 }
 0x18e   :  { %4995 = vmatprep.subr.bf16.mxu0 %v6509_v33  ;;  %5023 = vmatprep.subr.bf16.mxu1 %v6297_v48 }
 0x191   :  { %4997 = vmatpush1.bf16.msra.mxu0 %v6519_v42  ;;  %5025 = vmatpush3.bf16.msra.mxu1 %v6560_v8 }
 0x192   :  { %4999 = vmatprep.subr.bf16.mxu0 %v6522_v45  ;;  %5026 = vmatprep.subr.bf16.mxu1 %v6297_v48 }
 0x195   :  { %5001 = vmatpush1.bf16.msra.mxu0 %v6535_v53  ;;  %5028 = vmatpush3.bf16.msra.mxu1 %v6576_v19 }
 0x196   :  { %5003 = vmatprep.subr.bf16.mxu0 %v6538_v56  ;;  %5029 = vmatprep.subr.bf16.mxu1 %v6297_v48 }
 0x199   :  { %5005 = vmatpush1.bf16.msra.mxu0 %v6551_v63  ;;  %5031 = vmatpush3.bf16.msra.mxu1 %v6590_v26 }
 0x19a   :  { %5007 = vmatprep.subr.bf16.mxu0 %v6554_v3  ;;  %5032 = vmatprep.subr.bf16.mxu1 %v6297_v48 }
 0x19d   :  { %5009 = vmatpush1.bf16.msra.mxu0 %v6567_v10  ;;  %5034 = vmatpush3.bf16.msra.mxu1 %v6600_v29 }
 0x19e   :  { %5011 = vmatprep.subr.bf16.mxu0 %v6570_v14  ;;  %5035 = vmatprep.subr.bf16.mxu1 %v6297_v48 }
 0x1a1   :  { %5013 = vmatpush1.bf16.msra.mxu0 %v6583_v21  ;;  %5037 = vmatpush3.bf16.msra.mxu1 %v6609_v34 }
 0x1a2   :  { %5039 = vmatprep.subr.bf16.mxu0 %v6476_v12  ;;  %5070 = vmatprep.subr.bf16.mxu1 %v6297_v48 }
 0x257   :  { %v721_v39 = vpop.f32.mrb[2].mxu0  ;;  %v792_v44 = vpop.f32.mrb[10].mxu1 }
 0x258   :  { %v5883_v54 = vadd.f32 %v6672_v4, %v721_v39  ;;  %v723_v17 = vpop.f32.mrb[3].mxu0  ;;  %v4257_v18 = vpop.f32.mrb[11].mxu1  ;;  %v793_v38 = vadd.f32 %v792_v44, %v6685_v36 }
 0x259   :  { %v5885_v25 = vadd.f32 %v6676_v9, %v723_v17 }
 0x25a   :  { %v3800_v24 = vmul.f32 -1.442695, %v5883_v54 }
 0x25b   :  { %v3801_v27 = vmul.f32 -1.442695, %v5885_v25 }
 0x25c   :  { %5997 = vpow2.f32 %v3800_v24 }
 0x25d   :  { %5999 = vpow2.f32 %v3801_v27 }
 0x266   :  { %v5998_v28 = vpop.eup %5997 }
 0x267   :  { %v800_v30 = vadd.f32 1.0, %v5998_v28  ;;  %v6000_v32 = vpop.eup %5999 }
 0x268   :  { %v807_v35 = vadd.f32 1.0, %v6000_v32 }
 0x269   :  { %6001 = vrcp.f32 %v800_v30 }
 0x26a   :  { %6003 = vrcp.f32 %v807_v35 }
 0x273   :  { %v6002_v41 = vpop.eup %6001 }
 0x274   :  { %v810_v46 = vmul.f32 %v6002_v41, %v793_v38  ;;  %v6004_v57 = vpop.eup %6003 }
 0x275   :  { %v813_v58 = vsub.f32 1.0, %v6004_v57  ;;  %v815_v62 = vmul.f32 %v6004_v57, %v6688_v13 }
 0x276   :  { %v811_v49 = vadd.f32 %v810_v46, %v6653_v43 }
 0x278   :  { %6005 = vtanh.f32 %v811_v49 }
 0x282   :  { %v6006_v59 = vpop.eup %6005 }
 0x283   :  { %v814_v60 = vmul.f32 %v6006_v59, %v813_v58 }
 0x285   :  { %v6732_v2 = vadd.f32 %v815_v62, %v814_v60 }
 0x287   :  { %892 = vmatmul.mubr.f32.vlgmr.msra.gmra.mrb[4].mxu0 %v6732_v2  ;;  %4291 = vmatmul.mubr.f32.vlgmr.msra.gmra.mrb[12].mxu1 %v6732_v2 }
 0x288   :  { %5041 = vmatpush1.bf16.msra.mxu0 %v6478_v15  ;;  %5072 = vmatpush3.bf16.msra.mxu1 %v6512_v40 }
 0x289   :  { %5043 = vmatprep.subr.bf16.mxu0 %v6481_v16  ;;  %5073 = vmatprep.subr.bf16.mxu1 %v6297_v48 }
 0x28a   :  { %1063 = vmatprep.mubr.f32.mxu0 %v6296_v0  ;;  %4325 = vmatprep.mubr.msk.f32.mxu1 %vm6298_vm1, %v6296_v0 }
 0x28c   :  { %5045 = vmatpush1.bf16.msra.mxu0 %v6489_v22  ;;  %5075 = vmatpush3.bf16.msra.mxu1 %v6528_v51 }
 0x28d   :  { %5047 = vmatprep.subr.bf16.mxu0 %v6492_v23  ;;  %5076 = vmatprep.subr.bf16.mxu1 %v6297_v48 }
 0x290   :  { %5049 = vmatpush1.bf16.msra.mxu0 %v6506_v31  ;;  %5078 = vmatpush3.bf16.msra.mxu1 %v6544_v61 }
 0x291   :  { %5051 = vmatprep.subr.bf16.mxu0 %v6509_v33  ;;  %5079 = vmatprep.subr.bf16.mxu1 %v6297_v48 }
 0x294   :  { %5053 = vmatpush1.bf16.msra.mxu0 %v6519_v42  ;;  %5081 = vmatpush3.bf16.msra.mxu1 %v6560_v8 }
 0x295   :  { %5055 = vmatprep.subr.bf16.mxu0 %v6522_v45  ;;  %5082 = vmatprep.subr.bf16.mxu1 %v6297_v48 }
 0x298   :  { %5057 = vmatpush1.bf16.msra.mxu0 %v6535_v53  ;;  %5084 = vmatpush3.bf16.msra.mxu1 %v6576_v19 }
 0x299   :  { %5059 = vmatprep.subr.bf16.mxu0 %v6538_v56  ;;  %5085 = vmatprep.subr.bf16.mxu1 %v6297_v48 }
 0x29c   :  { %5061 = vmatpush1.bf16.msra.mxu0 %v6551_v63  ;;  %5087 = vmatpush3.bf16.msra.mxu1 %v6590_v26 }
 0x29d   :  { %5063 = vmatprep.subr.bf16.mxu0 %v6554_v3  ;;  %5088 = vmatprep.subr.bf16.mxu1 %v6297_v48 }
 0x2a0   :  { %5065 = vmatpush1.bf16.msra.mxu0 %v6567_v10  ;;  %5090 = vmatpush3.bf16.msra.mxu1 %v6600_v29 }
 0x2a1   :  { %5067 = vmatprep.subr.bf16.mxu0 %v6570_v14  ;;  %5091 = vmatprep.subr.bf16.mxu1 %v6297_v48 }
 0x2a4   :  { %5069 = vmatpush1.bf16.msra.mxu0 %v6583_v21  ;;  %5093 = vmatpush3.bf16.msra.mxu1 %v6609_v34 }
 0x2a5   :  { %5095 = vmatprep.subr.bf16.mxu0 %v6476_v12  ;;  %5126 = vmatprep.subr.bf16.mxu1 %v6297_v48 }
 0x35a   :  { %v893_v43 = vpop.f32.mrb[4].mxu0  ;;  %v964_v6 = vpop.f32.mrb[12].mxu1 }
 0x35b   :  { %v5887_v7 = vadd.f32 %v6672_v4, %v893_v43  ;;  %v895_v39 = vpop.f32.mrb[5].mxu0  ;;  %v4292_v44 = vpop.f32.mrb[13].mxu1  ;;  %v965_v30 = vadd.f32 %v964_v6, %v6685_v36 }
 0x35c   :  { %v5889_v17 = vadd.f32 %v6676_v9, %v895_v39 }
 0x35d   :  { %v3802_v54 = vmul.f32 -1.442695, %v5887_v7 }
 0x35e   :  { %v3803_v18 = vmul.f32 -1.442695, %v5889_v17 }
 0x35f   :  { %6007 = vpow2.f32 %v3802_v54 }
 0x360   :  { %6009 = vpow2.f32 %v3803_v18 }
 0x369   :  { %v6008_v24 = vpop.eup %6007 }
 0x36a   :  { %v972_v25 = vadd.f32 1.0, %v6008_v24  ;;  %v6010_v27 = vpop.eup %6009 }
 0x36b   :  { %v979_v28 = vadd.f32 1.0, %v6010_v27 }
 0x36c   :  { %6011 = vrcp.f32 %v972_v25 }
 0x36d   :  { %6013 = vrcp.f32 %v979_v28 }
 0x376   :  { %v6012_v32 = vpop.eup %6011 }
 0x377   :  { %v982_v35 = vmul.f32 %v6012_v32, %v965_v30  ;;  %v6014_v41 = vpop.eup %6013 }
 0x378   :  { %v985_v46 = vsub.f32 1.0, %v6014_v41  ;;  %v987_v58 = vmul.f32 %v6014_v41, %v6732_v2 }
 0x379   :  { %v983_v38 = vadd.f32 %v982_v35, %v6659_v52 }
 0x37b   :  { %6015 = vtanh.f32 %v983_v38 }
 0x385   :  { %v6016_v49 = vpop.eup %6015 }
 0x386   :  { %v986_v57 = vmul.f32 %v6016_v49, %v985_v46 }
 0x388   :  { %v6776_v59 = vadd.f32 %v987_v58, %v986_v57 }
 0x38a   :  { %1064 = vmatmul.mubr.f32.vlgmr.msra.gmra.mrb[6].mxu0 %v6776_v59  ;;  %4326 = vmatmul.mubr.f32.vlgmr.msra.gmra.mrb[14].mxu1 %v6776_v59 }
 0x38b   :  { %5097 = vmatpush1.bf16.msra.mxu0 %v6478_v15  ;;  %5128 = vmatpush3.bf16.msra.mxu1 %v6512_v40 }
 0x38c   :  { %5099 = vmatprep.subr.bf16.mxu0 %v6481_v16  ;;  %5129 = vmatprep.subr.bf16.mxu1 %v6297_v48 }
 0x38d   :  { %1235 = vmatprep.mubr.f32.mxu0 %v6296_v0  ;;  %4360 = vmatprep.mubr.msk.f32.mxu1 %vm6298_vm1, %v6296_v0 }
 0x38f   :  { %5101 = vmatpush1.bf16.msra.mxu0 %v6489_v22  ;;  %5131 = vmatpush3.bf16.msra.mxu1 %v6528_v51 }
 0x390   :  { %5103 = vmatprep.subr.bf16.mxu0 %v6492_v23  ;;  %5132 = vmatprep.subr.bf16.mxu1 %v6297_v48 }
 0x393   :  { %5105 = vmatpush1.bf16.msra.mxu0 %v6506_v31  ;;  %5134 = vmatpush3.bf16.msra.mxu1 %v6544_v61 }
 0x394   :  { %5107 = vmatprep.subr.bf16.mxu0 %v6509_v33  ;;  %5135 = vmatprep.subr.bf16.mxu1 %v6297_v48 }
 0x397   :  { %5109 = vmatpush1.bf16.msra.mxu0 %v6519_v42  ;;  %5137 = vmatpush3.bf16.msra.mxu1 %v6560_v8 }
 0x398   :  { %5111 = vmatprep.subr.bf16.mxu0 %v6522_v45  ;;  %5138 = vmatprep.subr.bf16.mxu1 %v6297_v48 }
 0x39b   :  { %5113 = vmatpush1.bf16.msra.mxu0 %v6535_v53  ;;  %5140 = vmatpush3.bf16.msra.mxu1 %v6576_v19 }
 0x39c   :  { %5115 = vmatprep.subr.bf16.mxu0 %v6538_v56  ;;  %5141 = vmatprep.subr.bf16.mxu1 %v6297_v48 }
 0x39f   :  { %5117 = vmatpush1.bf16.msra.mxu0 %v6551_v63  ;;  %5143 = vmatpush3.bf16.msra.mxu1 %v6590_v26 }
 0x3a0   :  { %5119 = vmatprep.subr.bf16.mxu0 %v6554_v3  ;;  %5144 = vmatprep.subr.bf16.mxu1 %v6297_v48 }
 0x3a3   :  { %5121 = vmatpush1.bf16.msra.mxu0 %v6567_v10  ;;  %5146 = vmatpush3.bf16.msra.mxu1 %v6600_v29 }
 0x3a4   :  { %5123 = vmatprep.subr.bf16.mxu0 %v6570_v14  ;;  %5147 = vmatprep.subr.bf16.mxu1 %v6297_v48 }
 0x3a7   :  { %5125 = vmatpush1.bf16.msra.mxu0 %v6583_v21  ;;  %5149 = vmatpush3.bf16.msra.mxu1 %v6609_v34 }
 0x3a8   :  { %5151 = vmatprep.subr.bf16.mxu0 %v6476_v12  ;;  %5182 = vmatprep.subr.bf16.mxu1 %v6297_v48 }
 0x45d   :  { %v1065_v52 = vpop.f32.mrb[6].mxu0  ;;  %v1136_v60 = vpop.f32.mrb[14].mxu1 }
 0x45e   :  { %v5891_v62 = vadd.f32 %v6672_v4, %v1065_v52  ;;  %v1067_v43 = vpop.f32.mrb[7].mxu0  ;;  %v4327_v6 = vpop.f32.mrb[15].mxu1  ;;  %v1137_v25 = vadd.f32 %v1136_v60, %v6685_v36 }
 0x45f   :  { %v5893_v39 = vadd.f32 %v6676_v9, %v1067_v43 }
 0x460   :  { %v3804_v7 = vmul.f32 -1.442695, %v5891_v62 }
 0x461   :  { %v3805_v44 = vmul.f32 -1.442695, %v5893_v39 }
 0x462   :  { %6017 = vpow2.f32 %v3804_v7 }
 0x463   :  { %6019 = vpow2.f32 %v3805_v44 }
 0x46c   :  { %v6018_v54 = vpop.eup %6017 }
 0x46d   :  { %v1144_v17 = vadd.f32 1.0, %v6018_v54  ;;  %v6020_v18 = vpop.eup %6019 }
 0x46e   :  { %v1151_v24 = vadd.f32 1.0, %v6020_v18 }
 0x46f   :  { %6021 = vrcp.f32 %v1144_v17 }
 0x470   :  { %6023 = vrcp.f32 %v1151_v24 }
 0x479   :  { %v6022_v27 = vpop.eup %6021 }
 0x47a   :  { %v1154_v28 = vmul.f32 %v6022_v27, %v1137_v25  ;;  %v6024_v32 = vpop.eup %6023 }
 0x47b   :  { %v1157_v35 = vsub.f32 1.0, %v6024_v32  ;;  %v1159_v46 = vmul.f32 %v6024_v32, %v6776_v59 }
 0x47c   :  { %v1155_v30 = vadd.f32 %v1154_v28, %v6655_v47 }
 0x47e   :  { %6025 = vtanh.f32 %v1155_v30 }
 0x488   :  { %v6026_v38 = vpop.eup %6025 }
 0x489   :  { %v1158_v41 = vmul.f32 %v6026_v38, %v1157_v35 }
 0x48b   :  { %v6820_v49 = vadd.f32 %v1159_v46, %v1158_v41 }
 0x48d   :  { %1236 = vmatmul.mubr.f32.vlgmr.msra.gmra.mrb[8].mxu0 %v6820_v49  ;;  %4361 = vmatmul.mubr.f32.vlgmr.msra.gmra.mrb[16].mxu1 %v6820_v49 }
 0x48e   :  { %5153 = vmatpush1.bf16.msra.mxu0 %v6478_v15  ;;  %5184 = vmatpush3.bf16.msra.mxu1 %v6512_v40 }
 0x48f   :  { %5155 = vmatprep.subr.bf16.mxu0 %v6481_v16  ;;  %5185 = vmatprep.subr.bf16.mxu1 %v6297_v48 }
 0x490   :  { %1407 = vmatprep.mubr.f32.mxu0 %v6296_v0  ;;  %4395 = vmatprep.mubr.msk.f32.mxu1 %vm6298_vm1, %v6296_v0 }
 0x492   :  { %5157 = vmatpush1.bf16.msra.mxu0 %v6489_v22  ;;  %5187 = vmatpush3.bf16.msra.mxu1 %v6528_v51 }
 0x493   :  { %5159 = vmatprep.subr.bf16.mxu0 %v6492_v23  ;;  %5188 = vmatprep.subr.bf16.mxu1 %v6297_v48 }
 0x496   :  { %5161 = vmatpush1.bf16.msra.mxu0 %v6506_v31  ;;  %5190 = vmatpush3.bf16.msra.mxu1 %v6544_v61 }
 0x497   :  { %5163 = vmatprep.subr.bf16.mxu0 %v6509_v33  ;;  %5191 = vmatprep.subr.bf16.mxu1 %v6297_v48 }
 0x49a   :  { %5165 = vmatpush1.bf16.msra.mxu0 %v6519_v42  ;;  %5193 = vmatpush3.bf16.msra.mxu1 %v6560_v8 }
 0x49b   :  { %5167 = vmatprep.subr.bf16.mxu0 %v6522_v45  ;;  %5194 = vmatprep.subr.bf16.mxu1 %v6297_v48 }
 0x49e   :  { %5169 = vmatpush1.bf16.msra.mxu0 %v6535_v53  ;;  %5196 = vmatpush3.bf16.msra.mxu1 %v6576_v19 }
 0x49f   :  { %5171 = vmatprep.subr.bf16.mxu0 %v6538_v56  ;;  %5197 = vmatprep.subr.bf16.mxu1 %v6297_v48 }
 0x4a2   :  { %5173 = vmatpush1.bf16.msra.mxu0 %v6551_v63  ;;  %5199 = vmatpush3.bf16.msra.mxu1 %v6590_v26 }
 0x4a3   :  { %5175 = vmatprep.subr.bf16.mxu0 %v6554_v3  ;;  %5200 = vmatprep.subr.bf16.mxu1 %v6297_v48 }
 0x4a6   :  { %5177 = vmatpush1.bf16.msra.mxu0 %v6567_v10  ;;  %5202 = vmatpush3.bf16.msra.mxu1 %v6600_v29 }
 0x4a7   :  { %5179 = vmatprep.subr.bf16.mxu0 %v6570_v14  ;;  %5203 = vmatprep.subr.bf16.mxu1 %v6297_v48 }
 0x4aa   :  { %5181 = vmatpush1.bf16.msra.mxu0 %v6583_v21  ;;  %5205 = vmatpush3.bf16.msra.mxu1 %v6609_v34 }
 0x4ab   :  { %5207 = vmatprep.subr.bf16.mxu0 %v6476_v12  ;;  %5238 = vmatprep.subr.bf16.mxu1 %v6297_v48 }
 0x560   :  { %v1237_v47 = vpop.f32.mrb[8].mxu0  ;;  %v1308_v57 = vpop.f32.mrb[16].mxu1 }
 0x561   :  { %v5895_v58 = vadd.f32 %v6672_v4, %v1237_v47  ;;  %v1239_v52 = vpop.f32.mrb[9].mxu0  ;;  %v4362_v60 = vpop.f32.mrb[17].mxu1  ;;  %v1309_v17 = vadd.f32 %v1308_v57, %v6685_v36 }
 0x562   :  { %v5897_v43 = vadd.f32 %v6676_v9, %v1239_v52 }
 0x563   :  { %v3806_v62 = vmul.f32 -1.442695, %v5895_v58 }
 0x564   :  { %v3807_v6 = vmul.f32 -1.442695, %v5897_v43 }
 0x565   :  { %6027 = vpow2.f32 %v3806_v62 }
 0x566   :  { %6029 = vpow2.f32 %v3807_v6 }
 0x56f   :  { %v6028_v7 = vpop.eup %6027 }
 0x570   :  { %v1316_v39 = vadd.f32 1.0, %v6028_v7  ;;  %v6030_v44 = vpop.eup %6029 }
 0x571   :  { %v1323_v54 = vadd.f32 1.0, %v6030_v44 }
 0x572   :  { %6031 = vrcp.f32 %v1316_v39 }
 0x573   :  { %6033 = vrcp.f32 %v1323_v54 }
 0x57c   :  { %v6032_v18 = vpop.eup %6031 }
 0x57d   :  { %v1326_v24 = vmul.f32 %v6032_v18, %v1309_v17  ;;  %v6034_v27 = vpop.eup %6033 }
 0x57e   :  { %v1329_v28 = vsub.f32 1.0, %v6034_v27  ;;  %v1331_v35 = vmul.f32 %v6034_v27, %v6820_v49 }
 0x57f   :  { %v1327_v25 = vadd.f32 %v1326_v24, %v6674_v5 }
 0x581   :  { %6035 = vtanh.f32 %v1327_v25 }
 0x58b   :  { %v6036_v30 = vpop.eup %6035 }
 0x58c   :  { %v1330_v32 = vmul.f32 %v6036_v30, %v1329_v28  ;;  %v1852_v30 = vld [vmem:[#allocation8] sm:$0xff] }
 0x58e   :  { %v6864_v38 = vadd.f32 %v1331_v35, %v1330_v32  ;;  %v1855_v32 = vld [vmem:[#allocation8 + $0x18] sm:$0xff] }
 0x590   :  { %1408 = vmatmul.mubr.f32.vlgmr.msra.gmra.mrb[10].mxu0 %v6864_v38  ;;  %4396 = vmatmul.mubr.f32.vlgmr.msra.gmra.mrb[18].mxu1 %v6864_v38 }
 0x591   :  { %5209 = vmatpush1.bf16.msra.mxu0 %v6478_v15  ;;  %5240 = vmatpush3.bf16.msra.mxu1 %v6512_v40 }
 0x592   :  { %5211 = vmatprep.subr.bf16.mxu0 %v6481_v16  ;;  %5241 = vmatprep.subr.bf16.mxu1 %v6297_v48 }
 0x593   :  { %1579 = vmatprep.mubr.f32.mxu0 %v6296_v0  ;;  %4430 = vmatprep.mubr.msk.f32.mxu1 %vm6298_vm1, %v6296_v0 }
 0x595   :  { %5213 = vmatpush1.bf16.msra.mxu0 %v6489_v22  ;;  %5243 = vmatpush3.bf16.msra.mxu1 %v6528_v51 }
 0x596   :  { %5215 = vmatprep.subr.bf16.mxu0 %v6492_v23  ;;  %5244 = vmatprep.subr.bf16.mxu1 %v6297_v48 }
 0x599   :  { %5217 = vmatpush1.bf16.msra.mxu0 %v6506_v31  ;;  %5246 = vmatpush3.bf16.msra.mxu1 %v6544_v61 }
 0x59a   :  { %5219 = vmatprep.subr.bf16.mxu0 %v6509_v33  ;;  %5247 = vmatprep.subr.bf16.mxu1 %v6297_v48 }
 0x59d   :  { %5221 = vmatpush1.bf16.msra.mxu0 %v6519_v42  ;;  %5249 = vmatpush3.bf16.msra.mxu1 %v6560_v8 }
 0x59e   :  { %5223 = vmatprep.subr.bf16.mxu0 %v6522_v45  ;;  %5250 = vmatprep.subr.bf16.mxu1 %v6297_v48 }
 0x5a1   :  { %5225 = vmatpush1.bf16.msra.mxu0 %v6535_v53  ;;  %5252 = vmatpush3.bf16.msra.mxu1 %v6576_v19 }
 0x5a2   :  { %5227 = vmatprep.subr.bf16.mxu0 %v6538_v56  ;;  %5253 = vmatprep.subr.bf16.mxu1 %v6297_v48 }
 0x5a5   :  { %5229 = vmatpush1.bf16.msra.mxu0 %v6551_v63  ;;  %5255 = vmatpush3.bf16.msra.mxu1 %v6590_v26 }
 0x5a6   :  { %5231 = vmatprep.subr.bf16.mxu0 %v6554_v3  ;;  %5256 = vmatprep.subr.bf16.mxu1 %v6297_v48 }
 0x5a9   :  { %5233 = vmatpush1.bf16.msra.mxu0 %v6567_v10  ;;  %5258 = vmatpush3.bf16.msra.mxu1 %v6600_v29 }
 0x5aa   :  { %5235 = vmatprep.subr.bf16.mxu0 %v6570_v14  ;;  %5259 = vmatprep.subr.bf16.mxu1 %v6297_v48 }
 0x5ad   :  { %5237 = vmatpush1.bf16.msra.mxu0 %v6583_v21  ;;  %5261 = vmatpush3.bf16.msra.mxu1 %v6609_v34 }
 0x5ae   :  { %5263 = vmatprep.subr.bf16.mxu0 %v6476_v12  ;;  %5294 = vmatprep.subr.bf16.mxu1 %v6297_v48 }
 0x663   :  { %v1409_v5 = vpop.f32.mrb[10].mxu0  ;;  %v1480_v41 = vpop.f32.mrb[18].mxu1 }
 0x664   :  { %v5899_v46 = vadd.f32 %v6672_v4, %v1409_v5  ;;  %v1411_v47 = vpop.f32.mrb[11].mxu0  ;;  %v4397_v57 = vpop.f32.mrb[19].mxu1  ;;  %v1481_v12 = vadd.f32 %v1480_v41, %v6685_v36  ;;  %v1859_v5 = vld [vmem:[#allocation8 + $0x38] sm:$0xff]  ;;  %v1862_v41 = vld [vmem:[#allocation8 + $0x50] sm:$0xff] }
 0x665   :  { %v5901_v52 = vadd.f32 %v6676_v9, %v1411_v47  ;;  %v1860_v57 = vld [vmem:[#allocation8 + $0x40] sm:$0xff] }
 0x666   :  { %v3808_v58 = vmul.f32 -1.442695, %v5899_v46 }
 0x667   :  { %v3809_v60 = vmul.f32 -1.442695, %v5901_v52  ;;  %v5320_v52 = vpack.c.bf16 %v1855_v32, %v1852_v30  ;;  %v1882_v30 = vld [vmem:[#allocation8 + $0xf0] sm:$0xff]  ;;  %v1885_v32 = vld [vmem:[#allocation8 + $0x108] sm:$0xff] }
 0x668   :  { %6037 = vpow2.f32 %v3808_v58  ;;  %v1863_v58 = vld [vmem:[#allocation8 + $0x58] sm:$0xff] }
 0x669   :  { %6039 = vpow2.f32 %v3809_v60 }
 0x672   :  { %v6038_v62 = vpop.eup %6037 }
 0x673   :  { %v1488_v43 = vadd.f32 1.0, %v6038_v62  ;;  %v6040_v6 = vpop.eup %6039  ;;  %v5322_v62 = vpack.c.bf16 %v1862_v41, %v1859_v5  ;;  %v1892_v5 = vld [vmem:[#allocation8 + $0x140] sm:$0xff]  ;;  %v1890_v41 = vld [vmem:[#allocation8 + $0x130] sm:$0xff] }
 0x674   :  { %v1495_v7 = vadd.f32 1.0, %v6040_v6  ;;  %v1861_v6 = vld [vmem:[#allocation8 + $0x48] sm:$0xff] }
 0x675   :  { %6041 = vrcp.f32 %v1488_v43  ;;  %v1858_v43 = vld [vmem:[#allocation8 + $0x30] sm:$0xff] }
 0x676   :  { %6043 = vrcp.f32 %v1495_v7  ;;  %v5354_v7 = vpack.c.bf16 %v1863_v58, %v1860_v57 }
 0x67f   :  { %v6042_v39 = vpop.eup %6041 }
 0x680   :  { %v1498_v44 = vmul.f32 %v6042_v39, %v1481_v12  ;;  %v6044_v17 = vpop.eup %6043  ;;  %v1868_v12 = vld [vmem:[#allocation8 + $0x80] sm:$0xff]  ;;  %v1866_v39 = vld [vmem:[#allocation8 + $0x70] sm:$0xff] }
 0x681   :  { %v1501_v18 = vsub.f32 1.0, %v6044_v17  ;;  %v1503_v27 = vmul.f32 %v6044_v17, %v6864_v38 }
 0x682   :  { %v1499_v54 = vadd.f32 %v1498_v44, %v6670_v1  ;;  %v1869_v44 = vld [vmem:[#allocation8 + $0x88] sm:$0xff] }
 0x684   :  { %6045 = vtanh.f32 %v1499_v54  ;;  %v5324_v54 = vpack.c.bf16 %v1861_v6, %v1858_v43  ;;  %v1895_v43 = vld [vmem:[#allocation8 + $0x158] sm:$0xff]  ;;  %v1898_v6 = vld [vmem:[#allocation8 + $0x170] sm:$0xff] }
 0x68e   :  { %v6046_v24 = vpop.eup %6045 }
 0x68f   :  { %v1502_v25 = vmul.f32 %v6046_v24, %v1501_v18  ;;  %v5358_v18 = vpack.c.bf16 %v1869_v44, %v1866_v39  ;;  %v1864_v24 = vld [vmem:[#allocation8 + $0x60] sm:$0xff]  ;;  %v5346_v39 = vpack.c.bf16 %v1898_v6, %v1895_v43  ;;  %v1943_v6 = vld [vmem:[#allocation10 + $0x158] sm:$0xff] }
 0x691   :  { %v6908_v28 = vadd.f32 %v1503_v27, %v1502_v25  ;;  %v1867_v25 = vld [vmem:[#allocation8 + $0x78] sm:$0xff] }
 0x692   :  { %v1871_v27 = vld [vmem:[#allocation8 + $0x98] sm:$0xff] }
 0x693   :  { %1580 = vmatmul.mubr.f32.vlgmr.msra.gmra.mrb[12].mxu0 %v6908_v28  ;;  %4431 = vmatmul.mubr.f32.vlgmr.msra.gmra.mrb[20].mxu1 %v6908_v28 }
 0x694   :  { %5265 = vmatpush1.bf16.msra.mxu0 %v6478_v15  ;;  %5296 = vmatpush3.bf16.msra.mxu1 %v6512_v40  ;;  %v1853_v15 = vld [vmem:[#allocation8 + $0x8] sm:$0xff] }
 0x695   :  { %5267 = vmatprep.subr.bf16.mxu0 %v6481_v16  ;;  %5297 = vmatprep.subr.bf16.mxu1 %v6297_v48  ;;  %v1856_v16 = vld [vmem:[#allocation8 + $0x20] sm:$0xff] }
 0x696   :  { %1751 = vmatprep.mubr.f32.mxu0 %v6296_v0  ;;  %4465 = vmatprep.mubr.msk.f32.mxu1 %vm6298_vm1, %v6296_v0 }
 0x698   :  { %5269 = vmatpush1.bf16.msra.mxu0 %v6489_v22  ;;  %5299 = vmatpush3.bf16.msra.mxu1 %v6528_v51  ;;  %v1854_v22 = vld [vmem:[#allocation8 + $0x10] sm:$0xff] }
 0x699   :  { %5271 = vmatprep.subr.bf16.mxu0 %v6492_v23  ;;  %5300 = vmatprep.subr.bf16.mxu1 %v6297_v48  ;;  %v5318_v23 = vpack.c.bf16 %v1856_v16, %v1853_v15  ;;  %v1874_v15 = vld [vmem:[#allocation8 + $0xb0] sm:$0xff]  ;;  %v1872_v16 = vld [vmem:[#allocation8 + $0xa0] sm:$0xff] }
 0x69c   :  { %5273 = vmatpush1.bf16.msra.mxu0 %v6506_v31  ;;  %5302 = vmatpush3.bf16.msra.mxu1 %v6544_v61  ;;  %v1857_v31 = vld [vmem:[#allocation8 + $0x28] sm:$0xff] }
 0x69d   :  { %5275 = vmatprep.subr.bf16.mxu0 %v6509_v33  ;;  %5303 = vmatprep.subr.bf16.mxu1 %v6297_v48  ;;  %v5350_v33 = vpack.c.bf16 %v1857_v31, %v1854_v22  ;;  %v1875_v22 = vld [vmem:[#allocation8 + $0xb8] sm:$0xff]  ;;  %v5330_v31 = vpack.c.bf16 %v1874_v15, %v1871_v27  ;;  %v1906_v15 = vld [vmem:[#allocation10 + $0x30] sm:$0xff] }
 0x6a0   :  { %5277 = vmatpush1.bf16.msra.mxu0 %v6519_v42  ;;  %5305 = vmatpush3.bf16.msra.mxu1 %v6560_v8 }
 0x6a1   :  { %5279 = vmatprep.subr.bf16.mxu0 %v6522_v45  ;;  %5306 = vmatprep.subr.bf16.mxu1 %v6297_v48 }
 0x6a4   :  { %5281 = vmatpush1.bf16.msra.mxu0 %v6535_v53  ;;  %5308 = vmatpush3.bf16.msra.mxu1 %v6576_v19 }
 0x6a5   :  { %5283 = vmatprep.subr.bf16.mxu0 %v6538_v56  ;;  %5309 = vmatprep.subr.bf16.mxu1 %v6297_v48 }
 0x6a8   :  { %5285 = vmatpush1.bf16.msra.mxu0 %v6551_v63  ;;  %5311 = vmatpush3.bf16.msra.mxu1 %v6590_v26 }
 0x6a9   :  { %5287 = vmatprep.subr.bf16.mxu0 %v6554_v3  ;;  %5312 = vmatprep.subr.bf16.mxu1 %v6297_v48 }
 0x6ac   :  { %5289 = vmatpush1.bf16.msra.mxu0 %v6567_v10  ;;  %5314 = vmatpush3.bf16.msra.mxu1 %v6600_v29 }
 0x6ad   :  { %5291 = vmatprep.subr.bf16.mxu0 %v6570_v14  ;;  %5315 = vmatprep.subr.bf16.mxu1 %v6297_v48 }
 0x6b0   :  { %5293 = vmatpush1.bf16.msra.mxu0 %v6583_v21  ;;  %5317 = vmatpush3.bf16.msra.mxu1 %v6609_v34 }
 0x6b1   :  { %5319 = vmatprep.subr.bf16.mxu0 %v5318_v23  ;;  %5351 = vmatprep.subr.bf16.mxu1 %v5350_v33  ;;  %v5328_v23 = vpack.c.bf16 %v1867_v25, %v1864_v24  ;;  %v1900_v24 = vld [vmem:[#allocation10] sm:$0xff] }
 0x766   :  { %v1581_v40 = vpop.f32.mrb[12].mxu0  ;;  %v1652_v42 = vpop.f32.mrb[20].mxu1 }
 0x767   :  { %v5903_v45 = vadd.f32 %v6672_v4, %v1581_v40  ;;  %v1583_v51 = vpop.f32.mrb[13].mxu0  ;;  %v4432_v53 = vpop.f32.mrb[21].mxu1  ;;  %v1653_v19 = vadd.f32 %v1652_v42, %v6685_v36  ;;  %v1870_v40 = vld [vmem:[#allocation8 + $0x90] sm:$0xff]  ;;  %v1873_v42 = vld [vmem:[#allocation8 + $0xa8] sm:$0xff] }
 0x768   :  { %v5905_v61 = vadd.f32 %v6676_v9, %v1583_v51  ;;  %v1880_v51 = vld [vmem:[#allocation8 + $0xe0] sm:$0xff]  ;;  %v1878_v53 = vld [vmem:[#allocation8 + $0xd0] sm:$0xff] }
 0x769   :  { %v3810_v56 = vmul.f32 -1.442695, %v5903_v45  ;;  %v1877_v45 = vld [vmem:[#allocation8 + $0xc8] sm:$0xff] }
 0x76a   :  { %v3811_v63 = vmul.f32 -1.442695, %v5905_v61  ;;  %v5332_v61 = vpack.c.bf16 %v1873_v42, %v1870_v40  ;;  %v1912_v40 = vld [vmem:[#allocation10 + $0x60] sm:$0xff]  ;;  %v1915_v42 = vld [vmem:[#allocation10 + $0x78] sm:$0xff] }
 0x76b   :  { %6047 = vpow2.f32 %v3810_v56  ;;  %v1881_v56 = vld [vmem:[#allocation8 + $0xe8] sm:$0xff] }
 0x76c   :  { %6049 = vpow2.f32 %v3811_v63  ;;  %v5334_v63 = vpack.c.bf16 %v1880_v51, %v1877_v45  ;;  %v6991_v45 = vpack.c.bf16 %v1915_v42, %v1912_v40  ;;  %v1919_v51 = vld [vmem:[#allocation10 + $0x98] sm:$0xff] }
 0x76d   :  { %v1935_v40 = vld [vmem:[#allocation10 + $0x118] sm:$0xff] }
 0x775   :  { %v6048_v3 = vpop.eup %6047 }
 0x776   :  { %v1660_v8 = vadd.f32 1.0, %v6048_v3  ;;  %v6050_v10 = vpop.eup %6049  ;;  %v5366_v3 = vpack.c.bf16 %v1881_v56, %v1878_v53  ;;  %v1922_v53 = vld [vmem:[#allocation10 + $0xb0] sm:$0xff] }
 0x777   :  { %v1667_v14 = vadd.f32 1.0, %v6050_v10  ;;  %v1879_v10 = vld [vmem:[#allocation8 + $0xd8] sm:$0xff]  ;;  %v6995_v56 = vpack.c.bf16 %v1922_v53, %v1919_v51  ;;  %v1938_v51 = vld [vmem:[#allocation10 + $0x130] sm:$0xff]  ;;  %v1941_v53 = vld [vmem:[#allocation10 + $0x148] sm:$0xff] }
 0x778   :  { %6051 = vrcp.f32 %v1660_v8  ;;  %v1876_v8 = vld [vmem:[#allocation8 + $0xc0] sm:$0xff] }
 0x779   :  { %6053 = vrcp.f32 %v1667_v14  ;;  %v1883_v14 = vld [vmem:[#allocation8 + $0xf8] sm:$0xff] }
 0x782   :  { %v6052_v21 = vpop.eup %6051 }
 0x783   :  { %v1670_v26 = vmul.f32 %v6052_v21, %v1653_v19  ;;  %v6054_v34 = vpop.eup %6053  ;;  %v1886_v19 = vld [vmem:[#allocation8 + $0x110] sm:$0xff]  ;;  %v1884_v21 = vld [vmem:[#allocation8 + $0x100] sm:$0xff] }
 0x784   :  { %v1673_v1 = vsub.f32 1.0, %v6054_v34  ;;  %v1675_v47 = vmul.f32 %v6054_v34, %v6908_v28  ;;  %v5338_v34 = vpack.c.bf16 %v1886_v19, %v1883_v14  ;;  %v1924_v19 = vld [vmem:[#allocation10 + $0xc0] sm:$0xff] }
 0x785   :  { %v1671_v29 = vadd.f32 %v1670_v26, %v6681_v20  ;;  %v1865_v20 = vld [vmem:[#allocation8 + $0x68] sm:$0xff]  ;;  %v1887_v26 = vld [vmem:[#allocation8 + $0x118] sm:$0xff] }
 0x786   :  { %v5326_v17 = vpack.c.bf16 %v1868_v12, %v1865_v20  ;;  %v1896_v20 = vld [vmem:[#allocation8 + $0x160] sm:$0xff] }
 0x787   :  { %6055 = vtanh.f32 %v1671_v29  ;;  %v5336_v29 = vpack.c.bf16 %v1879_v10, %v1876_v8  ;;  %v1925_v8 = vld [vmem:[#allocation10 + $0xc8] sm:$0xff]  ;;  %v1928_v10 = vld [vmem:[#allocation10 + $0xe0] sm:$0xff] }
 0x788   :  { %v7001_v14 = vpack.c.bf16 %v1928_v10, %v1925_v8  ;;  %v1947_v8 = vld [vmem:[#allocation10 + $0x178] sm:$0xff] }
 0x791   :  { %v6056_v35 = vpop.eup %6055 }
 0x792   :  { %v1674_v46 = vmul.f32 %v6056_v35, %v1673_v1  ;;  %v5370_v1 = vpack.c.bf16 %v1887_v26, %v1884_v21  ;;  %v1889_v35 = vld [vmem:[#allocation8 + $0x128] sm:$0xff]  ;;  %v1927_v21 = vld [vmem:[#allocation10 + $0xd8] sm:$0xff] }
 0x793   :  { %v5342_v57 = vpack.c.bf16 %v1892_v5, %v1889_v35  ;;  %v7003_v26 = vpack.c.bf16 %v1927_v21, %v1924_v19  ;;  %v1937_v5 = vld [vmem:[#allocation10 + $0x128] sm:$0xff] }
 0x794   :  { %v6950_v60 = vadd.f32 %v1675_v47, %v1674_v46  ;;  %v1893_v46 = vld [vmem:[#allocation8 + $0x148] sm:$0xff]  ;;  %v5340_v47 = vpack.c.bf16 %v1885_v32, %v1882_v30  ;;  %v1930_v30 = vld [vmem:[#allocation10 + $0xf0] sm:$0xff] }
 0x795   :  { %v5374_v58 = vpack.c.bf16 %v1893_v46, %v1890_v41  ;;  %v1933_v32 = vld [vmem:[#allocation10 + $0x108] sm:$0xff]  ;;  %v1940_v41 = vld [vmem:[#allocation10 + $0x140] sm:$0xff] }
 0x796   :  { %1752 = vmatmul.mubr.f32.vlgmr.msra.gmra.mrb[14].mxu0 %v6950_v60  ;;  %4466 = vmatmul.mubr.f32.vlgmr.msra.gmra.mrb[22].mxu1 %v6950_v60  ;;  %v7009_v35 = vpack.c.bf16 %v1933_v32, %v1930_v30  ;;  %v1936_v46 = vld [vmem:[#allocation10 + $0x120] sm:$0xff] }
 0x797   :  { %5321 = vmatpush1.bf16.msra.mxu0 %v5320_v52  ;;  %5353 = vmatpush3.bf16.msra.mxu1 %v5350_v33  ;;  %v5362_v33 = vpack.c.bf16 %v1875_v22, %v1872_v16  ;;  %v1888_v52 = vld [vmem:[#allocation8 + $0x120] sm:$0xff]  ;;  %v1909_v16 = vld [vmem:[#allocation10 + $0x48] sm:$0xff] }
 0x798   :  { %4500 = vmatprep.mubr.f32.mxu1 %v6688_v13  ;;  %5323 = vmatprep.subr.bf16.mxu0 %v5322_v62  ;;  %v1891_v62 = vld [vmem:[#allocation8 + $0x138] sm:$0xff]  ;;  %v6985_v22 = vpack.c.bf16 %v1909_v16, %v1906_v15  ;;  %v1926_v15 = vld [vmem:[#allocation10 + $0xd0] sm:$0xff]  ;;  %v1929_v16 = vld [vmem:[#allocation10 + $0xe8] sm:$0xff] }
 0x799   :  { %5355 = vmatprep.subr.bf16.mxu1 %v5354_v7  ;;  %2038 = vmatprep.mubr.f32.mxu0 %v6296_v0  ;;  %v5344_v12 = vpack.c.bf16 %v1891_v62, %v1888_v52  ;;  %v1905_v52 = vld [vmem:[#allocation10 + $0x28] sm:$0xff] }
 0x79b   :  { %5325 = vmatpush1.bf16.msra.mxu0 %v5324_v54  ;;  %5357 = vmatpush3.bf16.msra.mxu1 %v5354_v7  ;;  %v1899_v7 = vld [vmem:[#allocation8 + $0x178] sm:$0xff]  ;;  %v1894_v54 = vld [vmem:[#allocation8 + $0x150] sm:$0xff] }
 0x79c   :  { %5327 = vmatprep.subr.bf16.mxu0 %v5326_v17  ;;  %5359 = vmatprep.subr.bf16.mxu1 %v5358_v18  ;;  %v5378_v44 = vpack.c.bf16 %v1899_v7, %v1896_v20  ;;  %v1897_v17 = vld [vmem:[#allocation8 + $0x168] sm:$0xff]  ;;  %v1946_v20 = vld [vmem:[#allocation10 + $0x170] sm:$0xff] }
 0x79d   :  { %v7022_v7 = vpack.c.bf16 %v1946_v20, %v1943_v6 }
 0x79f   :  { %5329 = vmatpush1.bf16.msra.mxu0 %v5328_v23  ;;  %5361 = vmatpush3.bf16.msra.mxu1 %v5358_v18  ;;  %v5348_v18 = vpack.c.bf16 %v1897_v17, %v1894_v54  ;;  %v1913_v23 = vld [vmem:[#allocation10 + $0x68] sm:$0xff]  ;;  %v1908_v54 = vld [vmem:[#allocation10 + $0x40] sm:$0xff]  ;;  %v1911_v17 = vld [vmem:[#allocation10 + $0x58] sm:$0xff] }
 0x7a0   :  { %5331 = vmatprep.subr.bf16.mxu0 %v5330_v31  ;;  %5363 = vmatprep.subr.bf16.mxu1 %v5362_v33  ;;  %v1916_v31 = vld [vmem:[#allocation10 + $0x80] sm:$0xff] }
 0x7a3   :  { %5333 = vmatpush1.bf16.msra.mxu0 %v5332_v61  ;;  %5365 = vmatpush3.bf16.msra.mxu1 %v5362_v33  ;;  %v6989_v33 = vpack.c.bf16 %v1916_v31, %v1913_v23  ;;  %v1918_v61 = vld [vmem:[#allocation10 + $0x90] sm:$0xff]  ;;  %v7041_v23 = vpack.c.bf16 %v1929_v16, %v1926_v15  ;;  %v1932_v31 = vld [vmem:[#allocation10 + $0x100] sm:$0xff] }
 0x7a4   :  { %5335 = vmatprep.subr.bf16.mxu0 %v5334_v63  ;;  %5367 = vmatprep.subr.bf16.mxu1 %v5366_v3  ;;  %v1921_v63 = vld [vmem:[#allocation10 + $0xa8] sm:$0xff]  ;;  %v7045_v42 = vpack.c.bf16 %v1935_v40, %v1932_v31  ;;  %v1948_v31 = vld [vmem:[%s7467_s7] sm:$0x7] }
 0x7a5   :  { %v1962_v40 = vrot.slane %v1948_v31, %v6657_v50 }
 0x7a7   :  { %5337 = vmatpush1.bf16.msra.mxu0 %v5336_v29  ;;  %5369 = vmatpush3.bf16.msra.mxu1 %v5366_v3  ;;  %v6997_v3 = vpack.c.bf16 %v1921_v63, %v1918_v61  ;;  %v1931_v29 = vld [vmem:[#allocation10 + $0xf8] sm:$0xff]  ;;  %v7049_v61 = vpack.c.bf16 %v1941_v53, %v1938_v51  ;;  %v1944_v63 = vld [vmem:[#allocation10 + $0x160] sm:$0xff] }
 0x7a8   :  { %5339 = vmatprep.subr.bf16.mxu0 %v5338_v34  ;;  %5371 = vmatprep.subr.bf16.mxu1 %v5370_v1  ;;  %v1934_v34 = vld [vmem:[#allocation10 + $0x110] sm:$0xff]  ;;  %v7053_v10 = vpack.c.bf16 %v1947_v8, %v1944_v63  ;;  %v1966_v63 = vrot.slane %v1948_v31, %v6664_v55 }
 0x7ab   :  { %5341 = vmatpush1.bf16.msra.mxu0 %v5340_v47  ;;  %5373 = vmatpush3.bf16.msra.mxu1 %v5370_v1  ;;  %v7007_v1 = vpack.c.bf16 %v1934_v34, %v1931_v29  ;;  %v7013_v47 = vpack.c.bf16 %v1940_v41, %v1937_v5 }
 0x7ac   :  { %5343 = vmatprep.subr.bf16.mxu0 %v5342_v57  ;;  %5375 = vmatprep.subr.bf16.mxu1 %v5374_v58  ;;  %v1939_v57 = vld [vmem:[#allocation10 + $0x138] sm:$0xff] }
 0x7ad   :  { %v7015_v62 = vpack.c.bf16 %v1939_v57, %v1936_v46 }
 0x7af   :  { %5345 = vmatpush1.bf16.msra.mxu0 %v5344_v12  ;;  %5377 = vmatpush3.bf16.msra.mxu1 %v5374_v58  ;;  %v1902_v58 = vld [vmem:[#allocation10 + $0x10] sm:$0xff] }
 0x7b0   :  { %5347 = vmatprep.subr.bf16.mxu0 %v5346_v39  ;;  %5379 = vmatprep.subr.bf16.mxu1 %v5378_v44  ;;  %v7017_v43 = vpack.c.bf16 %v1905_v52, %v1902_v58  ;;  %v1942_v12 = vld [vmem:[#allocation10 + $0x150] sm:$0xff]  ;;  %v1945_v39 = vld [vmem:[#allocation10 + $0x168] sm:$0xff] }
 0x7b3   :  { %5349 = vmatpush1.bf16.msra.mxu0 %v5348_v18  ;;  %5381 = vmatpush3.bf16.msra.mxu1 %v5378_v44  ;;  %v7025_v44 = vpack.c.bf16 %v1945_v39, %v1942_v12  ;;  %v7028_v18 = vpack.c.bf16 %v1911_v17, %v1908_v54 }
 0x7b4   :  { %5414 = vmatprep.subr.bf16.mxu1 %v6297_v48 }
 0x7b6   :  { %2039 = vmatmul.mubr.f32.vlgmr.msra.gmra.mrb[16].mxu0 %v6688_v13  ;;  %4501 = vmatmul.mubr.f32.vlgmr.msra.gmra.mrb[24].mxu1 %v6732_v2  ;;  %v1901_v13 = vld [vmem:[#allocation10 + $0x8] sm:$0xff] }
 0x7b7   :  { %4503 = vmatprep.mubr.f32.mxu1 %v6776_v59  ;;  %2044 = vmatprep.mubr.f32.mxu0 %v6296_v0 }
 0x7b8   :  { %5416 = vmatpush3.bf16.msra.mxu1 %v7017_v43 }
 0x7b9   :  { %5417 = vmatprep.subr.bf16.mxu1 %v6297_v48 }
 0x7ba   :  { %2045 = vmatmul.mubr.f32.gmra.mrb[18].mxu0 %v6732_v2  ;;  %4504 = vmatmul.mubr.f32.gmra.mrb[26].mxu1 %v6820_v49  ;;  %v1904_v2 = vld [vmem:[#allocation10 + $0x20] sm:$0xff] }
 0x7bb   :  { %4506 = vmatprep.mubr.f32.mxu1 %v6864_v38  ;;  %2050 = vmatprep.mubr.f32.mxu0 %v6296_v0 }
 0x7bc   :  { %5419 = vmatpush3.bf16.msra.mxu1 %v7028_v18 }
 0x7bd   :  { %5420 = vmatprep.subr.bf16.mxu1 %v6297_v48 }
 0x7be   :  { %2051 = vmatmul.mubr.f32.gmra.mrb[20].mxu0 %v6776_v59  ;;  %4507 = vmatmul.mubr.f32.gmra.mrb[28].mxu1 %v6908_v28  ;;  %v6977_v59 = vpack.c.bf16 %v1904_v2, %v1901_v13  ;;  %v1914_v13 = vld [vmem:[#allocation10 + $0x70] sm:$0xff]  ;;  %v1917_v2 = vld [vmem:[#allocation10 + $0x88] sm:$0xff] }
 0x7bf   :  { %4509 = vmatprep.mubr.f32.mxu1 %v6950_v60  ;;  %2056 = vmatprep.mubr.f32.mxu0 %v6296_v0 }
 0x7c0   :  { %5383 = vmatprep.subr.bf16.mxu0 %v6977_v59 }
 0x7c2   :  { %2057 = vmatmul.mubr.f32.gmra.mrb[22].mxu0 %v6820_v49  ;;  %v1903_v49 = vld [vmem:[#allocation10 + $0x18] sm:$0xff] }
 0x7c3   :  { %2062 = vmatprep.mubr.f32.mxu0 %v6296_v0  ;;  %v6979_v25 = vpack.c.bf16 %v1903_v49, %v1900_v24  ;;  %v1920_v24 = vld [vmem:[#allocation10 + $0xa0] sm:$0xff]  ;;  %v7034_v49 = vpack.c.bf16 %v1917_v2, %v1914_v13 }
 0x7c5   :  { %5385 = vmatpush1.bf16.msra.mxu0 %v6979_v25  ;;  %5422 = vmatpush3.bf16.msra.mxu1 %v7034_v49 }
 0x7c6   :  { %2063 = vmatmul.mubr.f32.gmra.mrb[24].mxu0 %v6864_v38  ;;  %v1907_v38 = vld [vmem:[#allocation10 + $0x38] sm:$0xff]  ;;  %5423 = vmatprep.subr.bf16.mxu1 %v6297_v48 }
 0x7c7   :  { %2068 = vmatprep.mubr.f32.mxu0 %v6296_v0 }
 0x7ca   :  { %2069 = vmatmul.mubr.f32.gmra.mrb[26].mxu0 %v6908_v28  ;;  %v1910_v28 = vld [vmem:[#allocation10 + $0x50] sm:$0xff] }
 0x7cb   :  { %2074 = vmatprep.mubr.f32.mxu0 %v6296_v0  ;;  %v6983_v27 = vpack.c.bf16 %v1910_v28, %v1907_v38  ;;  %v1923_v38 = vld [vmem:[#allocation10 + $0xb8] sm:$0xff] }
 0x7cc   :  { %v7037_v28 = vpack.c.bf16 %v1923_v38, %v1920_v24 }
 0x7cd   :  { %5387 = vmatprep.subr.bf16.mxu0 %v6983_v27 }
 0x7ce   :  { %2075 = vmatmul.mubr.f32.gmra.mrb[28].mxu0 %v6950_v60  ;;  %5425 = vmatpush3.bf16.msra.mxu1 %v7037_v28 }
 0x7cf   :  { %2080 = vmatprep.mubr.f32.mxu0 %v6296_v0  ;;  %5389 = vmatpush1.bf16.msra.mxu0 %v6985_v22 }
 0x7d0   :  { %5391 = vmatprep.subr.bf16.mxu0 %v6989_v33  ;;  %5426 = vmatprep.subr.bf16.mxu1 %v6297_v48 }
 0x7d2   :  { %5428 = vmatpush3.bf16.msra.mxu1 %v7041_v23 }
 0x7d3   :  { %5393 = vmatpush1.bf16.msra.mxu0 %v6991_v45  ;;  %5429 = vmatprep.subr.bf16.mxu1 %v6297_v48 }
 0x7d4   :  { %5395 = vmatprep.subr.bf16.mxu0 %v6995_v56 }
 0x7d6   :  { %5431 = vmatpush3.bf16.msra.mxu1 %v7045_v42 }
 0x7d7   :  { %5397 = vmatpush1.bf16.msra.mxu0 %v6997_v3  ;;  %5432 = vmatprep.subr.bf16.mxu1 %v6297_v48 }
 0x7d8   :  { %5399 = vmatprep.subr.bf16.mxu0 %v7001_v14 }
 0x7da   :  { %5434 = vmatpush3.bf16.msra.mxu1 %v7049_v61 }
 0x7db   :  { %5401 = vmatpush1.bf16.msra.mxu0 %v7003_v26  ;;  %5435 = vmatprep.subr.bf16.mxu1 %v6297_v48 }
 0x7dc   :  { %5403 = vmatprep.subr.bf16.mxu0 %v7007_v1 }
 0x7de   :  { %5437 = vmatpush3.bf16.msra.mxu1 %v7053_v10 }
 0x7df   :  { %5405 = vmatpush1.bf16.msra.mxu0 %v7009_v35  ;;  %5470 = vmatprep.subr.bf16.mxu1 %v6297_v48 }
 0x7e0   :  { %5407 = vmatprep.subr.bf16.mxu0 %v7013_v47 }
 0x7e3   :  { %5409 = vmatpush1.bf16.msra.mxu0 %v7015_v62 }
 0x7e4   :  { %5411 = vmatprep.subr.bf16.mxu0 %v7022_v7 }
 0x7e7   :  { %5413 = vmatpush1.bf16.msra.mxu0 %v7025_v44 }
 0x7e8   :  { %5439 = vmatprep.subr.bf16.mxu0 %v6977_v59 }
 0x869   :  { %v1753_v19 = vpop.f32.mrb[14].mxu0  ;;  %v1824_v21 = vpop.f32.mrb[22].mxu1 }
 0x86a   :  { %v5907_v29 = vadd.f32 %v6672_v4, %v1753_v19  ;;  %v1755_v34 = vpop.f32.mrb[15].mxu0  ;;  %v4467_v30 = vpop.f32.mrb[23].mxu1  ;;  %v1825_v6 = vadd.f32 %v1824_v21, %v6685_v36 }
 0x86b   :  { %v5909_v5 = vadd.f32 %v6676_v9, %v1755_v34 }
 0x86c   :  { %v3812_v32 = vmul.f32 -1.442695, %v5907_v29 }
 0x86d   :  { %v3813_v41 = vmul.f32 -1.442695, %v5909_v5 }
 0x86e   :  { %6057 = vpow2.f32 %v3812_v32 }
 0x86f   :  { %6059 = vpow2.f32 %v3813_v41 }
 0x878   :  { %v6058_v46 = vpop.eup %6057 }
 0x879   :  { %v1832_v57 = vadd.f32 1.0, %v6058_v46  ;;  %v6060_v58 = vpop.eup %6059 }
 0x87a   :  { %v1839_v52 = vadd.f32 1.0, %v6060_v58 }
 0x87b   :  { %6061 = vrcp.f32 %v1832_v57 }
 0x87c   :  { %6063 = vrcp.f32 %v1839_v52 }
 0x885   :  { %v6062_v20 = vpop.eup %6061 }
 0x886   :  { %v1842_v12 = vmul.f32 %v6062_v20, %v1825_v6  ;;  %v6064_v13 = vpop.eup %6063  ;;  %v7139_v20 = vrot.slane %v1948_v31, %v6647_v37 }
 0x887   :  { %v1845_v36 = vsub.f32 1.0, %v6064_v13  ;;  %v1847_v16 = vmul.f32 %v6064_v13, %v6950_v60  ;;  %v1949_v60 = vld [vmem:[%s7468_s8] sm:$0x7] }
 0x888   :  { %v1843_v4 = vadd.f32 %v1842_v12, %v6678_v11  ;;  %v2221_v51 = vrot.slane %v1949_v60, %v6657_v50  ;;  %v2225_v8 = vrot.slane %v1949_v60, %v6664_v55  ;;  %v7136_v52 = vrot.slane %v1949_v60, %v6647_v37 }
 0x889   :  { %v7062_v39 = vpop.f32.mrb[24].mxu1 }
 0x88a   :  { %6065 = vtanh.f32 %v1843_v4  ;;  %v7064_v54 = vpop.f32.mrb[25].mxu1  ;;  %v7129_v21 = vadd.f32 %v2221_v51, %v1962_v40  ;;  %v7131_v34 = vadd.f32 %v2225_v8, %v1966_v63 }
 0x88d   :  { %v7066_v9 = vpop.f32.mrb[26].mxu1 }
 0x88e   :  { %v7068_v17 = vpop.f32.mrb[27].mxu1 }
 0x891   :  { %v7070_v2 = vpop.f32.mrb[28].mxu1 }
 0x892   :  { %v7072_v24 = vpop.f32.mrb[29].mxu1 }
 0x894   :  { %v6066_v38 = vpop.eup %6065 }
 0x895   :  { %v1846_v15 = vmul.f32 %v6066_v38, %v1845_v36  ;;  %v2154_v36 = vadd.f32 %v7064_v54, %v7139_v20 }
 0x897   :  { %v1848_v11 = vadd.f32 %v1847_v16, %v1846_v15 }
 0x899   :  { %2081 = vmatmul.mubr.f32.gmra.mrb[30].mxu0 %v1848_v11  ;;  %4510 = vmatmul.mubr.f32.gmra.mrb[30].mxu1 %v1848_v11 }
 0x89a   :  { %2301 = vmatprep.mubr.f32.mxu0 %v6296_v0  ;;  %4544 = vmatprep.mubr.msk.f32.mxu1 %vm6298_vm1, %v6296_v0 }
 0x89d   :  { %2302 = vmatmul.mubr.f32.vlgmr.msra.gmra.mrb[16].mxu0 %v6296_v0  ;;  %4545 = vmatmul.mubr.f32.vlgmr.msra.gmra.mrb[32].mxu1 %v6296_v0 }
 0x89e   :  { %5441 = vmatpush1.bf16.msra.mxu0 %v6979_v25  ;;  %5472 = vmatpush3.bf16.msra.mxu1 %v7017_v43 }
 0x89f   :  { %5443 = vmatprep.subr.bf16.mxu0 %v6983_v27  ;;  %5473 = vmatprep.subr.bf16.mxu1 %v6297_v48 }
 0x8a0   :  { %2468 = vmatprep.mubr.f32.mxu0 %v6296_v0  ;;  %4579 = vmatprep.mubr.msk.f32.mxu1 %vm6298_vm1, %v6296_v0 }
 0x8a2   :  { %5445 = vmatpush1.bf16.msra.mxu0 %v6985_v22  ;;  %5475 = vmatpush3.bf16.msra.mxu1 %v7028_v18 }
 0x8a3   :  { %5447 = vmatprep.subr.bf16.mxu0 %v6989_v33  ;;  %5476 = vmatprep.subr.bf16.mxu1 %v6297_v48 }
 0x8a6   :  { %5449 = vmatpush1.bf16.msra.mxu0 %v6991_v45  ;;  %5478 = vmatpush3.bf16.msra.mxu1 %v7034_v49 }
 0x8a7   :  { %5451 = vmatprep.subr.bf16.mxu0 %v6995_v56  ;;  %5479 = vmatprep.subr.bf16.mxu1 %v6297_v48 }
 0x8aa   :  { %5453 = vmatpush1.bf16.msra.mxu0 %v6997_v3  ;;  %5481 = vmatpush3.bf16.msra.mxu1 %v7037_v28 }
 0x8ab   :  { %5455 = vmatprep.subr.bf16.mxu0 %v7001_v14  ;;  %5482 = vmatprep.subr.bf16.mxu1 %v6297_v48 }
 0x8ae   :  { %5457 = vmatpush1.bf16.msra.mxu0 %v7003_v26  ;;  %5484 = vmatpush3.bf16.msra.mxu1 %v7041_v23 }
 0x8af   :  { %5459 = vmatprep.subr.bf16.mxu0 %v7007_v1  ;;  %5485 = vmatprep.subr.bf16.mxu1 %v6297_v48 }
 0x8b2   :  { %5461 = vmatpush1.bf16.msra.mxu0 %v7009_v35  ;;  %5487 = vmatpush3.bf16.msra.mxu1 %v7045_v42 }
 0x8b3   :  { %5463 = vmatprep.subr.bf16.mxu0 %v7013_v47  ;;  %5488 = vmatprep.subr.bf16.mxu1 %v6297_v48 }
 0x8b6   :  { %5465 = vmatpush1.bf16.msra.mxu0 %v7015_v62  ;;  %5490 = vmatpush3.bf16.msra.mxu1 %v7049_v61 }
 0x8b7   :  { %5467 = vmatprep.subr.bf16.mxu0 %v7022_v7  ;;  %5491 = vmatprep.subr.bf16.mxu1 %v6297_v48 }
 0x8ba   :  { %5469 = vmatpush1.bf16.msra.mxu0 %v7025_v44  ;;  %5493 = vmatpush3.bf16.msra.mxu1 %v7053_v10 }
 0x8bb   :  { %5495 = vmatprep.subr.bf16.mxu0 %v6977_v59  ;;  %5526 = vmatprep.subr.bf16.mxu1 %v6297_v48 }
 0x96c   :  { %v7123_v53 = vpop.f32.mrb[30].mxu1 }
 0x96d   :  { %v7127_v19 = vpop.f32.mrb[31].mxu1 }
 0x970   :  { %v2303_v29 = vpop.f32.mrb[16].mxu0  ;;  %v2374_v30 = vpop.f32.mrb[32].mxu1 }
 0x971   :  { %v5911_v32 = vadd.f32 %v7129_v21, %v2303_v29  ;;  %v2305_v5 = vpop.f32.mrb[17].mxu0  ;;  %v4546_v41 = vpop.f32.mrb[33].mxu1  ;;  %v2375_v4 = vadd.f32 %v2374_v30, %v7136_v52 }
 0x972   :  { %v5913_v50 = vadd.f32 %v7131_v34, %v2305_v5 }
 0x973   :  { %v3814_v46 = vmul.f32 -1.442695, %v5911_v32 }
 0x974   :  { %v3815_v57 = vmul.f32 -1.442695, %v5913_v50 }
 0x975   :  { %6067 = vpow2.f32 %v3814_v46 }
 0x976   :  { %6069 = vpow2.f32 %v3815_v57 }
 0x97f   :  { %v6068_v58 = vpop.eup %6067 }
 0x980   :  { %v2382_v55 = vadd.f32 1.0, %v6068_v58  ;;  %v6070_v6 = vpop.eup %6069 }
 0x981   :  { %v2389_v12 = vadd.f32 1.0, %v6070_v6  ;;  %v2159_v6 = vadd.f32 %v7062_v39, %v7139_v20 }
 0x982   :  { %6071 = vrcp.f32 %v2382_v55 }
 0x983   :  { %6073 = vrcp.f32 %v2389_v12 }
 0x98c   :  { %v6072_v13 = vpop.eup %6071 }
 0x98d   :  { %v2392_v38 = vmul.f32 %v6072_v13, %v2375_v4  ;;  %v6074_v16 = vpop.eup %6073 }
 0x98e   :  { %v2395_v11 = vsub.f32 1.0, %v6074_v16  ;;  %v2397_v51 = vmul.f32 0.0, %v6074_v16 }
 0x98f   :  { %v2393_v15 = vadd.f32 %v2392_v38, %v2154_v36 }
 0x991   :  { %6075 = vtanh.f32 %v2393_v15 }
 0x99b   :  { %v6076_v40 = vpop.eup %6075 }
 0x99c   :  { %v2396_v60 = vmul.f32 %v6076_v40, %v2395_v11 }
 0x99e   :  { %v7144_v63 = vadd.f32 %v2397_v51, %v2396_v60 }
 0x9a0   :  { %2469 = vmatmul.mubr.f32.vlgmr.msra.gmra.mrb[18].mxu0 %v7144_v63  ;;  %4580 = vmatmul.mubr.f32.vlgmr.msra.gmra.mrb[34].mxu1 %v7144_v63 }
 0x9a1   :  { %5497 = vmatpush1.bf16.msra.mxu0 %v6979_v25  ;;  %5528 = vmatpush3.bf16.msra.mxu1 %v7017_v43 }
 0x9a2   :  { %5499 = vmatprep.subr.bf16.mxu0 %v6983_v27  ;;  %5529 = vmatprep.subr.bf16.mxu1 %v6297_v48 }
 0x9a3   :  { %2635 = vmatprep.mubr.f32.mxu0 %v6296_v0  ;;  %4614 = vmatprep.mubr.msk.f32.mxu1 %vm6298_vm1, %v6296_v0 }
 0x9a5   :  { %5501 = vmatpush1.bf16.msra.mxu0 %v6985_v22  ;;  %5531 = vmatpush3.bf16.msra.mxu1 %v7028_v18 }
 0x9a6   :  { %5503 = vmatprep.subr.bf16.mxu0 %v6989_v33  ;;  %5532 = vmatprep.subr.bf16.mxu1 %v6297_v48 }
 0x9a9   :  { %5505 = vmatpush1.bf16.msra.mxu0 %v6991_v45  ;;  %5534 = vmatpush3.bf16.msra.mxu1 %v7034_v49 }
 0x9aa   :  { %5507 = vmatprep.subr.bf16.mxu0 %v6995_v56  ;;  %5535 = vmatprep.subr.bf16.mxu1 %v6297_v48 }
 0x9ad   :  { %5509 = vmatpush1.bf16.msra.mxu0 %v6997_v3  ;;  %5537 = vmatpush3.bf16.msra.mxu1 %v7037_v28 }
 0x9ae   :  { %5511 = vmatprep.subr.bf16.mxu0 %v7001_v14  ;;  %5538 = vmatprep.subr.bf16.mxu1 %v6297_v48 }
 0x9b1   :  { %5513 = vmatpush1.bf16.msra.mxu0 %v7003_v26  ;;  %5540 = vmatpush3.bf16.msra.mxu1 %v7041_v23 }
 0x9b2   :  { %5515 = vmatprep.subr.bf16.mxu0 %v7007_v1  ;;  %5541 = vmatprep.subr.bf16.mxu1 %v6297_v48 }
 0x9b5   :  { %5517 = vmatpush1.bf16.msra.mxu0 %v7009_v35  ;;  %5543 = vmatpush3.bf16.msra.mxu1 %v7045_v42 }
 0x9b6   :  { %5519 = vmatprep.subr.bf16.mxu0 %v7013_v47  ;;  %5544 = vmatprep.subr.bf16.mxu1 %v6297_v48 }
 0x9b9   :  { %5521 = vmatpush1.bf16.msra.mxu0 %v7015_v62  ;;  %5546 = vmatpush3.bf16.msra.mxu1 %v7049_v61 }
 0x9ba   :  { %5523 = vmatprep.subr.bf16.mxu0 %v7022_v7  ;;  %5547 = vmatprep.subr.bf16.mxu1 %v6297_v48 }
 0x9bd   :  { %5525 = vmatpush1.bf16.msra.mxu0 %v7025_v44  ;;  %5549 = vmatpush3.bf16.msra.mxu1 %v7053_v10 }
 0x9be   :  { %5551 = vmatprep.subr.bf16.mxu0 %v6977_v59  ;;  %5582 = vmatprep.subr.bf16.mxu1 %v6297_v48 }
 0xa73   :  { %v2470_v37 = vpop.f32.mrb[18].mxu0  ;;  %v2541_v54 = vpop.f32.mrb[34].mxu1 }
 0xa74   :  { %v5915_v31 = vadd.f32 %v7129_v21, %v2470_v37  ;;  %v2472_v8 = vpop.f32.mrb[19].mxu0  ;;  %v4581_v29 = vpop.f32.mrb[35].mxu1  ;;  %v2542_v58 = vadd.f32 %v2541_v54, %v7136_v52 }
 0xa75   :  { %v5917_v32 = vadd.f32 %v7131_v34, %v2472_v8 }
 0xa76   :  { %v3816_v30 = vmul.f32 -1.442695, %v5915_v31 }
 0xa77   :  { %v3817_v5 = vmul.f32 -1.442695, %v5917_v32 }
 0xa78   :  { %6077 = vpow2.f32 %v3816_v30 }
 0xa79   :  { %6079 = vpow2.f32 %v3817_v5 }
 0xa82   :  { %v6078_v41 = vpop.eup %6077 }
 0xa83   :  { %v2549_v46 = vadd.f32 1.0, %v6078_v41  ;;  %v6080_v50 = vpop.eup %6079 }
 0xa84   :  { %v2556_v57 = vadd.f32 1.0, %v6080_v50 }
 0xa85   :  { %6081 = vrcp.f32 %v2549_v46  ;;  %v2164_v46 = vadd.f32 %v7068_v17, %v7139_v20 }
 0xa86   :  { %6083 = vrcp.f32 %v2556_v57 }
 0xa8f   :  { %v6082_v55 = vpop.eup %6081 }
 0xa90   :  { %v2559_v12 = vmul.f32 %v6082_v55, %v2542_v58  ;;  %v6084_v13 = vpop.eup %6083 }
 0xa91   :  { %v2562_v36 = vsub.f32 1.0, %v6084_v13  ;;  %v2564_v16 = vmul.f32 %v6084_v13, %v7144_v63 }
 0xa92   :  { %v2560_v4 = vadd.f32 %v2559_v12, %v2159_v6 }
 0xa94   :  { %6085 = vtanh.f32 %v2560_v4 }
 0xa9e   :  { %v6086_v38 = vpop.eup %6085 }
 0xa9f   :  { %v2563_v15 = vmul.f32 %v6086_v38, %v2562_v36 }
 0xaa1   :  { %v7189_v11 = vadd.f32 %v2564_v16, %v2563_v15 }
 0xaa3   :  { %2636 = vmatmul.mubr.f32.vlgmr.msra.gmra.mrb[20].mxu0 %v7189_v11  ;;  %4615 = vmatmul.mubr.f32.vlgmr.msra.gmra.mrb[36].mxu1 %v7189_v11 }
 0xaa4   :  { %5553 = vmatpush1.bf16.msra.mxu0 %v6979_v25  ;;  %5584 = vmatpush3.bf16.msra.mxu1 %v7017_v43 }
 0xaa5   :  { %5555 = vmatprep.subr.bf16.mxu0 %v6983_v27  ;;  %5585 = vmatprep.subr.bf16.mxu1 %v6297_v48 }
 0xaa6   :  { %2802 = vmatprep.mubr.f32.mxu0 %v6296_v0  ;;  %4649 = vmatprep.mubr.msk.f32.mxu1 %vm6298_vm1, %v6296_v0 }
 0xaa8   :  { %5557 = vmatpush1.bf16.msra.mxu0 %v6985_v22  ;;  %5587 = vmatpush3.bf16.msra.mxu1 %v7028_v18 }
 0xaa9   :  { %5559 = vmatprep.subr.bf16.mxu0 %v6989_v33  ;;  %5588 = vmatprep.subr.bf16.mxu1 %v6297_v48 }
 0xaac   :  { %5561 = vmatpush1.bf16.msra.mxu0 %v6991_v45  ;;  %5590 = vmatpush3.bf16.msra.mxu1 %v7034_v49 }
 0xaad   :  { %5563 = vmatprep.subr.bf16.mxu0 %v6995_v56  ;;  %5591 = vmatprep.subr.bf16.mxu1 %v6297_v48 }
 0xab0   :  { %5565 = vmatpush1.bf16.msra.mxu0 %v6997_v3  ;;  %5593 = vmatpush3.bf16.msra.mxu1 %v7037_v28 }
 0xab1   :  { %5567 = vmatprep.subr.bf16.mxu0 %v7001_v14  ;;  %5594 = vmatprep.subr.bf16.mxu1 %v6297_v48 }
 0xab4   :  { %5569 = vmatpush1.bf16.msra.mxu0 %v7003_v26  ;;  %5596 = vmatpush3.bf16.msra.mxu1 %v7041_v23 }
 0xab5   :  { %5571 = vmatprep.subr.bf16.mxu0 %v7007_v1  ;;  %5597 = vmatprep.subr.bf16.mxu1 %v6297_v48 }
 0xab8   :  { %5573 = vmatpush1.bf16.msra.mxu0 %v7009_v35  ;;  %5599 = vmatpush3.bf16.msra.mxu1 %v7045_v42 }
 0xab9   :  { %5575 = vmatprep.subr.bf16.mxu0 %v7013_v47  ;;  %5600 = vmatprep.subr.bf16.mxu1 %v6297_v48 }
 0xabc   :  { %5577 = vmatpush1.bf16.msra.mxu0 %v7015_v62  ;;  %5602 = vmatpush3.bf16.msra.mxu1 %v7049_v61 }
 0xabd   :  { %5579 = vmatprep.subr.bf16.mxu0 %v7022_v7  ;;  %5603 = vmatprep.subr.bf16.mxu1 %v6297_v48 }
 0xac0   :  { %5581 = vmatpush1.bf16.msra.mxu0 %v7025_v44  ;;  %5605 = vmatpush3.bf16.msra.mxu1 %v7053_v10 }
 0xac1   :  { %5607 = vmatprep.subr.bf16.mxu0 %v6977_v59  ;;  %5638 = vmatprep.subr.bf16.mxu1 %v6297_v48 }
 0xb76   :  { %v2637_v39 = vpop.f32.mrb[20].mxu0  ;;  %v2708_v40 = vpop.f32.mrb[36].mxu1 }
 0xb77   :  { %v5919_v60 = vadd.f32 %v7129_v21, %v2637_v39  ;;  %v2639_v51 = vpop.f32.mrb[21].mxu0  ;;  %v4616_v63 = vpop.f32.mrb[37].mxu1  ;;  %v2709_v5 = vadd.f32 %v2708_v40, %v7136_v52 }
 0xb78   :  { %v5921_v54 = vadd.f32 %v7131_v34, %v2639_v51 }
 0xb79   :  { %v3818_v37 = vmul.f32 -1.442695, %v5919_v60 }
 0xb7a   :  { %v3819_v31 = vmul.f32 -1.442695, %v5921_v54 }
 0xb7b   :  { %6087 = vpow2.f32 %v3818_v37 }
 0xb7c   :  { %6089 = vpow2.f32 %v3819_v31 }
 0xb85   :  { %v6088_v8 = vpop.eup %6087 }
 0xb86   :  { %v2716_v29 = vadd.f32 1.0, %v6088_v8  ;;  %v6090_v30 = vpop.eup %6089  ;;  %v2169_v8 = vadd.f32 %v7066_v9, %v7139_v20 }
 0xb87   :  { %v2723_v32 = vadd.f32 1.0, %v6090_v30 }
 0xb88   :  { %6091 = vrcp.f32 %v2716_v29 }
 0xb89   :  { %6093 = vrcp.f32 %v2723_v32 }
 0xb92   :  { %v6092_v41 = vpop.eup %6091 }
 0xb93   :  { %v2726_v50 = vmul.f32 %v6092_v41, %v2709_v5  ;;  %v6094_v58 = vpop.eup %6093 }
 0xb94   :  { %v2729_v55 = vsub.f32 1.0, %v6094_v58  ;;  %v2731_v4 = vmul.f32 %v6094_v58, %v7189_v11 }
 0xb95   :  { %v2727_v57 = vadd.f32 %v2726_v50, %v2164_v46 }
 0xb97   :  { %6095 = vtanh.f32 %v2727_v57 }
 0xba1   :  { %v6096_v6 = vpop.eup %6095 }
 0xba2   :  { %v2730_v12 = vmul.f32 %v6096_v6, %v2729_v55 }
 0xba4   :  { %v7234_v13 = vadd.f32 %v2731_v4, %v2730_v12 }
 0xba6   :  { %2803 = vmatmul.mubr.f32.vlgmr.msra.gmra.mrb[22].mxu0 %v7234_v13  ;;  %4650 = vmatmul.mubr.f32.vlgmr.msra.gmra.mrb[38].mxu1 %v7234_v13 }
 0xba7   :  { %5609 = vmatpush1.bf16.msra.mxu0 %v6979_v25  ;;  %5640 = vmatpush3.bf16.msra.mxu1 %v7017_v43 }
 0xba8   :  { %5611 = vmatprep.subr.bf16.mxu0 %v6983_v27  ;;  %5641 = vmatprep.subr.bf16.mxu1 %v6297_v48 }
 0xba9   :  { %2969 = vmatprep.mubr.f32.mxu0 %v6296_v0  ;;  %4684 = vmatprep.mubr.msk.f32.mxu1 %vm6298_vm1, %v6296_v0 }
 0xbab   :  { %5613 = vmatpush1.bf16.msra.mxu0 %v6985_v22  ;;  %5643 = vmatpush3.bf16.msra.mxu1 %v7028_v18 }
 0xbac   :  { %5615 = vmatprep.subr.bf16.mxu0 %v6989_v33  ;;  %5644 = vmatprep.subr.bf16.mxu1 %v6297_v48 }
 0xbaf   :  { %5617 = vmatpush1.bf16.msra.mxu0 %v6991_v45  ;;  %5646 = vmatpush3.bf16.msra.mxu1 %v7034_v49 }
 0xbb0   :  { %5619 = vmatprep.subr.bf16.mxu0 %v6995_v56  ;;  %5647 = vmatprep.subr.bf16.mxu1 %v6297_v48 }
 0xbb3   :  { %5621 = vmatpush1.bf16.msra.mxu0 %v6997_v3  ;;  %5649 = vmatpush3.bf16.msra.mxu1 %v7037_v28 }
 0xbb4   :  { %5623 = vmatprep.subr.bf16.mxu0 %v7001_v14  ;;  %5650 = vmatprep.subr.bf16.mxu1 %v6297_v48 }
 0xbb7   :  { %5625 = vmatpush1.bf16.msra.mxu0 %v7003_v26  ;;  %5652 = vmatpush3.bf16.msra.mxu1 %v7041_v23 }
 0xbb8   :  { %5627 = vmatprep.subr.bf16.mxu0 %v7007_v1  ;;  %5653 = vmatprep.subr.bf16.mxu1 %v6297_v48 }
 0xbbb   :  { %5629 = vmatpush1.bf16.msra.mxu0 %v7009_v35  ;;  %5655 = vmatpush3.bf16.msra.mxu1 %v7045_v42 }
 0xbbc   :  { %5631 = vmatprep.subr.bf16.mxu0 %v7013_v47  ;;  %5656 = vmatprep.subr.bf16.mxu1 %v6297_v48 }
 0xbbf   :  { %5633 = vmatpush1.bf16.msra.mxu0 %v7015_v62  ;;  %5658 = vmatpush3.bf16.msra.mxu1 %v7049_v61 }
 0xbc0   :  { %5635 = vmatprep.subr.bf16.mxu0 %v7022_v7  ;;  %5659 = vmatprep.subr.bf16.mxu1 %v6297_v48 }
 0xbc3   :  { %5637 = vmatpush1.bf16.msra.mxu0 %v7025_v44  ;;  %5661 = vmatpush3.bf16.msra.mxu1 %v7053_v10 }
 0xbc4   :  { %5663 = vmatprep.subr.bf16.mxu0 %v6977_v59  ;;  %5694 = vmatprep.subr.bf16.mxu1 %v6297_v48 }
 0xc79   :  { %v2804_v17 = vpop.f32.mrb[22].mxu0  ;;  %v2875_v36 = vpop.f32.mrb[38].mxu1 }
 0xc7a   :  { %v5923_v38 = vadd.f32 %v7129_v21, %v2804_v17  ;;  %v2806_v15 = vpop.f32.mrb[23].mxu0  ;;  %v4651_v16 = vpop.f32.mrb[39].mxu1  ;;  %v2876_v54 = vadd.f32 %v2875_v36, %v7136_v52 }
 0xc7b   :  { %v5925_v39 = vadd.f32 %v7131_v34, %v2806_v15 }
 0xc7c   :  { %v3820_v11 = vmul.f32 -1.442695, %v5923_v38 }
 0xc7d   :  { %v3821_v40 = vmul.f32 -1.442695, %v5925_v39 }
 0xc7e   :  { %6097 = vpow2.f32 %v3820_v11 }
 0xc7f   :  { %6099 = vpow2.f32 %v3821_v40  ;;  %v2174_v40 = vadd.f32 %v7072_v24, %v7139_v20 }
 0xc88   :  { %v6098_v60 = vpop.eup %6097 }
 0xc89   :  { %v2883_v51 = vadd.f32 1.0, %v6098_v60  ;;  %v6100_v63 = vpop.eup %6099 }
 0xc8a   :  { %v2890_v37 = vadd.f32 1.0, %v6100_v63 }
 0xc8b   :  { %6101 = vrcp.f32 %v2883_v51 }
 0xc8c   :  { %6103 = vrcp.f32 %v2890_v37 }
 0xc95   :  { %v6102_v31 = vpop.eup %6101 }
 0xc96   :  { %v2893_v29 = vmul.f32 %v6102_v31, %v2876_v54  ;;  %v6104_v32 = vpop.eup %6103 }
 0xc97   :  { %v2896_v5 = vsub.f32 1.0, %v6104_v32  ;;  %v2898_v50 = vmul.f32 %v6104_v32, %v7234_v13 }
 0xc98   :  { %v2894_v30 = vadd.f32 %v2893_v29, %v2169_v8 }
 0xc9a   :  { %6105 = vtanh.f32 %v2894_v30 }
 0xca4   :  { %v6106_v41 = vpop.eup %6105 }
 0xca5   :  { %v2897_v46 = vmul.f32 %v6106_v41, %v2896_v5 }
 0xca7   :  { %v7279_v57 = vadd.f32 %v2898_v50, %v2897_v46 }
 0xca9   :  { %2970 = vmatmul.mubr.f32.vlgmr.msra.gmra.mrb[24].mxu0 %v7279_v57  ;;  %4685 = vmatmul.mubr.f32.vlgmr.msra.gmra.mrb[40].mxu1 %v7279_v57 }
 0xcaa   :  { %5665 = vmatpush1.bf16.msra.mxu0 %v6979_v25  ;;  %5696 = vmatpush3.bf16.msra.mxu1 %v7017_v43 }
 0xcab   :  { %5667 = vmatprep.subr.bf16.mxu0 %v6983_v27  ;;  %5697 = vmatprep.subr.bf16.mxu1 %v6297_v48 }
 0xcac   :  { %3136 = vmatprep.mubr.f32.mxu0 %v6296_v0  ;;  %4719 = vmatprep.mubr.msk.f32.mxu1 %vm6298_vm1, %v6296_v0 }
 0xcae   :  { %5669 = vmatpush1.bf16.msra.mxu0 %v6985_v22  ;;  %5699 = vmatpush3.bf16.msra.mxu1 %v7028_v18 }
 0xcaf   :  { %5671 = vmatprep.subr.bf16.mxu0 %v6989_v33  ;;  %5700 = vmatprep.subr.bf16.mxu1 %v6297_v48 }
 0xcb2   :  { %5673 = vmatpush1.bf16.msra.mxu0 %v6991_v45  ;;  %5702 = vmatpush3.bf16.msra.mxu1 %v7034_v49 }
 0xcb3   :  { %5675 = vmatprep.subr.bf16.mxu0 %v6995_v56  ;;  %5703 = vmatprep.subr.bf16.mxu1 %v6297_v48 }
 0xcb6   :  { %5677 = vmatpush1.bf16.msra.mxu0 %v6997_v3  ;;  %5705 = vmatpush3.bf16.msra.mxu1 %v7037_v28 }
 0xcb7   :  { %5679 = vmatprep.subr.bf16.mxu0 %v7001_v14  ;;  %5706 = vmatprep.subr.bf16.mxu1 %v6297_v48 }
 0xcba   :  { %5681 = vmatpush1.bf16.msra.mxu0 %v7003_v26  ;;  %5708 = vmatpush3.bf16.msra.mxu1 %v7041_v23 }
 0xcbb   :  { %5683 = vmatprep.subr.bf16.mxu0 %v7007_v1  ;;  %5709 = vmatprep.subr.bf16.mxu1 %v6297_v48 }
 0xcbe   :  { %5685 = vmatpush1.bf16.msra.mxu0 %v7009_v35  ;;  %5711 = vmatpush3.bf16.msra.mxu1 %v7045_v42 }
 0xcbf   :  { %5687 = vmatprep.subr.bf16.mxu0 %v7013_v47  ;;  %5712 = vmatprep.subr.bf16.mxu1 %v6297_v48 }
 0xcc2   :  { %5689 = vmatpush1.bf16.msra.mxu0 %v7015_v62  ;;  %5714 = vmatpush3.bf16.msra.mxu1 %v7049_v61 }
 0xcc3   :  { %5691 = vmatprep.subr.bf16.mxu0 %v7022_v7  ;;  %5715 = vmatprep.subr.bf16.mxu1 %v6297_v48 }
 0xcc6   :  { %5693 = vmatpush1.bf16.msra.mxu0 %v7025_v44  ;;  %5717 = vmatpush3.bf16.msra.mxu1 %v7053_v10 }
 0xcc7   :  { %5719 = vmatprep.subr.bf16.mxu0 %v6977_v59  ;;  %5750 = vmatprep.subr.bf16.mxu1 %v6297_v48 }
 0xd7c   :  { %v2971_v9 = vpop.f32.mrb[24].mxu0  ;;  %v3042_v58 = vpop.f32.mrb[40].mxu1 }
 0xd7d   :  { %v5927_v55 = vadd.f32 %v7129_v21, %v2971_v9  ;;  %v2973_v6 = vpop.f32.mrb[25].mxu0  ;;  %v4686_v12 = vpop.f32.mrb[41].mxu1  ;;  %v3043_v11 = vadd.f32 %v3042_v58, %v7136_v52 }
 0xd7e   :  { %v5929_v13 = vadd.f32 %v7131_v34, %v2973_v6 }
 0xd7f   :  { %v3822_v4 = vmul.f32 -1.442695, %v5927_v55 }
 0xd80   :  { %v3823_v17 = vmul.f32 -1.442695, %v5929_v13 }
 0xd81   :  { %6107 = vpow2.f32 %v3822_v4  ;;  %v2179_v4 = vadd.f32 %v7070_v2, %v7139_v20  ;;  %v3570_v2 = vld [vmem:[#allocation11] sm:$0xff] }
 0xd82   :  { %6109 = vpow2.f32 %v3823_v17 }
 0xd8b   :  { %v6108_v36 = vpop.eup %6107 }
 0xd8c   :  { %v3050_v38 = vadd.f32 1.0, %v6108_v36  ;;  %v6110_v15 = vpop.eup %6109 }
 0xd8d   :  { %v3057_v16 = vadd.f32 1.0, %v6110_v15 }
 0xd8e   :  { %6111 = vrcp.f32 %v3050_v38 }
 0xd8f   :  { %6113 = vrcp.f32 %v3057_v16 }
 0xd98   :  { %v6112_v39 = vpop.eup %6111 }
 0xd99   :  { %v3060_v60 = vmul.f32 %v6112_v39, %v3043_v11  ;;  %v6114_v63 = vpop.eup %6113 }
 0xd9a   :  { %v3063_v37 = vsub.f32 1.0, %v6114_v63  ;;  %v3065_v8 = vmul.f32 %v6114_v63, %v7279_v57 }
 0xd9b   :  { %v3061_v51 = vadd.f32 %v3060_v60, %v2174_v40  ;;  %v3572_v60 = vld [vmem:[#allocation11 + $0x10] sm:$0xff] }
 0xd9d   :  { %6115 = vtanh.f32 %v3061_v51  ;;  %v3573_v51 = vld [vmem:[#allocation11 + $0x18] sm:$0xff] }
 0xd9e   :  { %v5834_v63 = vpack.c.bf16 %v3573_v51, %v3572_v60 }
 0xda7   :  { %v6116_v54 = vpop.eup %6115 }
 0xda8   :  { %v3064_v31 = vmul.f32 %v6116_v54, %v3063_v37  ;;  %v3574_v37 = vld [vmem:[#allocation11 + $0x20] sm:$0xff]  ;;  %v3575_v54 = vld [vmem:[#allocation11 + $0x28] sm:$0xff] }
 0xdaa   :  { %v7324_v29 = vadd.f32 %v3065_v8, %v3064_v31  ;;  %v5837_v31 = vpack.c.bf16 %v3575_v54, %v3574_v37  ;;  %v3576_v8 = vld [vmem:[#allocation11 + $0x30] sm:$0xff] }
 0xdac   :  { %3137 = vmatmul.mubr.f32.vlgmr.msra.gmra.mrb[26].mxu0 %v7324_v29  ;;  %4720 = vmatmul.mubr.f32.vlgmr.msra.gmra.mrb[42].mxu1 %v7324_v29 }
 0xdad   :  { %5721 = vmatpush1.bf16.msra.mxu0 %v6979_v25  ;;  %5752 = vmatpush3.bf16.msra.mxu1 %v7017_v43 }
 0xdae   :  { %5723 = vmatprep.subr.bf16.mxu0 %v6983_v27  ;;  %5753 = vmatprep.subr.bf16.mxu1 %v6297_v48 }
 0xdaf   :  { %3303 = vmatprep.mubr.f32.mxu0 %v6296_v0  ;;  %4754 = vmatprep.mubr.msk.f32.mxu1 %vm6298_vm1, %v6296_v0 }
 0xdb1   :  { %5725 = vmatpush1.bf16.msra.mxu0 %v6985_v22  ;;  %5755 = vmatpush3.bf16.msra.mxu1 %v7028_v18 }
 0xdb2   :  { %5727 = vmatprep.subr.bf16.mxu0 %v6989_v33  ;;  %5756 = vmatprep.subr.bf16.mxu1 %v6297_v48 }
 0xdb5   :  { %5729 = vmatpush1.bf16.msra.mxu0 %v6991_v45  ;;  %5758 = vmatpush3.bf16.msra.mxu1 %v7034_v49 }
 0xdb6   :  { %5731 = vmatprep.subr.bf16.mxu0 %v6995_v56  ;;  %5759 = vmatprep.subr.bf16.mxu1 %v6297_v48 }
 0xdb9   :  { %5733 = vmatpush1.bf16.msra.mxu0 %v6997_v3  ;;  %5761 = vmatpush3.bf16.msra.mxu1 %v7037_v28 }
 0xdba   :  { %5735 = vmatprep.subr.bf16.mxu0 %v7001_v14  ;;  %5762 = vmatprep.subr.bf16.mxu1 %v6297_v48 }
 0xdbd   :  { %5737 = vmatpush1.bf16.msra.mxu0 %v7003_v26  ;;  %5764 = vmatpush3.bf16.msra.mxu1 %v7041_v23 }
 0xdbe   :  { %5739 = vmatprep.subr.bf16.mxu0 %v7007_v1  ;;  %5765 = vmatprep.subr.bf16.mxu1 %v6297_v48 }
 0xdc1   :  { %5741 = vmatpush1.bf16.msra.mxu0 %v7009_v35  ;;  %5767 = vmatpush3.bf16.msra.mxu1 %v7045_v42 }
 0xdc2   :  { %5743 = vmatprep.subr.bf16.mxu0 %v7013_v47  ;;  %5768 = vmatprep.subr.bf16.mxu1 %v6297_v48 }
 0xdc5   :  { %5745 = vmatpush1.bf16.msra.mxu0 %v7015_v62  ;;  %5770 = vmatpush3.bf16.msra.mxu1 %v7049_v61 }
 0xdc6   :  { %5747 = vmatprep.subr.bf16.mxu0 %v7022_v7  ;;  %5771 = vmatprep.subr.bf16.mxu1 %v6297_v48 }
 0xdc9   :  { %5749 = vmatpush1.bf16.msra.mxu0 %v7025_v44  ;;  %5773 = vmatpush3.bf16.msra.mxu1 %v7053_v10 }
 0xdca   :  { %5775 = vmatprep.subr.bf16.mxu0 %v6977_v59  ;;  %5806 = vmatprep.subr.bf16.mxu1 %v6297_v48 }
 0xe7f   :  { %v3138_v24 = vpop.f32.mrb[26].mxu0  ;;  %v3209_v30 = vpop.f32.mrb[42].mxu1 }
 0xe80   :  { %v5931_v32 = vadd.f32 %v7129_v21, %v3138_v24  ;;  %v3140_v5 = vpop.f32.mrb[27].mxu0  ;;  %v4721_v41 = vpop.f32.mrb[43].mxu1  ;;  %v3210_v59 = vadd.f32 %v3209_v30, %v7136_v52  ;;  %v3578_v24 = vld [vmem:[#allocation11 + $0x40] sm:$0xff]  ;;  %v3579_v30 = vld [vmem:[#allocation11 + $0x48] sm:$0xff] }
 0xe81   :  { %v5933_v50 = vadd.f32 %v7131_v34, %v3140_v5  ;;  %v3580_v5 = vld [vmem:[#allocation11 + $0x50] sm:$0xff]  ;;  %v3581_v41 = vld [vmem:[#allocation11 + $0x58] sm:$0xff] }
 0xe82   :  { %v3824_v46 = vmul.f32 -1.442695, %v5931_v32  ;;  %v5843_v32 = vpack.c.bf16 %v3579_v30, %v3578_v24  ;;  %v3831_v30 = vld [vmem:[%s7472_s12] ss:$0 sm:$0xff] }
 0xe83   :  { %v3825_v57 = vmul.f32 -1.442695, %v5933_v50  ;;  %v3582_v50 = vld [vmem:[#allocation11 + $0x60] sm:$0xff] }
 0xe84   :  { %6117 = vpow2.f32 %v3824_v46  ;;  %v5846_v46 = vpack.c.bf16 %v3581_v41, %v3580_v5 }
 0xe85   :  { %6119 = vpow2.f32 %v3825_v57  ;;  %v3583_v57 = vld [vmem:[#allocation11 + $0x68] sm:$0xff] }
 0xe8e   :  { %v6118_v9 = vpop.eup %6117 }
 0xe8f   :  { %v3217_v58 = vadd.f32 1.0, %v6118_v9  ;;  %v6120_v55 = vpop.eup %6119  ;;  %v5849_v9 = vpack.c.bf16 %v3583_v57, %v3582_v50 }
 0xe90   :  { %v3224_v6 = vadd.f32 1.0, %v6120_v55  ;;  %v3585_v55 = vld [vmem:[#allocation11 + $0x78] sm:$0xff] }
 0xe91   :  { %6121 = vrcp.f32 %v3217_v58  ;;  %v3584_v58 = vld [vmem:[#allocation11 + $0x70] sm:$0xff] }
 0xe92   :  { %6123 = vrcp.f32 %v3224_v6  ;;  %v5852_v6 = vpack.c.bf16 %v3585_v55, %v3584_v58 }
 0xe9b   :  { %v6122_v12 = vpop.eup %6121 }
 0xe9c   :  { %v3227_v13 = vmul.f32 %v6122_v12, %v3210_v59  ;;  %v6124_v36 = vpop.eup %6123  ;;  %v3664_v59 = vld [vmem:[#allocation13] sm:$0xff]  ;;  %v3665_v12 = vld [vmem:[#allocation13 + $0x8] sm:$0xff] }
 0xe9d   :  { %v3230_v38 = vsub.f32 1.0, %v6124_v36  ;;  %v3232_v11 = vmul.f32 %v6124_v36, %v7324_v29 }
 0xe9e   :  { %v3228_v17 = vadd.f32 %v3227_v13, %v2179_v4  ;;  %v3666_v4 = vld [vmem:[#allocation13 + $0x10] sm:$0xff]  ;;  %v5855_v13 = vpack.c.bf16 %v3665_v12, %v3664_v59 }
 0xea0   :  { %6125 = vtanh.f32 %v3228_v17  ;;  %v3667_v17 = vld [vmem:[#allocation13 + $0x18] sm:$0xff] }
 0xea1   :  { %v5858_v36 = vpack.c.bf16 %v3667_v17, %v3666_v4 }
 0xeaa   :  { %v6126_v15 = vpop.eup %6125 }
 0xeab   :  { %v3231_v16 = vmul.f32 %v6126_v15, %v3230_v38  ;;  %v3668_v38 = vld [vmem:[#allocation13 + $0x20] sm:$0xff]  ;;  %v3669_v15 = vld [vmem:[#allocation13 + $0x28] sm:$0xff] }
 0xead   :  { %v7369_v39 = vadd.f32 %v3232_v11, %v3231_v16  ;;  %v5861_v16 = vpack.c.bf16 %v3669_v15, %v3668_v38  ;;  %v3670_v11 = vld [vmem:[#allocation13 + $0x30] sm:$0xff] }
 0xeaf   :  { %3304 = vmatmul.mubr.f32.vlgmr.msra.gmra.mrb[28].mxu0 %v7369_v39  ;;  %4755 = vmatmul.mubr.f32.vlgmr.msra.gmra.mrb[44].mxu1 %v7369_v39 }
 0xeb0   :  { %5777 = vmatpush1.bf16.msra.mxu0 %v6979_v25  ;;  %5808 = vmatpush3.bf16.msra.mxu1 %v7017_v43 }
 0xeb1   :  { %5779 = vmatprep.subr.bf16.mxu0 %v6983_v27  ;;  %5809 = vmatprep.subr.bf16.mxu1 %v6297_v48 }
 0xeb2   :  { %3470 = vmatprep.mubr.f32.mxu0 %v6296_v0  ;;  %4789 = vmatprep.mubr.msk.f32.mxu1 %vm6298_vm1, %v6296_v0 }
 0xeb4   :  { %5781 = vmatpush1.bf16.msra.mxu0 %v6985_v22  ;;  %5811 = vmatpush3.bf16.msra.mxu1 %v7028_v18 }
 0xeb5   :  { %5783 = vmatprep.subr.bf16.mxu0 %v6989_v33  ;;  %5812 = vmatprep.subr.bf16.mxu1 %v6297_v48 }
 0xeb8   :  { %5785 = vmatpush1.bf16.msra.mxu0 %v6991_v45  ;;  %5814 = vmatpush3.bf16.msra.mxu1 %v7034_v49 }
 0xeb9   :  { %5787 = vmatprep.subr.bf16.mxu0 %v6995_v56  ;;  %5815 = vmatprep.subr.bf16.mxu1 %v6297_v48 }
 0xebc   :  { %5789 = vmatpush1.bf16.msra.mxu0 %v6997_v3  ;;  %5817 = vmatpush3.bf16.msra.mxu1 %v7037_v28 }
 0xebd   :  { %5791 = vmatprep.subr.bf16.mxu0 %v7001_v14  ;;  %5818 = vmatprep.subr.bf16.mxu1 %v6297_v48 }
 0xec0   :  { %5793 = vmatpush1.bf16.msra.mxu0 %v7003_v26  ;;  %5820 = vmatpush3.bf16.msra.mxu1 %v7041_v23 }
 0xec1   :  { %5795 = vmatprep.subr.bf16.mxu0 %v7007_v1  ;;  %5821 = vmatprep.subr.bf16.mxu1 %v6297_v48 }
 0xec4   :  { %5797 = vmatpush1.bf16.msra.mxu0 %v7009_v35  ;;  %5823 = vmatpush3.bf16.msra.mxu1 %v7045_v42 }
 0xec5   :  { %5799 = vmatprep.subr.bf16.mxu0 %v7013_v47  ;;  %5824 = vmatprep.subr.bf16.mxu1 %v6297_v48 }
 0xec8   :  { %5801 = vmatpush1.bf16.msra.mxu0 %v7015_v62  ;;  %5826 = vmatpush3.bf16.msra.mxu1 %v7049_v61 }
 0xec9   :  { %5803 = vmatprep.subr.bf16.mxu0 %v7022_v7  ;;  %5827 = vmatprep.subr.bf16.mxu1 %v6297_v48  ;;  %v2184_v7 = vadd.f32 %v7127_v19, %v7139_v20  ;;  %v3571_v19 = vld [vmem:[#allocation11 + $0x8] sm:$0xff] }
 0xeca   :  { %v5831_v40 = vpack.c.bf16 %v3571_v19, %v3570_v2  ;;  %v2189_v19 = vadd.f32 %v7123_v53, %v7139_v20  ;;  %v3830_v53 = vld [vmem:[%s7470_s10] ss:$0 sm:$0xff] }
 0xecc   :  { %5805 = vmatpush1.bf16.msra.mxu0 %v7025_v44  ;;  %5829 = vmatpush3.bf16.msra.mxu1 %v7053_v10 }
 0xecd   :  { %5830 = vmatprep.subr.bf16.mxu0 %v6297_v48  ;;  %5854 = vmatprep.subr.bf16.mxu1 %v6297_v48 }
 0xf82   :  { %v3305_v25 = vpop.f32.mrb[28].mxu0  ;;  %v3376_v27 = vpop.f32.mrb[44].mxu1 }
 0xf83   :  { %v5935_v22 = vadd.f32 %v7129_v21, %v3305_v25  ;;  %v3307_v33 = vpop.f32.mrb[29].mxu0  ;;  %v4756_v45 = vpop.f32.mrb[45].mxu1  ;;  %v3377_v62 = vadd.f32 %v3376_v27, %v7136_v52  ;;  %v3672_v27 = vld [vmem:[#allocation13 + $0x40] sm:$0xff] }
 0xf84   :  { %v5937_v3 = vadd.f32 %v7131_v34, %v3307_v33  ;;  %v3674_v45 = vld [vmem:[#allocation13 + $0x50] sm:$0xff] }
 0xf85   :  { %v3826_v56 = vmul.f32 -1.442695, %v5935_v22  ;;  %v3673_v22 = vld [vmem:[#allocation13 + $0x48] sm:$0xff] }
 0xf86   :  { %v3827_v14 = vmul.f32 -1.442695, %v5937_v3  ;;  %v5867_v33 = vpack.c.bf16 %v3673_v22, %v3672_v27 }
 0xf87   :  { %6127 = vpow2.f32 %v3826_v56  ;;  %v3675_v56 = vld [vmem:[#allocation13 + $0x58] sm:$0xff] }
 0xf88   :  { %6129 = vpow2.f32 %v3827_v14  ;;  %v5870_v3 = vpack.c.bf16 %v3675_v56, %v3674_v45  ;;  %v3676_v14 = vld [vmem:[#allocation13 + $0x60] sm:$0xff] }
 0xf91   :  { %v6128_v26 = vpop.eup %6127 }
 0xf92   :  { %v3384_v1 = vadd.f32 1.0, %v6128_v26  ;;  %v6130_v35 = vpop.eup %6129  ;;  %v3677_v26 = vld [vmem:[#allocation13 + $0x68] sm:$0xff] }
 0xf93   :  { %v3391_v47 = vadd.f32 1.0, %v6130_v35 }
 0xf94   :  { %6131 = vrcp.f32 %v3384_v1  ;;  %v5873_v1 = vpack.c.bf16 %v3677_v26, %v3676_v14 }
 0xf95   :  { %6133 = vrcp.f32 %v3391_v47 }
 0xf9e   :  { %v6132_v43 = vpop.eup %6131 }
 0xf9f   :  { %v3394_v44 = vmul.f32 %v6132_v43, %v3377_v62  ;;  %v6134_v49 = vpop.eup %6133 }
 0xfa0   :  { %v3397_v28 = vsub.f32 1.0, %v6134_v49  ;;  %v3399_v61 = vmul.f32 %v6134_v49, %v7369_v39  ;;  %v3671_v39 = vld [vmem:[#allocation13 + $0x38] sm:$0xff] }
 0xfa1   :  { %v3395_v18 = vadd.f32 %v3394_v44, %v2184_v7  ;;  %v5864_v25 = vpack.c.bf16 %v3671_v39, %v3670_v11 }
 0xfa3   :  { %6135 = vtanh.f32 %v3395_v18 }
 0xfad   :  { %v6136_v23 = vpop.eup %6135 }
 0xfae   :  { %v3398_v42 = vmul.f32 %v6136_v23, %v3397_v28 }
 0xfb0   :  { %v7414_v10 = vadd.f32 %v3399_v61, %v3398_v42 }
 0xfb2   :  { %3471 = vmatmul.mubr.f32.vlgmr.msra.gmra.mrb[30].mxu0 %v7414_v10  ;;  %4790 = vmatmul.mubr.f32.vlgmr.msra.gmra.mrb[46].mxu1 %v7414_v10 }
 0xfb3   :  { %4824 = vmatprep.mubr.msk.f32.mxu0 %vm6298_vm1, %v6296_v0  ;;  %4859 = vmatprep.mubr.msk.f32.mxu1 %vm6298_vm1, %v6296_v0  ;;  %v3577_v0 = vld [vmem:[#allocation11 + $0x38] sm:$0xff] }
 0xfb4   :  { %5832 = vmatpush3.bf16.msra.mxu0 %v5831_v40  ;;  %v5840_v29 = vpack.c.bf16 %v3577_v0, %v3576_v8  ;;  %5856 = vmatpush3.bf16.msra.mxu1 %v5855_v13  ;;  %v3679_v8 = vld [vmem:[#allocation13 + $0x78] sm:$0xff] }
 0xfb5   :  { %5833 = vmatprep.subr.bf16.mxu0 %v6297_v48  ;;  %5857 = vmatprep.subr.bf16.mxu1 %v6297_v48 }
 0xfb8   :  { %5835 = vmatpush3.bf16.msra.mxu0 %v5834_v63  ;;  %5859 = vmatpush3.bf16.msra.mxu1 %v5858_v36 }
 0xfb9   :  { %5836 = vmatprep.subr.bf16.mxu0 %v6297_v48  ;;  %5860 = vmatprep.subr.bf16.mxu1 %v6297_v48 }
 0xfbc   :  { %5838 = vmatpush3.bf16.msra.mxu0 %v5837_v31  ;;  %5862 = vmatpush3.bf16.msra.mxu1 %v5861_v16  ;;  %v3678_v31 = vld [vmem:[#allocation13 + $0x70] sm:$0xff] }
 0xfbd   :  { %5839 = vmatprep.subr.bf16.mxu0 %v6297_v48  ;;  %5863 = vmatprep.subr.bf16.mxu1 %v6297_v48  ;;  %v5876_v0 = vpack.c.bf16 %v3679_v8, %v3678_v31 }
 0xfc0   :  { %5841 = vmatpush3.bf16.msra.mxu0 %v5840_v29  ;;  %5865 = vmatpush3.bf16.msra.mxu1 %v5864_v25 }
 0xfc1   :  { %5842 = vmatprep.subr.bf16.mxu0 %v6297_v48  ;;  %5866 = vmatprep.subr.bf16.mxu1 %v6297_v48 }
 0xfc4   :  { %5844 = vmatpush3.bf16.msra.mxu0 %v5843_v32  ;;  %5868 = vmatpush3.bf16.msra.mxu1 %v5867_v33 }
 0xfc5   :  { %5845 = vmatprep.subr.bf16.mxu0 %v6297_v48  ;;  %5869 = vmatprep.subr.bf16.mxu1 %v6297_v48 }
 0xfc8   :  { %5847 = vmatpush3.bf16.msra.mxu0 %v5846_v46  ;;  %5871 = vmatpush3.bf16.msra.mxu1 %v5870_v3 }
 0xfc9   :  { %5848 = vmatprep.subr.bf16.mxu0 %v6297_v48  ;;  %5872 = vmatprep.subr.bf16.mxu1 %v6297_v48 }
 0xfcc   :  { %5850 = vmatpush3.bf16.msra.mxu0 %v5849_v9  ;;  %5874 = vmatpush3.bf16.msra.mxu1 %v5873_v1 }
 0xfcd   :  { %5851 = vmatprep.subr.bf16.mxu0 %v6297_v48  ;;  %5875 = vmatprep.subr.bf16.mxu1 %v6297_v48 }
 0xfd0   :  { %5853 = vmatpush3.bf16.msra.mxu0 %v5852_v6  ;;  %5877 = vmatpush3.bf16.msra.mxu1 %v5876_v0 }
0x1085   :  { %v3472_v35 = vpop.f32.mrb[30].mxu0  ;;  %v3543_v47 = vpop.f32.mrb[46].mxu1 }
0x1086   :  { %v5939_v62 = vadd.f32 %v7129_v21, %v3472_v35  ;;  %v3474_v43 = vpop.f32.mrb[31].mxu0  ;;  %v4791_v7 = vpop.f32.mrb[47].mxu1  ;;  %v3544_v2 = vadd.f32 %v3543_v47, %v7136_v52 }
0x1087   :  { %v5941_v18 = vadd.f32 %v7131_v34, %v3474_v43 }
0x1088   :  { %v3828_v44 = vmul.f32 -1.442695, %v5939_v62 }
0x1089   :  { %v3829_v49 = vmul.f32 -1.442695, %v5941_v18 }
0x108a   :  { %6137 = vpow2.f32 %v3828_v44 }
0x108b   :  { %6139 = vpow2.f32 %v3829_v49 }
0x1094   :  { %v6138_v28 = vpop.eup %6137 }
0x1095   :  { %v3551_v23 = vadd.f32 1.0, %v6138_v28  ;;  %v6140_v42 = vpop.eup %6139 }
0x1096   :  { %v3558_v61 = vadd.f32 1.0, %v6140_v42 }
0x1097   :  { %6141 = vrcp.f32 %v3551_v23 }
0x1098   :  { %6143 = vrcp.f32 %v3558_v61 }
0x10a1   :  { %v6142_v48 = vpop.eup %6141 }
0x10a2   :  { %v3561_v21 = vmul.f32 %v6142_v48, %v3544_v2  ;;  %v6144_v60 = vpop.eup %6143 }
0x10a3   :  { %v3564_v34 = vsub.f32 1.0, %v6144_v60  ;;  %v3566_v37 = vmul.f32 %v6144_v60, %v7414_v10 }
0x10a4   :  { %v3562_v40 = vadd.f32 %v3561_v21, %v2189_v19 }
0x10a6   :  { %6145 = vtanh.f32 %v3562_v40 }
0x10b0   :  { %v6146_v51 = vpop.eup %6145 }
0x10b1   :  { %v3565_v63 = vmul.f32 %v6146_v51, %v3564_v34 }
0x10b3   :  { %v3567_v54 = vadd.f32 %v3566_v37, %v3565_v63 }
0x10b5   :  { %4825 = vmatmul.mubr.f32.vlgmr.msra.gmra.mrb[32].mxu0 %v3567_v54 }
0x1188   :  { %v3659_v52 = vpop.f32.mrb[32].mxu0 }
0x1189   :  { %v3660_v20 = vadd.f32 %v3830_v53, %v3659_v52  ;;  %v4826_v29 = vpop.f32.mrb[33].mxu0 }
0x118b   :  { %v3663_v24 = vmax.f32 %v3660_v20, 0.0 }
0x118d   :  { %4860 = vmatmul.mubr.f32.vlgmr.msra.gmra.mrb[48].mxu1 %v3663_v24 }
0x1260   :  { %v3753_v10 = vpop.f32.mrb[48].mxu1 }
0x1261   :  { %v3754_v32 = vadd.f32 %v3831_v30, %v3753_v10  ;;  %v4861_v5 = vpop.f32.mrb[49].mxu1 }
0x1263   :  { %3757 = vst [vmem:[#allocation14] sm:$0xff] %v3754_v32 }
0x1264   :  { %6268 = shalt.err (!%p6265_p2)
}
0x1265   :  { %s6269_s19 = scalar_lea.hbm %s7473_s13, 128 }
0x1266   :  { %p6270_p3 = scmp.ne.s32.totalorder %s7473_s13, %s6269_s19  ;;  %p6273_p4 = scmp.lt.u32.totalorder %s6269_s19, %s7473_s13 }
0x1268   :  { %p6275_p5 = pnand %p6273_p4, %p6270_p3 }
0x126a   :  { %6278 = shalt.err (!%p6275_p5)
}
0x126b   :  { %3767 = dma.vmem_to_hbm [thread:$0]  %s3765_s28, 128, %s7473_s13, [#allocation7]  }
0x126c   :  { %6285 = dma.done.wait [#allocation7], 128  }
0x126d   :  { %6286 = vsyncadd [#allocation7], 4294967168 }
0x126e   :  { %3771 = vsyncpa [#allocation6], 1 }
0x126f   :  { %3772 = vsyncpa [#allocation9], 1 }
0x1270   :  { %3773 = vsyncpa [#allocation12], 1 }
0x1271   :  { %3774 = vsyncpa [#allocation7], 1 }

</bundles_post_ra>
